<compile_context>
chip_gen: v6e
topology: v6e:2x2x1
jax: 0.10.0
libtpu: 0.0.40
codegen_flags: <defaults>
</compile_context>

<pallas_src>
import functools

import jax
import jax.numpy as jnp
from jax import lax
from jax.experimental import pallas as pl
from jax.experimental.pallas import tpu as pltpu

NUM_HEADS = 3
LEAKY_SLOPE = 0.2


# ----------------------------------------------------------------------------
# Pallas kernel: per-batch graph reasoning (GCB + LTB + fuse 1x1 conv)
# ----------------------------------------------------------------------------
def _argr_graph_kernel(x_ref, ang_ref, wbig_ref, wuv_ref, wfx_ref, wfg_ref,
                       wfl_ref, bf_ref, out_ref, *, Cp, leaky_slope,
                       approx_recip):
    f32 = jnp.float32
    bf16 = jnp.bfloat16

    def recip(x):
        # approx=True routes the divide to the EUP (separate bundle slot);
        # set approx_recip=False for bit-exact softmax normalization.
        return pl.reciprocal(x, approx=True) if approx_recip else 1.0 / x

    X = x_ref[0]                       # [N, Cp] f32 nodes, current batch element
    Xb = X.astype(bf16)

    # One wide bf16 projection: [theta | phi | 3 GCB heads | 3 LTB heads].
    proj = jnp.dot(Xb, wbig_ref[...], preferred_element_type=f32)     # [N, 8Cp]
    theta = proj[:, 0:Cp]
    phi_x = proj[:, Cp:2 * Cp]
    Xg = proj[:, 2 * Cp:5 * Cp].astype(bf16)                          # [N, 3Cp]
    Xl = proj[:, 5 * Cp:8 * Cp].astype(bf16)                          # [N, 3Cp]

    # ---------------- Global Context Block ----------------
    # theta @ phi_x.T without materializing the transpose (contract lane axes).
    e = lax.dot_general(theta.astype(bf16), phi_x.astype(bf16),
                        (((1,), (1,)), ((), ())),
                        preferred_element_type=f32)                   # [N, N]
    # softmax over dim=1 (rows sum to 1), reductions along lanes
    e = e - jnp.max(e, axis=1, keepdims=True)
    p = jnp.exp(e)
    A = (p * recip(jnp.sum(p, axis=1, keepdims=True))).astype(bf16)

    g3 = jnp.maximum(jnp.dot(A, Xg, preferred_element_type=f32), 0.0)  # [N, 3Cp]
    g = g3[:, 0:Cp] + g3[:, Cp:2 * Cp] + g3[:, 2 * Cp:3 * Cp]          # head sum (VPU)

    # ---------------- Local Topology Block with angle ----------------
    # e2[u,v] = wu.X[u] + wv.X[v] + ang[u,v]; build e2^T directly so the column
    # softmax over u becomes a lane-direction softmax on e2t.
    wu = wuv_ref[0:1, :]                                               # [1, Cp]
    wv = wuv_ref[1:2, :]                                               # [1, Cp]
    su_row = lax.dot_general(wu, X, (((1,), (1,)), ((), ())),
                             preferred_element_type=f32)               # [1, N]
    sv_col = lax.dot_general(X, wv, (((1,), (1,)), ((), ())),
                             preferred_element_type=f32)               # [N, 1]
    e2t = sv_col + su_row + ang_ref[...].astype(f32)   # e2t[v,u] == e2[u,v]
    e2t = jnp.maximum(e2t, leaky_slope * e2t)          # LeakyReLU(0.2)
    e2t = e2t - jnp.max(e2t, axis=1, keepdims=True)
    p2 = jnp.exp(e2t)
    A2t = p2 * recip(jnp.sum(p2, axis=1, keepdims=True))               # [N, N] f32

    # One cheap f32 XLU transpose back to A2 so the apply is a standard
    # (1,0)-contraction bf16 MXU matmul.
    A2 = jnp.transpose(A2t).astype(bf16)
    l3 = jnp.maximum(jnp.dot(A2, Xl, preferred_element_type=f32), 0.0)  # [N, 3Cp]
    l = l3[:, 0:Cp] + l3[:, Cp:2 * Cp] + l3[:, 2 * Cp:3 * Cp]

    # ---------------- fuse 1x1 conv on concat([X, g, l]) ----------------
    out = (jnp.dot(Xb, wfx_ref[...], preferred_element_type=f32)
           + jnp.dot(g.astype(bf16), wfg_ref[...], preferred_element_type=f32)
           + jnp.dot(l.astype(bf16), wfl_ref[...], preferred_element_type=f32)
           + bf_ref[...])
    out_ref[0] = out.astype(out_ref.dtype)


def _vmem_cap_bytes():
    """Generation-aware physical VMEM capacity (conservative fallback)."""
    try:
        return int(pltpu.get_tpu_info().vmem_capacity_bytes)
    except Exception:
        return 64 << 20    # v7x per-TensorCore budget; safe lower bound


def argr_graph_pallas(nodes_p, ang_t, w_big, wuv, wf_x, wf_g, wf_l, bf, *,
                      leaky_slope=LEAKY_SLOPE, approx_recip=True):
    """nodes_p: [B, N, Cp] f32 (channel-padded); returns [B, N, Cp] f32."""
    B, N, Cp = nodes_p.shape
    C8 = 8 * Cp
    kernel = functools.partial(_argr_graph_kernel, Cp=Cp,
                               leaky_slope=leaky_slope,
                               approx_recip=approx_recip)

    # Explicit VMEM budget: buffered inputs/outputs + live f32 NxN temporaries
    # + the [N,3Cp]/[N,8Cp] slabs, clamped below the generation's physical VMEM
    # with ~8 MiB headroom.
    vmem_cap = _vmem_cap_bytes()
    vmem_est = int(
        2 * 4 * N * Cp           # nodes block (double-buffered)
        + 2 * N * N              # ang_t (bf16, single-buffered)
        + 2 * Cp * C8            # W_big (bf16)
        + 3 * 2 * Cp * Cp        # fuse sub-weights (bf16)
        + 4 * 2 * Cp + 4 * Cp    # wuv rows + bias
        + 2 * 4 * N * Cp         # output block (double-buffered)
        + 4 * 8 * N * N          # live f32 NxN score/prob temporaries
        + 4 * 14 * N * Cp        # proj + head slabs + partial sums
        + (4 << 20))             # spill / misc headroom
    vmem_limit = int(min(max(vmem_est, 16 << 20), vmem_cap - (8 << 20)))

    out_shape = jax.ShapeDtypeStruct((B, N, Cp), jnp.float32)

    def build(single_buffer_invariants):
        def inv(shape):
            # Batch-invariant operands: constant index_map; request a single
            # VMEM copy instead of the default double buffer.
            if single_buffer_invariants:
                return pl.BlockSpec(shape, lambda b: (0,) * len(shape),
                                    pipeline_mode=pl.Buffered(1))
            return pl.BlockSpec(shape, lambda b: (0,) * len(shape))

        return pl.pallas_call(
            kernel,
            out_shape=out_shape,
            grid=(B,),
            in_specs=[
                pl.BlockSpec((1, N, Cp), lambda b: (b, 0, 0)),  # nodes
                inv((N, N)),        # angular term (transposed, bf16)
                inv((Cp, C8)),      # fused projection weights (bf16)
                inv((2, Cp)),       # [wu; wv] rows (f32)
                inv((Cp, Cp)),      # fuse W (X part, bf16)
                inv((Cp, Cp)),      # fuse W (g part, bf16)
                inv((Cp, Cp)),      # fuse W (l part, bf16)
                inv((1, Cp)),       # fuse bias (f32)
            ],
            out_specs=pl.BlockSpec((1, N, Cp), lambda b: (b, 0, 0)),
            compiler_params=pltpu.CompilerParams(
                dimension_semantics=("parallel",),
                vmem_limit_bytes=vmem_limit),
        )

    args = (nodes_p, ang_t, w_big, wuv, wf_x, wf_g, wf_l, bf)
    try:
        out = build(True)(*args)
        return jax.block_until_ready(out)
    except Exception:
        # Fallback: some builds may reject single-buffered pipeline_mode;
        # double-buffering the invariants only costs VMEM, not correctness.
        return build(False)(*args)


# ----------------------------------------------------------------------------
# Glue (plain JAX): maxpool, phi grid + angular map, weight plumbing, upsample
# ----------------------------------------------------------------------------
def make_bilinear_kernel(stride):
    factor = (2 * stride - stride % 2) / (2.0 * stride)
    og = jnp.arange(stride, dtype=jnp.float32)
    filt = 1.0 - jnp.abs(og / factor - (stride - 1) / (2.0 * factor))
    return filt[None, :] * filt[:, None]  # [s, s]


def _pad2(w, pad_r, pad_c):
    if pad_r == 0 and pad_c == 0:
        return w
    return jnp.pad(w, ((0, pad_r), (0, pad_c)))


def _prep_graph_operands(params, C, Cp):
    """Concat / pad / transpose the module weights into MXU-friendly slabs."""
    pad = Cp - C
    bf16 = jnp.bfloat16

    wt_T = _pad2(params["W_theta"].T, pad, pad)                       # [Cp, Cp]
    wp_T = _pad2(params["W_phi"].T, pad, pad)                         # [Cp, Cp]
    gh_T = jnp.concatenate([_pad2(w.T, pad, pad)
                            for w in params["gcb_heads"]], axis=1)    # [Cp, 3Cp]
    lh_T = jnp.concatenate([_pad2(w.T, pad, pad)
                            for w in params["ltb_heads"]], axis=1)    # [Cp, 3Cp]
    w_big = jnp.concatenate([wt_T, wp_T, gh_T, lh_T], axis=1).astype(bf16)

    wu = jnp.pad(params["W_gamma"][0, 0:C], (0, pad))
    wv = jnp.pad(params["W_gamma"][0, C:2 * C], (0, pad))
    wuv = jnp.stack([wu, wv], axis=0).astype(jnp.float32)             # [2, Cp]

    wf_T = params["fuse_w"].T                                         # [3C, C]
    wf_x = _pad2(wf_T[0:C, :], pad, pad).astype(bf16)                 # [Cp, Cp]
    wf_g = _pad2(wf_T[C:2 * C, :], pad, pad).astype(bf16)
    wf_l = _pad2(wf_T[2 * C:3 * C, :], pad, pad).astype(bf16)
    bf = jnp.pad(params["fuse_b"], (0, pad))[None, :].astype(jnp.float32)
    return w_big, wuv, wf_x, wf_g, wf_l, bf


def argr_forward(feat_map, params, *, stride=2):
    """feat_map: [B, C, H, W] (NCHW, like the PyTorch module)."""
    B, C, H, W = feat_map.shape
    feat_map = feat_map.astype(jnp.float32)
    # TODO(synk): odd H/W path (torch truncating maxpool + nearest F.interpolate)
    # is not implemented; even spatial dims are assumed.
    assert H % 2 == 0 and W % 2 == 0
    Hd, Wd = H // 2, W // 2
    N = Hd * Wd
    assert N % 8 == 0, "N = H/2 * W/2 must be a multiple of 8 (sublane tiling)"

    # MaxPool2d(2, 2)
    feat_down = feat_map.reshape(B, C, Hd, 2, Wd, 2).max(axis=(3, 5))

    # polar angle per downsampled pixel
    ys = jnp.arange(Hd, dtype=jnp.float32)[:, None]
    xs = jnp.arange(Wd, dtype=jnp.float32)[None, :]
    cy, cx = (Hd - 1) / 2.0, (Wd - 1) / 2.0
    phis = jnp.arctan2(ys - cy, xs - cx).reshape(-1)                  # [N]

    # Hoisted batch-invariant angular term, already TRANSPOSED for the kernel
    # (bf16: it is only an additive pre-softmax bias, halves its VMEM/DMA):
    # ang_t[v, u] = wc*cos(phi_u - phi_v) + ws*sin(phi_u - phi_v)
    wc = params["W_gamma"][0, 2 * C]
    ws = params["W_gamma"][0, 2 * C + 1]
    d_t = phis[None, :] - phis[:, None]                               # [N, N]
    ang_t = (wc * jnp.cos(d_t) + ws * jnp.sin(d_t)).astype(jnp.bfloat16)

    nodes = feat_down.transpose(0, 2, 3, 1).reshape(B, N, C)          # [B, N, C]

    # Lane-dense channel padding: C -> multiple of 128 (zero pad; all padded
    # weight rows/cols are zero so the math is unchanged, output is sliced).
    Cp = max(128, ((C + 127) // 128) * 128)
    nodes_p = jnp.pad(nodes, ((0, 0), (0, 0), (0, Cp - C)))

    w_big, wuv, wf_x, wf_g, wf_l, bf = _prep_graph_operands(params, C, Cp)

    out_nodes = argr_graph_pallas(nodes_p, ang_t, w_big, wuv,
                                  wf_x, wf_g, wf_l, bf)
    out_nodes = out_nodes[:, :, :C]                                   # drop pad

    out_down = out_nodes.reshape(B, Hd, Wd, C).transpose(0, 3, 1, 2)  # NCHW

    # depthwise ConvTranspose2d(k=s, stride=s) with bilinear weights:
    # each output s x s block = input pixel * kernel (no overlap).
    kern = make_bilinear_kernel(stride)                               # [s, s]
    up = out_down[:, :, :, None, :, None] * kern[None, None, None, :, None, :]
    return up.reshape(B, C, Hd * stride, Wd * stride)


# ----------------------------------------------------------------------------
# Pure-JAX reference (mirrors the PyTorch forward) for correctness checking
# ----------------------------------------------------------------------------
def argr_forward_reference(feat_map, params, *, stride=2):
    B, C, H, W = feat_map.shape
    Hd, Wd = H // 2, W // 2
    fd = feat_map.reshape(B, C, Hd, 2, Wd, 2).max(axis=(3, 5))
    ys = jnp.arange(Hd, dtype=jnp.float32)[:, None]
    xs = jnp.arange(Wd, dtype=jnp.float32)[None, :]
    cy, cx = (Hd - 1) / 2.0, (Wd - 1) / 2.0
    phis = jnp.arctan2(ys - cy, xs - cx).reshape(-1)
    nodes = fd.transpose(0, 2, 3, 1).reshape(B, Hd * Wd, C)
    N = Hd * Wd

    outs = []
    for b in range(B):
        X = nodes[b]
        # GCB
        theta = X @ params["W_theta"].T
        phi_x = X @ params["W_phi"].T
        A = jax.nn.softmax(theta @ phi_x.T, axis=1)
        g = sum(jnp.maximum(A @ (X @ Wk.T), 0.0) for Wk in params["gcb_heads"])
        # LTB
        Xu = jnp.broadcast_to(X[:, None, :], (N, N, C))
        Xv = jnp.broadcast_to(X[None, :, :], (N, N, C))
        delta = phis[:, None] - phis[None, :]
        pairs = jnp.concatenate(
            [Xu, Xv, jnp.cos(delta)[..., None], jnp.sin(delta)[..., None]], axis=-1)
        e2 = (pairs @ params["W_gamma"].T)[..., 0]
        e2 = jnp.where(e2 > 0, e2, LEAKY_SLOPE * e2)
        A2 = jax.nn.softmax(e2, axis=0)
        l = sum(jnp.maximum(A2 @ (X @ Wk.T), 0.0) for Wk in params["ltb_heads"])
        outs.append(jnp.concatenate([X, g, l], axis=-1))
    fused = jnp.stack(outs, 0)                                    # [B, N, 3C]
    out_down = fused @ params["fuse_w"].T + params["fuse_b"]      # [B, N, C]
    out_down = out_down.reshape(B, Hd, Wd, C).transpose(0, 3, 1, 2)
    kern = make_bilinear_kernel(stride)
    up = out_down[:, :, :, None, :, None] * kern[None, None, None, :, None, :]
    return up.reshape(B, C, Hd * stride, Wd * stride)


# ----------------------------------------------------------------------------
def init_params(key, C, num_heads=NUM_HEADS):
    ks = jax.random.split(key, 5 + 2 * num_heads)
    scale = 0.1
    params = {
        "W_theta": scale * jax.random.normal(ks[0], (C, C), jnp.float32),
        "W_phi": scale * jax.random.normal(ks[1], (C, C), jnp.float32),
        "W_gamma": scale * jax.random.normal(ks[2], (1, 2 * C + 2), jnp.float32),
        "fuse_w": scale * jax.random.normal(ks[3], (C, 3 * C), jnp.float32),
        "fuse_b": scale * jax.random.normal(ks[4], (C,), jnp.float32),
        "gcb_heads": [scale * jax.random.normal(ks[5 + i], (C, C), jnp.float32)
                      for i in range(num_heads)],
        "ltb_heads": [scale * jax.random.normal(ks[5 + num_heads + i], (C, C),
                                                jnp.float32)
                      for i in range(num_heads)],
    }
    return params


if __name__ == "__main__":
    B, C, H, W = 2, 4, 16, 16
    key = jax.random.PRNGKey(0)
    k_x, k_p = jax.random.split(key)
    feat_map = jax.random.normal(k_x, (B, C, H, W), jnp.float32)
    params = init_params(k_p, C)

    out = argr_forward(feat_map, params)
    out = jax.block_until_ready(out)

    ref = argr_forward_reference(feat_map, params)
    assert out.shape == (B, C, H, W), out.shape
    # Tolerance covers bf16 MXU operands + EUP approx reciprocal in softmax.
    err = float(jnp.max(jnp.abs(out - ref)))
    assert jnp.allclose(out, ref, rtol=1e-2, atol=1e-2), err
    print("KERNEL_OK")
</pallas_src>

<mosaic_0001>
module attributes {stable_mosaic.version = 11 : i64} {
  func.func @_argr_graph_kernel(%arg0: i32, %arg1: memref<1x64x128xf32, #tpu.memory_space<vmem>>, %arg2: memref<64x64xbf16, #tpu.memory_space<vmem>>, %arg3: memref<128x1024xbf16, #tpu.memory_space<vmem>>, %arg4: memref<2x128xf32, #tpu.memory_space<vmem>>, %arg5: memref<128x128xbf16, #tpu.memory_space<vmem>>, %arg6: memref<128x128xbf16, #tpu.memory_space<vmem>>, %arg7: memref<128x128xbf16, #tpu.memory_space<vmem>>, %arg8: memref<1x128xf32, #tpu.memory_space<vmem>>, %arg9: memref<1x64x128xf32, #tpu.memory_space<vmem>>) attributes {dimension_semantics = [#tpu.dimension_semantics<parallel>], iteration_bounds = array<i64: 2>, scalar_prefetch = 0 : i64, scratch_operands = 0 : i64, tpu.core_type = #tpu.core_type<tc>, window_params = [{transform_indices = @transform_0, window_bounds = array<i64: 1, 64, 128>}, {pipeline_mode = #tpu.pipeline_mode<synchronous>, transform_indices = @transform_1, window_bounds = array<i64: 64, 64>}, {pipeline_mode = #tpu.pipeline_mode<synchronous>, transform_indices = @transform_2, window_bounds = array<i64: 128, 1024>}, {pipeline_mode = #tpu.pipeline_mode<synchronous>, transform_indices = @transform_3, window_bounds = array<i64: 2, 128>}, {pipeline_mode = #tpu.pipeline_mode<synchronous>, transform_indices = @transform_4, window_bounds = array<i64: 128, 128>}, {pipeline_mode = #tpu.pipeline_mode<synchronous>, transform_indices = @transform_5, window_bounds = array<i64: 128, 128>}, {pipeline_mode = #tpu.pipeline_mode<synchronous>, transform_indices = @transform_6, window_bounds = array<i64: 128, 128>}, {pipeline_mode = #tpu.pipeline_mode<synchronous>, transform_indices = @transform_7, window_bounds = array<i64: 1, 128>}, {transform_indices = @transform_8, window_bounds = array<i64: 1, 64, 128>}]} {
    %c0 = arith.constant 0 : index
    %c0_0 = arith.constant 0 : index
    %c0_1 = arith.constant 0 : index
    %0 = vector.load %arg1[%c0, %c0_0, %c0_1] : memref<1x64x128xf32, #tpu.memory_space<vmem>>, vector<1x64x128xf32>
    %1 = vector.shape_cast %0 : vector<1x64x128xf32> to vector<64x128xf32>
    %2 = arith.truncf %1 : vector<64x128xf32> to vector<64x128xbf16>
    %c0_2 = arith.constant 0 : index
    %c0_3 = arith.constant 0 : index
    %3 = vector.load %arg3[%c0_2, %c0_3] : memref<128x1024xbf16, #tpu.memory_space<vmem>>, vector<128x1024xbf16>
    %cst = arith.constant dense<0.000000e+00> : vector<64x1024xf32>
    %4 = tpu.matmul %2, %3, %cst {dimension_numbers = #tpu.dot_dimension_numbers<[1], [0], [0], [1], [0, 0, 1, 1], [], []>} : vector<64x128xbf16>, vector<128x1024xbf16>, vector<64x1024xf32> -> vector<64x1024xf32>
    %5 = vector.extract_strided_slice %4 {offsets = [0, 0], sizes = [64, 128], strides = [1, 1]} : vector<64x1024xf32> to vector<64x128xf32>
    %6 = vector.extract_strided_slice %4 {offsets = [0, 128], sizes = [64, 128], strides = [1, 1]} : vector<64x1024xf32> to vector<64x128xf32>
    %7 = vector.extract_strided_slice %4 {offsets = [0, 256], sizes = [64, 384], strides = [1, 1]} : vector<64x1024xf32> to vector<64x384xf32>
    %8 = arith.truncf %7 : vector<64x384xf32> to vector<64x384xbf16>
    %9 = vector.extract_strided_slice %4 {offsets = [0, 640], sizes = [64, 384], strides = [1, 1]} : vector<64x1024xf32> to vector<64x384xf32>
    %10 = arith.truncf %9 : vector<64x384xf32> to vector<64x384xbf16>
    %11 = arith.truncf %5 : vector<64x128xf32> to vector<64x128xbf16>
    %12 = arith.truncf %6 : vector<64x128xf32> to vector<64x128xbf16>
    %cst_4 = arith.constant dense<0.000000e+00> : vector<64x64xf32>
    %13 = tpu.matmul %11, %12, %cst_4 {dimension_numbers = #tpu.dot_dimension_numbers<[1], [1], [0], [0], [0, 0, 1, 0], [], []>} : vector<64x128xbf16>, vector<64x128xbf16>, vector<64x64xf32> -> vector<64x64xf32>
    %cst_5 = arith.constant dense<0xFF800000> : vector<64xf32>
    %14 = vector.multi_reduction <maximumf>, %13, %cst_5 [1] : vector<64x64xf32> to vector<64xf32>
    %15 = vector.shape_cast %14 : vector<64xf32> to vector<64x1xf32>
    %16 = vector.broadcast %15 : vector<64x1xf32> to vector<64x64xf32>
    %17 = arith.subf %13, %16 : vector<64x64xf32>
    %18 = math.exp %17 : vector<64x64xf32>
    %cst_6 = arith.constant dense<0.000000e+00> : vector<64xf32>
    %19 = vector.multi_reduction <add>, %18, %cst_6 [1] : vector<64x64xf32> to vector<64xf32>
    %20 = vector.shape_cast %19 : vector<64xf32> to vector<64x1xf32>
    %21 = tpu.reciprocal %20 {approx = true} : vector<64x1xf32> -> vector<64x1xf32>
    %22 = vector.broadcast %21 : vector<64x1xf32> to vector<64x64xf32>
    %23 = arith.mulf %18, %22 : vector<64x64xf32>
    %24 = arith.truncf %23 : vector<64x64xf32> to vector<64x64xbf16>
    %cst_7 = arith.constant dense<0.000000e+00> : vector<64x384xf32>
    %25 = tpu.matmul %24, %8, %cst_7 {dimension_numbers = #tpu.dot_dimension_numbers<[1], [0], [0], [1], [0, 0, 1, 1], [], []>} : vector<64x64xbf16>, vector<64x384xbf16>, vector<64x384xf32> -> vector<64x384xf32>
    %cst_8 = arith.constant 0.000000e+00 : f32
    %26 = vector.broadcast %cst_8 : f32 to vector<64x384xf32>
    %27 = arith.maximumf %25, %26 : vector<64x384xf32>
    %28 = vector.extract_strided_slice %27 {offsets = [0, 0], sizes = [64, 128], strides = [1, 1]} : vector<64x384xf32> to vector<64x128xf32>
    %29 = vector.extract_strided_slice %27 {offsets = [0, 128], sizes = [64, 128], strides = [1, 1]} : vector<64x384xf32> to vector<64x128xf32>
    %30 = arith.addf %28, %29 : vector<64x128xf32>
    %31 = vector.extract_strided_slice %27 {offsets = [0, 256], sizes = [64, 128], strides = [1, 1]} : vector<64x384xf32> to vector<64x128xf32>
    %32 = arith.addf %30, %31 : vector<64x128xf32>
    %c0_9 = arith.constant 0 : index
    %c0_10 = arith.constant 0 : index
    %33 = vector.load %arg4[%c0_9, %c0_10] : memref<2x128xf32, #tpu.memory_space<vmem>>, vector<1x128xf32>
    %c1 = arith.constant 1 : index
    %c0_11 = arith.constant 0 : index
    %34 = vector.load %arg4[%c1, %c0_11] : memref<2x128xf32, #tpu.memory_space<vmem>>, vector<1x128xf32>
    %cst_12 = arith.constant dense<0.000000e+00> : vector<1x64xf32>
    %35 = tpu.matmul %33, %1, %cst_12 {dimension_numbers = #tpu.dot_dimension_numbers<[1], [1], [0], [0], [0, 0, 1, 0], [], []>} : vector<1x128xf32>, vector<64x128xf32>, vector<1x64xf32> -> vector<1x64xf32>
    %cst_13 = arith.constant dense<0.000000e+00> : vector<64x1xf32>
    %36 = tpu.matmul %1, %34, %cst_13 {dimension_numbers = #tpu.dot_dimension_numbers<[1], [1], [0], [0], [0, 0, 1, 0], [], []>} : vector<64x128xf32>, vector<1x128xf32>, vector<64x1xf32> -> vector<64x1xf32>
    %37 = vector.broadcast %36 : vector<64x1xf32> to vector<64x64xf32>
    %38 = vector.broadcast %35 : vector<1x64xf32> to vector<64x64xf32>
    %39 = arith.addf %37, %38 : vector<64x64xf32>
    %c0_14 = arith.constant 0 : index
    %c0_15 = arith.constant 0 : index
    %40 = vector.load %arg2[%c0_14, %c0_15] : memref<64x64xbf16, #tpu.memory_space<vmem>>, vector<64x64xbf16>
    %41 = arith.extf %40 : vector<64x64xbf16> to vector<64x64xf32>
    %42 = arith.addf %39, %41 : vector<64x64xf32>
    %cst_16 = arith.constant 2.000000e-01 : f32
    %43 = vector.broadcast %cst_16 : f32 to vector<64x64xf32>
    %44 = arith.mulf %43, %42 : vector<64x64xf32>
    %45 = arith.maximumf %42, %44 : vector<64x64xf32>
    %cst_17 = arith.constant dense<0xFF800000> : vector<64xf32>
    %46 = vector.multi_reduction <maximumf>, %45, %cst_17 [1] : vector<64x64xf32> to vector<64xf32>
    %47 = vector.shape_cast %46 : vector<64xf32> to vector<64x1xf32>
    %48 = vector.broadcast %47 : vector<64x1xf32> to vector<64x64xf32>
    %49 = arith.subf %45, %48 : vector<64x64xf32>
    %50 = math.exp %49 : vector<64x64xf32>
    %cst_18 = arith.constant dense<0.000000e+00> : vector<64xf32>
    %51 = vector.multi_reduction <add>, %50, %cst_18 [1] : vector<64x64xf32> to vector<64xf32>
    %52 = vector.shape_cast %51 : vector<64xf32> to vector<64x1xf32>
    %53 = tpu.reciprocal %52 {approx = true} : vector<64x1xf32> -> vector<64x1xf32>
    %54 = vector.broadcast %53 : vector<64x1xf32> to vector<64x64xf32>
    %55 = arith.mulf %50, %54 : vector<64x64xf32>
    %56 = tpu.transpose %55, [1, 0] : vector<64x64xf32> -> vector<64x64xf32>
    %57 = arith.truncf %56 : vector<64x64xf32> to vector<64x64xbf16>
    %cst_19 = arith.constant dense<0.000000e+00> : vector<64x384xf32>
    %58 = tpu.matmul %57, %10, %cst_19 {dimension_numbers = #tpu.dot_dimension_numbers<[1], [0], [0], [1], [0, 0, 1, 1], [], []>} : vector<64x64xbf16>, vector<64x384xbf16>, vector<64x384xf32> -> vector<64x384xf32>
    %cst_20 = arith.constant 0.000000e+00 : f32
    %59 = vector.broadcast %cst_20 : f32 to vector<64x384xf32>
    %60 = arith.maximumf %58, %59 : vector<64x384xf32>
    %61 = vector.extract_strided_slice %60 {offsets = [0, 0], sizes = [64, 128], strides = [1, 1]} : vector<64x384xf32> to vector<64x128xf32>
    %62 = vector.extract_strided_slice %60 {offsets = [0, 128], sizes = [64, 128], strides = [1, 1]} : vector<64x384xf32> to vector<64x128xf32>
    %63 = arith.addf %61, %62 : vector<64x128xf32>
    %64 = vector.extract_strided_slice %60 {offsets = [0, 256], sizes = [64, 128], strides = [1, 1]} : vector<64x384xf32> to vector<64x128xf32>
    %65 = arith.addf %63, %64 : vector<64x128xf32>
    %c0_21 = arith.constant 0 : index
    %c0_22 = arith.constant 0 : index
    %66 = vector.load %arg5[%c0_21, %c0_22] : memref<128x128xbf16, #tpu.memory_space<vmem>>, vector<128x128xbf16>
    %cst_23 = arith.constant dense<0.000000e+00> : vector<64x128xf32>
    %67 = tpu.matmul %2, %66, %cst_23 {dimension_numbers = #tpu.dot_dimension_numbers<[1], [0], [0], [1], [0, 0, 1, 1], [], []>} : vector<64x128xbf16>, vector<128x128xbf16>, vector<64x128xf32> -> vector<64x128xf32>
    %68 = arith.truncf %32 : vector<64x128xf32> to vector<64x128xbf16>
    %c0_24 = arith.constant 0 : index
    %c0_25 = arith.constant 0 : index
    %69 = vector.load %arg6[%c0_24, %c0_25] : memref<128x128xbf16, #tpu.memory_space<vmem>>, vector<128x128xbf16>
    %cst_26 = arith.constant dense<0.000000e+00> : vector<64x128xf32>
    %70 = tpu.matmul %68, %69, %cst_26 {dimension_numbers = #tpu.dot_dimension_numbers<[1], [0], [0], [1], [0, 0, 1, 1], [], []>} : vector<64x128xbf16>, vector<128x128xbf16>, vector<64x128xf32> -> vector<64x128xf32>
    %71 = arith.addf %67, %70 : vector<64x128xf32>
    %72 = arith.truncf %65 : vector<64x128xf32> to vector<64x128xbf16>
    %c0_27 = arith.constant 0 : index
    %c0_28 = arith.constant 0 : index
    %73 = vector.load %arg7[%c0_27, %c0_28] : memref<128x128xbf16, #tpu.memory_space<vmem>>, vector<128x128xbf16>
    %cst_29 = arith.constant dense<0.000000e+00> : vector<64x128xf32>
    %74 = tpu.matmul %72, %73, %cst_29 {dimension_numbers = #tpu.dot_dimension_numbers<[1], [0], [0], [1], [0, 0, 1, 1], [], []>} : vector<64x128xbf16>, vector<128x128xbf16>, vector<64x128xf32> -> vector<64x128xf32>
    %75 = arith.addf %71, %74 : vector<64x128xf32>
    %c0_30 = arith.constant 0 : index
    %c0_31 = arith.constant 0 : index
    %76 = vector.load %arg8[%c0_30, %c0_31] : memref<1x128xf32, #tpu.memory_space<vmem>>, vector<1x128xf32>
    %77 = vector.broadcast %76 : vector<1x128xf32> to vector<64x128xf32>
    %78 = arith.addf %75, %77 : vector<64x128xf32>
    %c0_32 = arith.constant 0 : index
    %c0_33 = arith.constant 0 : index
    %c0_34 = arith.constant 0 : index
    %79 = vector.load %arg9[%c0_32, %c0_33, %c0_34] : memref<1x64x128xf32, #tpu.memory_space<vmem>>, vector<1x64x128xf32>
    %80 = vector.shape_cast %79 : vector<1x64x128xf32> to vector<64x128xf32>
    %81 = vector.shape_cast %78 : vector<64x128xf32> to vector<1x64x128xf32>
    tpu.vector_store %arg9[%c0_32, %c0_33, %c0_34], %81 {strides = array<i32>} : memref<1x64x128xf32, #tpu.memory_space<vmem>>, vector<1x64x128xf32>,
    return
  }
  func.func @transform_0(%arg0: i32) -> (i32, i32, i32) {
    %c0_i32 = arith.constant 0 : i32
    %c0_i32_0 = arith.constant 0 : i32
    %c0_i32_1 = arith.constant 0 : i32
    return %arg0, %c0_i32, %c0_i32_0 : i32, i32, i32
  }
  func.func @transform_1(%arg0: i32) -> (i32, i32) {
    %c0_i32 = arith.constant 0 : i32
    %c0_i32_0 = arith.constant 0 : i32
    %c0_i32_1 = arith.constant 0 : i32
    return %c0_i32, %c0_i32_0 : i32, i32
  }
  func.func @transform_2(%arg0: i32) -> (i32, i32) {
    %c0_i32 = arith.constant 0 : i32
    %c0_i32_0 = arith.constant 0 : i32
    %c0_i32_1 = arith.constant 0 : i32
    return %c0_i32, %c0_i32_0 : i32, i32
  }
  func.func @transform_3(%arg0: i32) -> (i32, i32) {
    %c0_i32 = arith.constant 0 : i32
    %c0_i32_0 = arith.constant 0 : i32
    %c0_i32_1 = arith.constant 0 : i32
    return %c0_i32, %c0_i32_0 : i32, i32
  }
  func.func @transform_4(%arg0: i32) -> (i32, i32) {
    %c0_i32 = arith.constant 0 : i32
    %c0_i32_0 = arith.constant 0 : i32
    %c0_i32_1 = arith.constant 0 : i32
    return %c0_i32, %c0_i32_0 : i32, i32
  }
  func.func @transform_5(%arg0: i32) -> (i32, i32) {
    %c0_i32 = arith.constant 0 : i32
    %c0_i32_0 = arith.constant 0 : i32
    %c0_i32_1 = arith.constant 0 : i32
    return %c0_i32, %c0_i32_0 : i32, i32
  }
  func.func @transform_6(%arg0: i32) -> (i32, i32) {
    %c0_i32 = arith.constant 0 : i32
    %c0_i32_0 = arith.constant 0 : i32
    %c0_i32_1 = arith.constant 0 : i32
    return %c0_i32, %c0_i32_0 : i32, i32
  }
  func.func @transform_7(%arg0: i32) -> (i32, i32) {
    %c0_i32 = arith.constant 0 : i32
    %c0_i32_0 = arith.constant 0 : i32
    %c0_i32_1 = arith.constant 0 : i32
    return %c0_i32, %c0_i32_0 : i32, i32
  }
  func.func @transform_8(%arg0: i32) -> (i32, i32, i32) {
    %c0_i32 = arith.constant 0 : i32
    %c0_i32_0 = arith.constant 0 : i32
    %c0_i32_1 = arith.constant 0 : i32
    return %arg0, %c0_i32, %c0_i32_0 : i32, i32, i32
  }
}

module attributes {stable_mosaic.version = 11 : i64} {
  func.func @_argr_graph_kernel(%arg0: i32, %arg1: memref<1x64x128xf32, #tpu.memory_space<vmem>>, %arg2: memref<64x64xbf16, #tpu.memory_space<vmem>>, %arg3: memref<128x1024xbf16, #tpu.memory_space<vmem>>, %arg4: memref<2x128xf32, #tpu.memory_space<vmem>>, %arg5: memref<128x128xbf16, #tpu.memory_space<vmem>>, %arg6: memref<128x128xbf16, #tpu.memory_space<vmem>>, %arg7: memref<128x128xbf16, #tpu.memory_space<vmem>>, %arg8: memref<1x128xf32, #tpu.memory_space<vmem>>, %arg9: memref<1x64x128xf32, #tpu.memory_space<vmem>>) attributes {dimension_semantics = [#tpu.dimension_semantics<parallel>], iteration_bounds = array<i64: 2>, scalar_prefetch = 0 : i64, scratch_operands = 0 : i64, tpu.core_type = #tpu.core_type<tc>, window_params = [{transform_indices = @transform_0, window_bounds = array<i64: 1, 64, 128>}, {pipeline_mode = #tpu.pipeline_mode<synchronous>, transform_indices = @transform_1, window_bounds = array<i64: 64, 64>}, {pipeline_mode = #tpu.pipeline_mode<synchronous>, transform_indices = @transform_2, window_bounds = array<i64: 128, 1024>}, {pipeline_mode = #tpu.pipeline_mode<synchronous>, transform_indices = @transform_3, window_bounds = array<i64: 2, 128>}, {pipeline_mode = #tpu.pipeline_mode<synchronous>, transform_indices = @transform_4, window_bounds = array<i64: 128, 128>}, {pipeline_mode = #tpu.pipeline_mode<synchronous>, transform_indices = @transform_5, window_bounds = array<i64: 128, 128>}, {pipeline_mode = #tpu.pipeline_mode<synchronous>, transform_indices = @transform_6, window_bounds = array<i64: 128, 128>}, {pipeline_mode = #tpu.pipeline_mode<synchronous>, transform_indices = @transform_7, window_bounds = array<i64: 1, 128>}, {transform_indices = @transform_8, window_bounds = array<i64: 1, 64, 128>}]} {
    %c0 = arith.constant 0 : index
    %c0_0 = arith.constant 0 : index
    %c0_1 = arith.constant 0 : index
    %0 = vector.load %arg1[%c0, %c0_0, %c0_1] : memref<1x64x128xf32, #tpu.memory_space<vmem>>, vector<1x64x128xf32>
    %1 = vector.shape_cast %0 : vector<1x64x128xf32> to vector<64x128xf32>
    %2 = arith.truncf %1 : vector<64x128xf32> to vector<64x128xbf16>
    %c0_2 = arith.constant 0 : index
    %c0_3 = arith.constant 0 : index
    %3 = vector.load %arg3[%c0_2, %c0_3] : memref<128x1024xbf16, #tpu.memory_space<vmem>>, vector<128x1024xbf16>
    %cst = arith.constant dense<0.000000e+00> : vector<64x1024xf32>
    %4 = tpu.matmul %2, %3, %cst {dimension_numbers = #tpu.dot_dimension_numbers<[1], [0], [0], [1], [0, 0, 1, 1], [], []>} : vector<64x128xbf16>, vector<128x1024xbf16>, vector<64x1024xf32> -> vector<64x1024xf32>
    %5 = vector.extract_strided_slice %4 {offsets = [0, 0], sizes = [64, 128], strides = [1, 1]} : vector<64x1024xf32> to vector<64x128xf32>
    %6 = vector.extract_strided_slice %4 {offsets = [0, 128], sizes = [64, 128], strides = [1, 1]} : vector<64x1024xf32> to vector<64x128xf32>
    %7 = vector.extract_strided_slice %4 {offsets = [0, 256], sizes = [64, 384], strides = [1, 1]} : vector<64x1024xf32> to vector<64x384xf32>
    %8 = arith.truncf %7 : vector<64x384xf32> to vector<64x384xbf16>
    %9 = vector.extract_strided_slice %4 {offsets = [0, 640], sizes = [64, 384], strides = [1, 1]} : vector<64x1024xf32> to vector<64x384xf32>
    %10 = arith.truncf %9 : vector<64x384xf32> to vector<64x384xbf16>
    %11 = arith.truncf %5 : vector<64x128xf32> to vector<64x128xbf16>
    %12 = arith.truncf %6 : vector<64x128xf32> to vector<64x128xbf16>
    %cst_4 = arith.constant dense<0.000000e+00> : vector<64x64xf32>
    %13 = tpu.matmul %11, %12, %cst_4 {dimension_numbers = #tpu.dot_dimension_numbers<[1], [1], [0], [0], [0, 0, 1, 0], [], []>} : vector<64x128xbf16>, vector<64x128xbf16>, vector<64x64xf32> -> vector<64x64xf32>
    %cst_5 = arith.constant dense<0xFF800000> : vector<64xf32>
    %14 = vector.multi_reduction <maximumf>, %13, %cst_5 [1] : vector<64x64xf32> to vector<64xf32>
    %15 = vector.shape_cast %14 : vector<64xf32> to vector<64x1xf32>
    %16 = vector.broadcast %15 : vector<64x1xf32> to vector<64x64xf32>
    %17 = arith.subf %13, %16 : vector<64x64xf32>
    %18 = math.exp %17 : vector<64x64xf32>
    %cst_6 = arith.constant dense<0.000000e+00> : vector<64xf32>
    %19 = vector.multi_reduction <add>, %18, %cst_6 [1] : vector<64x64xf32> to vector<64xf32>
    %20 = vector.shape_cast %19 : vector<64xf32> to vector<64x1xf32>
    %21 = tpu.reciprocal %20 {approx = true} : vector<64x1xf32> -> vector<64x1xf32>
    %22 = vector.broadcast %21 : vector<64x1xf32> to vector<64x64xf32>
    %23 = arith.mulf %18, %22 : vector<64x64xf32>
    %24 = arith.truncf %23 : vector<64x64xf32> to vector<64x64xbf16>
    %cst_7 = arith.constant dense<0.000000e+00> : vector<64x384xf32>
    %25 = tpu.matmul %24, %8, %cst_7 {dimension_numbers = #tpu.dot_dimension_numbers<[1], [0], [0], [1], [0, 0, 1, 1], [], []>} : vector<64x64xbf16>, vector<64x384xbf16>, vector<64x384xf32> -> vector<64x384xf32>
    %cst_8 = arith.constant 0.000000e+00 : f32
    %26 = vector.broadcast %cst_8 : f32 to vector<64x384xf32>
    %27 = arith.maximumf %25, %26 : vector<64x384xf32>
    %28 = vector.extract_strided_slice %27 {offsets = [0, 0], sizes = [64, 128], strides = [1, 1]} : vector<64x384xf32> to vector<64x128xf32>
    %29 = vector.extract_strided_slice %27 {offsets = [0, 128], sizes = [64, 128], strides = [1, 1]} : vector<64x384xf32> to vector<64x128xf32>
    %30 = arith.addf %28, %29 : vector<64x128xf32>
    %31 = vector.extract_strided_slice %27 {offsets = [0, 256], sizes = [64, 128], strides = [1, 1]} : vector<64x384xf32> to vector<64x128xf32>
    %32 = arith.addf %30, %31 : vector<64x128xf32>
    %c0_9 = arith.constant 0 : index
    %c0_10 = arith.constant 0 : index
    %33 = vector.load %arg4[%c0_9, %c0_10] : memref<2x128xf32, #tpu.memory_space<vmem>>, vector<1x128xf32>
    %c1 = arith.constant 1 : index
    %c0_11 = arith.constant 0 : index
    %34 = vector.load %arg4[%c1, %c0_11] : memref<2x128xf32, #tpu.memory_space<vmem>>, vector<1x128xf32>
    %cst_12 = arith.constant dense<0.000000e+00> : vector<1x64xf32>
    %35 = tpu.matmul %33, %1, %cst_12 {dimension_numbers = #tpu.dot_dimension_numbers<[1], [1], [0], [0], [0, 0, 1, 0], [], []>} : vector<1x128xf32>, vector<64x128xf32>, vector<1x64xf32> -> vector<1x64xf32>
    %cst_13 = arith.constant dense<0.000000e+00> : vector<64x1xf32>
    %36 = tpu.matmul %1, %34, %cst_13 {dimension_numbers = #tpu.dot_dimension_numbers<[1], [1], [0], [0], [0, 0, 1, 0], [], []>} : vector<64x128xf32>, vector<1x128xf32>, vector<64x1xf32> -> vector<64x1xf32>
    %37 = vector.broadcast %36 : vector<64x1xf32> to vector<64x64xf32>
    %38 = vector.broadcast %35 : vector<1x64xf32> to vector<64x64xf32>
    %39 = arith.addf %37, %38 : vector<64x64xf32>
    %c0_14 = arith.constant 0 : index
    %c0_15 = arith.constant 0 : index
    %40 = vector.load %arg2[%c0_14, %c0_15] : memref<64x64xbf16, #tpu.memory_space<vmem>>, vector<64x64xbf16>
    %41 = arith.extf %40 : vector<64x64xbf16> to vector<64x64xf32>
    %42 = arith.addf %39, %41 : vector<64x64xf32>
    %cst_16 = arith.constant 2.000000e-01 : f32
    %43 = vector.broadcast %cst_16 : f32 to vector<64x64xf32>
    %44 = arith.mulf %43, %42 : vector<64x64xf32>
    %45 = arith.maximumf %42, %44 : vector<64x64xf32>
    %cst_17 = arith.constant dense<0xFF800000> : vector<64xf32>
    %46 = vector.multi_reduction <maximumf>, %45, %cst_17 [1] : vector<64x64xf32> to vector<64xf32>
    %47 = vector.shape_cast %46 : vector<64xf32> to vector<64x1xf32>
    %48 = vector.broadcast %47 : vector<64x1xf32> to vector<64x64xf32>
    %49 = arith.subf %45, %48 : vector<64x64xf32>
    %50 = math.exp %49 : vector<64x64xf32>
    %cst_18 = arith.constant dense<0.000000e+00> : vector<64xf32>
    %51 = vector.multi_reduction <add>, %50, %cst_18 [1] : vector<64x64xf32> to vector<64xf32>
    %52 = vector.shape_cast %51 : vector<64xf32> to vector<64x1xf32>
    %53 = tpu.reciprocal %52 {approx = true} : vector<64x1xf32> -> vector<64x1xf32>
    %54 = vector.broadcast %53 : vector<64x1xf32> to vector<64x64xf32>
    %55 = arith.mulf %50, %54 : vector<64x64xf32>
    %56 = tpu.transpose %55, [1, 0] : vector<64x64xf32> -> vector<64x64xf32>
    %57 = arith.truncf %56 : vector<64x64xf32> to vector<64x64xbf16>
    %cst_19 = arith.constant dense<0.000000e+00> : vector<64x384xf32>
    %58 = tpu.matmul %57, %10, %cst_19 {dimension_numbers = #tpu.dot_dimension_numbers<[1], [0], [0], [1], [0, 0, 1, 1], [], []>} : vector<64x64xbf16>, vector<64x384xbf16>, vector<64x384xf32> -> vector<64x384xf32>
    %cst_20 = arith.constant 0.000000e+00 : f32
    %59 = vector.broadcast %cst_20 : f32 to vector<64x384xf32>
    %60 = arith.maximumf %58, %59 : vector<64x384xf32>
    %61 = vector.extract_strided_slice %60 {offsets = [0, 0], sizes = [64, 128], strides = [1, 1]} : vector<64x384xf32> to vector<64x128xf32>
    %62 = vector.extract_strided_slice %60 {offsets = [0, 128], sizes = [64, 128], strides = [1, 1]} : vector<64x384xf32> to vector<64x128xf32>
    %63 = arith.addf %61, %62 : vector<64x128xf32>
    %64 = vector.extract_strided_slice %60 {offsets = [0, 256], sizes = [64, 128], strides = [1, 1]} : vector<64x384xf32> to vector<64x128xf32>
    %65 = arith.addf %63, %64 : vector<64x128xf32>
    %c0_21 = arith.constant 0 : index
    %c0_22 = arith.constant 0 : index
    %66 = vector.load %arg5[%c0_21, %c0_22] : memref<128x128xbf16, #tpu.memory_space<vmem>>, vector<128x128xbf16>
    %cst_23 = arith.constant dense<0.000000e+00> : vector<64x128xf32>
    %67 = tpu.matmul %2, %66, %cst_23 {dimension_numbers = #tpu.dot_dimension_numbers<[1], [0], [0], [1], [0, 0, 1, 1], [], []>} : vector<64x128xbf16>, vector<128x128xbf16>, vector<64x128xf32> -> vector<64x128xf32>
    %68 = arith.truncf %32 : vector<64x128xf32> to vector<64x128xbf16>
    %c0_24 = arith.constant 0 : index
    %c0_25 = arith.constant 0 : index
    %69 = vector.load %arg6[%c0_24, %c0_25] : memref<128x128xbf16, #tpu.memory_space<vmem>>, vector<128x128xbf16>
    %cst_26 = arith.constant dense<0.000000e+00> : vector<64x128xf32>
    %70 = tpu.matmul %68, %69, %cst_26 {dimension_numbers = #tpu.dot_dimension_numbers<[1], [0], [0], [1], [0, 0, 1, 1], [], []>} : vector<64x128xbf16>, vector<128x128xbf16>, vector<64x128xf32> -> vector<64x128xf32>
    %71 = arith.addf %67, %70 : vector<64x128xf32>
    %72 = arith.truncf %65 : vector<64x128xf32> to vector<64x128xbf16>
    %c0_27 = arith.constant 0 : index
    %c0_28 = arith.constant 0 : index
    %73 = vector.load %arg7[%c0_27, %c0_28] : memref<128x128xbf16, #tpu.memory_space<vmem>>, vector<128x128xbf16>
    %cst_29 = arith.constant dense<0.000000e+00> : vector<64x128xf32>
    %74 = tpu.matmul %72, %73, %cst_29 {dimension_numbers = #tpu.dot_dimension_numbers<[1], [0], [0], [1], [0, 0, 1, 1], [], []>} : vector<64x128xbf16>, vector<128x128xbf16>, vector<64x128xf32> -> vector<64x128xf32>
    %75 = arith.addf %71, %74 : vector<64x128xf32>
    %c0_30 = arith.constant 0 : index
    %c0_31 = arith.constant 0 : index
    %76 = vector.load %arg8[%c0_30, %c0_31] : memref<1x128xf32, #tpu.memory_space<vmem>>, vector<1x128xf32>
    %77 = vector.broadcast %76 : vector<1x128xf32> to vector<64x128xf32>
    %78 = arith.addf %75, %77 : vector<64x128xf32>
    %c0_32 = arith.constant 0 : index
    %c0_33 = arith.constant 0 : index
    %c0_34 = arith.constant 0 : index
    %79 = vector.load %arg9[%c0_32, %c0_33, %c0_34] : memref<1x64x128xf32, #tpu.memory_space<vmem>>, vector<1x64x128xf32>
    %80 = vector.shape_cast %79 : vector<1x64x128xf32> to vector<64x128xf32>
    %81 = vector.shape_cast %78 : vector<64x128xf32> to vector<1x64x128xf32>
    tpu.vector_store %arg9[%c0_32, %c0_33, %c0_34], %81 {strides = array<i32>} : memref<1x64x128xf32, #tpu.memory_space<vmem>>, vector<1x64x128xf32>,
    return
  }
  func.func @transform_0(%arg0: i32) -> (i32, i32, i32) {
    %c0_i32 = arith.constant 0 : i32
    %c0_i32_0 = arith.constant 0 : i32
    %c0_i32_1 = arith.constant 0 : i32
    return %arg0, %c0_i32, %c0_i32_0 : i32, i32, i32
  }
  func.func @transform_1(%arg0: i32) -> (i32, i32) {
    %c0_i32 = arith.constant 0 : i32
    %c0_i32_0 = arith.constant 0 : i32
    %c0_i32_1 = arith.constant 0 : i32
    return %c0_i32, %c0_i32_0 : i32, i32
  }
  func.func @transform_2(%arg0: i32) -> (i32, i32) {
    %c0_i32 = arith.constant 0 : i32
    %c0_i32_0 = arith.constant 0 : i32
    %c0_i32_1 = arith.constant 0 : i32
    return %c0_i32, %c0_i32_0 : i32, i32
  }
  func.func @transform_3(%arg0: i32) -> (i32, i32) {
    %c0_i32 = arith.constant 0 : i32
    %c0_i32_0 = arith.constant 0 : i32
    %c0_i32_1 = arith.constant 0 : i32
    return %c0_i32, %c0_i32_0 : i32, i32
  }
  func.func @transform_4(%arg0: i32) -> (i32, i32) {
    %c0_i32 = arith.constant 0 : i32
    %c0_i32_0 = arith.constant 0 : i32
    %c0_i32_1 = arith.constant 0 : i32
    return %c0_i32, %c0_i32_0 : i32, i32
  }
  func.func @transform_5(%arg0: i32) -> (i32, i32) {
    %c0_i32 = arith.constant 0 : i32
    %c0_i32_0 = arith.constant 0 : i32
    %c0_i32_1 = arith.constant 0 : i32
    return %c0_i32, %c0_i32_0 : i32, i32
  }
  func.func @transform_6(%arg0: i32) -> (i32, i32) {
    %c0_i32 = arith.constant 0 : i32
    %c0_i32_0 = arith.constant 0 : i32
    %c0_i32_1 = arith.constant 0 : i32
    return %c0_i32, %c0_i32_0 : i32, i32
  }
  func.func @transform_7(%arg0: i32) -> (i32, i32) {
    %c0_i32 = arith.constant 0 : i32
    %c0_i32_0 = arith.constant 0 : i32
    %c0_i32_1 = arith.constant 0 : i32
    return %c0_i32, %c0_i32_0 : i32, i32
  }
  func.func @transform_8(%arg0: i32) -> (i32, i32, i32) {
    %c0_i32 = arith.constant 0 : i32
    %c0_i32_0 = arith.constant 0 : i32
    %c0_i32_1 = arith.constant 0 : i32
    return %arg0, %c0_i32, %c0_i32_0 : i32, i32, i32
  }
}

</mosaic_0001>

<bundles_post_ra>
// kernel: tpu_custom_call.1
= control target key start
LH: loop header
LB: loop body
LE: loop exit
PB: predicated region body
PF: predicated region fallthrough
CT: control target
= control target key end

     0   :  { %s3951_s0 = inlined_call_operand.hbm [shape: f32[2,64,128], index: 0, kind: input, shape index: {}]   ;;  %s3952_s1 = inlined_call_operand.hbm [shape: bf16[64,64], index: 1, kind: input, shape index: {}]   ;;  %s3953_s2 = inlined_call_operand.hbm [shape: bf16[128,1024], index: 2, kind: input, shape index: {}]   ;;  %s3954_s3 = inlined_call_operand.vmem [shape: f32[2,128], index: 3, kind: input, shape index: {}]   ;;  %s3955_s4 = inlined_call_operand.hbm [shape: bf16[128,128], index: 4, kind: input, shape index: {}]   ;;  %s3956_s5 = inlined_call_operand.hbm [shape: bf16[128,128], index: 5, kind: input, shape index: {}]   ;;  %s3957_s6 = inlined_call_operand.hbm [shape: bf16[128,128], index: 6, kind: input, shape index: {}]   ;;  %s3958_s7 = inlined_call_operand.vmem [shape: f32[1,128], index: 7, kind: input, shape index: {}]   ;;  %s3959_s8 = inlined_call_operand.hbm [shape: f32[2,64,128], index: 8, kind: output, shape index: {}]  }
   0x1   :  { %3964 = sst [smem:[#allocation19_spill]] %s3952_s1 }
   0x2   :  { %3965 = sst [smem:[#allocation20_spill]] %s3953_s2 }
   0x3   :  { %13 = vsyncpa [#allocation3], 0 }
   0x4   :  { %15 = vsyncpa [#allocation3 + $0x1], 0 }
   0x5   :  { %16 = vsyncpa [#allocation6], 0 }
   0x6   :  { %17 = vsyncpa [#allocation9], 0 }
   0x7   :  { %18 = vsyncpa [#allocation12], 0 }
   0x8   :  { %19 = vsyncpa [#allocation4], 0 }
   0x9   :  { %21 = vsyncpa [#allocation4 + $0x1], 0  ;;  %s3347_s27 = smov 0   ;;  %s3349_s28 = smov 0  }
   0xa   :  { %s3351_s29 = smov 0   ;;  %s3353_s30 = smov 0  }
   0xb LB: > { %s3284_s9 = smov [#allocation5]   ;;  %s3368_s11 = sadd.s32 4294967295, %s3282_s30   ;;  %s3282_s30 = sphi %s3353_s30, %s3989_s30   ;;  %s3278_s29 = sphi %s3351_s29, %s3988_s29   ;;  %s3274_s28 = sphi %s3349_s28, %s3987_s28   ;;  %s3270_s27 = sphi %s3347_s27, %s3986_s27  }
   0xc   : > { %s243_s10 = sshll.u32 %s3284_s9, 4  ;;  %p2494_p0 = scmp.ge.s32.totalorder %s3282_s30, 1  ;;  %s244_s10 = int_to_ptr.vmem [resolvable:$true] %s243_s10 }
   0xd   : > { %p3960_p1 = scmp.eq.s32.totalorder %s3368_s11, 0  ;;  %p231_p2 = scmp.lt.s32.totalorder %s3282_s30, 3 }
   0xe   : > { %s3285_s13 = smov [#allocation8]   ;;  %s3286_s16 = smov [#allocation7]  }
   0xf   : > { %p3373_p3 = pnand %p2494_p0, %p231_p2  ;;  %s272_s14 = sshll.u32 %s3285_s13, 4  ;;  %s3386_s14 = int_to_ptr.vmem [resolvable:$true] %s272_s14 }
  0x10   : > { %s256_s17 = sshll.u32 %s3286_s16, 4  ;;  %s3059_s19 = scalar_lea.vmem %s244_s10, 512  ;;  %s3388_s17 = int_to_ptr.vmem [resolvable:$true] %s256_s17 }
  0x11   : > { %s3966_s12 = scalar_select %p3373_p3, 1, 0 }
  0x12   : > { %p2876_p5 = pneg %p3373_p3  ;;  %p3060_p8 = scmp.ne.s32.totalorder %s244_s10, %s3059_s19 }
  0x13   : > { %p3067_p11 = scmp.lt.s32.totalorder %s244_s10, %s244_s10  ;;  %p3068_p12 = scmp.lt.s32.totalorder %s3059_s19, %s3059_s19 }
  0x14   : > { %p3382_p6 = pnand %p2876_p5, %p3960_p1 }
  0x15   : > { %p3069_p13 = por %p3068_p12, %p3067_p11 }
  0x16   : > { %p3392_p7 = pneg %p3382_p6 }
  0x18   : > { %p3062_p9 = pnand %p3060_p8, %p3392_p7 }
  0x1a   : > { %p3063_p10 = pneg %p3062_p9 }
  0x1c   : > { %p3070_p0 = pnand %p3069_p13, %p3063_p10 }
  0x1e   : > { %3073 = shalt.err (!%p3070_p0)
}
  0x1f   : > { %s3287_s20 = smov 64   ;;  %s3288_s21 = smov 4  }
  0x20   : > { %s3969_s1 = sld [smem:[#allocation19_spill]]  ;;  %s3085_s24 = scalar_lea.vmem %s3386_s14, 1024 }
  0x21   : > { %p3086_p2 = scmp.ne.s32.totalorder %s3386_s14, %s3085_s24  ;;  %p3093_p9 = scmp.lt.s32.totalorder %s3386_s14, %s3386_s14 }
  0x22   : > { %p3094_p10 = scmp.lt.s32.totalorder %s3085_s24, %s3085_s24 }
  0x23   : > { %p3088_p5 = pnand %p3086_p2, %p3392_p7 }
  0x24   : > { %p3095_p11 = por %p3094_p10, %p3093_p9 }
  0x25   : > { %p3089_p8 = pneg %p3088_p5 }
  0x26   : > { %2879 = dma.hbm_to_vmem [thread:$0]  (!%p3382_p6), %s3969_s1, 512, %s244_s10, [#allocation6], %s3287_s20, %s3287_s20, %s3288_s21  }
  0x27   : > { %p3096_p12 = pnand %p3095_p11, %p3089_p8 }
  0x29   : > { %3099 = shalt.err (!%p3096_p12)
}
  0x2a   : > { %2885 = dma.hbm_to_vmem [thread:$0]  (!%p3382_p6), %s3955_s4, 1024, %s3386_s14, [#allocation9], %s3287_s20, %s3287_s20, %s3288_s21  }
  0x2b   : > { %s3111_s9 = scalar_lea.vmem %s3388_s17, 8192  ;;  %p3119_p5 = scmp.lt.s32.totalorder %s3388_s17, %s3388_s17 }
  0x2c   : > { %p3112_p13 = scmp.ne.s32.totalorder %s3388_s17, %s3111_s9  ;;  %p3120_p8 = scmp.lt.s32.totalorder %s3111_s9, %s3111_s9 }
  0x2e   : > { %p3114_p0 = pnand %p3112_p13, %p3392_p7  ;;  %p3121_p9 = por %p3120_p8, %p3119_p5 }
  0x30   : > { %p3115_p2 = pneg %p3114_p0 }
  0x32   : > { %p3122_p10 = pnand %p3121_p9, %p3115_p2 }
  0x34   : > { %3125 = shalt.err (!%p3122_p10)
}
  0x35   : > { %s3289_s10 = smov 512   ;;  %s3290_s13 = smov 32  }
  0x36   : > { %s3970_s2 = sld [smem:[#allocation20_spill]]  ;;  %s3291_s14 = smov [#allocation10]  }
  0x37   : > { %s285_s22 = sshll.u32 %s3291_s14, 4  ;;  %s3292_s23 = smov [#allocation11]   ;;  %s286_s22 = int_to_ptr.vmem [resolvable:$true] %s285_s22 }
  0x38   : > { %s298_s24 = sshll.u32 %s3292_s23, 4  ;;  %s3137_s25 = scalar_lea.vmem %s286_s22, 1024  ;;  %s299_s24 = int_to_ptr.vmem [resolvable:$true] %s298_s24 }
  0x39   : > { %p3138_p11 = scmp.ne.s32.totalorder %s286_s22, %s3137_s25  ;;  %p3145_p0 = scmp.lt.s32.totalorder %s286_s22, %s286_s22 }
  0x3a   : > { %p3146_p2 = scmp.lt.s32.totalorder %s3137_s25, %s3137_s25 }
  0x3b   : > { %p3140_p12 = pnand %p3138_p11, %p3392_p7 }
  0x3c   : > { %2882 = dma.hbm_to_vmem [thread:$0]  (!%p3382_p6), %s3970_s2, 8192, %s3388_s17, [#allocation6], %s3289_s10, %s3289_s10, %s3290_s13  }
  0x3d   : > { %p3141_p13 = pneg %p3140_p12  ;;  %p3147_p5 = por %p3146_p2, %p3145_p0 }
  0x3f   : > { %p3148_p8 = pnand %p3147_p5, %p3141_p13 }
  0x41   : > { %3151 = shalt.err (!%p3148_p8)
}
  0x42   : > { %2888 = dma.hbm_to_vmem [thread:$0]  (!%p3382_p6), %s3956_s5, 1024, %s286_s22, [#allocation9], %s3287_s20, %s3287_s20, %s3288_s21  }
  0x43   : > { %s3163_s9 = scalar_lea.vmem %s299_s24, 1024  ;;  %p3171_p12 = scmp.lt.s32.totalorder %s299_s24, %s299_s24 }
  0x44   : > { %p3164_p9 = scmp.ne.s32.totalorder %s299_s24, %s3163_s9  ;;  %p3172_p0 = scmp.lt.s32.totalorder %s3163_s9, %s3163_s9 }
  0x46   : > { %p3166_p10 = pnand %p3164_p9, %p3392_p7  ;;  %p3173_p13 = por %p3172_p0, %p3171_p12 }
  0x48   : > { %p3167_p11 = pneg %p3166_p10 }
  0x4a   : > { %p3174_p2 = pnand %p3173_p13, %p3167_p11 }
  0x4c   : > { %3177 = shalt.err (!%p3174_p2)
}
  0x4d   : > { %2891 = dma.hbm_to_vmem [thread:$0]  (!%p3382_p6), %s3957_s6, 1024, %s299_s24, [#allocation12], %s3287_s20, %s3287_s20, %s3288_s21  }
  0x4e   : > { %s2493_s15 = sadd.s32 4294967294, %s3282_s30   ;;  %s3455_s18 = sadd.s32 1, %s3282_s30  }
  0x4f   : > { %s34_s16 = sadd.s32 1, %s3278_s29  ;;  %s31_s19 = ssub.s32 %s3282_s30, %s3455_s18 }
  0x50   : > { %p41_p7 = scmp.ne.s32.totalorder %s3278_s29, %s3274_s28  ;;  %p32_p5 = scmp.eq.s32.totalorder %s31_s19, 0 }
  0x51   : > { %p42_p8 = scmp.eq.s32.totalorder %s3282_s30, 0  ;;  %p47_p9 = scmp.ne.s32.totalorder %s3274_s28, %s3270_s27 }
  0x52   : > { %p218_p10 = scmp.eq.s32.totalorder %s3368_s11, 1  ;;  %p224_p0 = scmp.eq.s32.totalorder %s2493_s15, 1 }
  0x53   : > { %s3467_s14 = scalar_select %p32_p5, %s3278_s29, %s34_s16  }
  0x54   : > { %p43_p11 = por %p42_p8, %p41_p7  ;;  %p3471_p12 = por %p3960_p1, %p47_p9 }
  0x55   : > { %p3475_p6 = por %p218_p10, %p41_p7  ;;  %p2905_p13 = scmp.lt.s32.totalorder %s3282_s30, 2 }
  0x56   : > { %s3971_s22 = scalar_select %p3471_p12, 1, 0 }
  0x57   : > { %s3972_s20 = scalar_select %p3475_p6, 1, 0 }
  0x58   : > { %s315_s21 = sand.u32 1, %s3278_s29   ;;  %p3481_p2 = por %p224_p0, %p47_p9 }
  0x59   : > { %s2501_s24 = sshll.u32 %s315_s21, 6  ;;  %s2623_s25 = sshll.u32 %s3282_s30, 10 }
  0x5a   : > { %s3973_s23 = scalar_select %p3481_p2, 1, 0 }
  0x5b   : > { %s3489_s9 = scalar_lea.hbm %s3951_s0, %s2623_s25  ;;  %s319_s10 = scalar_lea.vmem [#allocation2], %s2501_s24 }
  0x5c   : > { %s326_s13 = sshll.u32 %s319_s10, 4  ;;  %p3491_p7 = pnand %p2905_p13, %p43_p11  ;;  %s3495_s13 = int_to_ptr.vmem [resolvable:$true] %s326_s13 }
  0x5d   : > { %s3497_s16 = scalar_lea.sflag [#allocation3], %s315_s21  ;;  %s3178_s19 = scalar_lea.hbm %s3489_s9, 1024 }
  0x5e   : > { %p3179_p5 = scmp.ne.s32.totalorder %s3489_s9, %s3178_s19  ;;  %p3180_p8 = pneg %p3491_p7 }
  0x5f   : > { %s3183_s24 = scalar_lea.hbm %s3951_s0, 2048  ;;  %p3184_p11 = scmp.lt.s32.totalorder %s3489_s9, %s3951_s0 }
  0x60   : > { %p3181_p9 = pnand %p3180_p8, %p3179_p5  ;;  %p3185_p0 = scmp.lt.s32.totalorder %s3183_s24, %s3178_s19 }
  0x62   : > { %p3182_p10 = pneg %p3181_p9  ;;  %p3186_p13 = por %p3185_p0, %p3184_p11 }
  0x64   : > { %p3187_p4 = pnand %p3186_p13, %p3182_p10 }
  0x66   : > { %3190 = shalt.err (!%p3187_p4)
}
  0x67   : > { %s3191_s21 = scalar_lea.vmem %s3495_s13, 1024  ;;  %s3293_s1 = smov [#allocation2]  }
  0x68   : > { %p3192_p1 = scmp.ne.s32.totalorder %s3495_s13, %s3191_s21  ;;  %s3196_s2 = sshll.u32 %s3293_s1, 4  ;;  %s3197_s2 = int_to_ptr.vmem [resolvable:$false] %s3196_s2 }
  0x69   : > { %s3198_s25 = scalar_lea.vmem %s3197_s2, 2048  ;;  %p3199_p9 = scmp.lt.s32.totalorder %s3495_s13, %s3197_s2 }
  0x6a   : > { %p3194_p2 = pnand %p3192_p1, %p3180_p8  ;;  %p3200_p6 = scmp.lt.s32.totalorder %s3198_s25, %s3191_s21 }
  0x6c   : > { %p3195_p5 = pneg %p3194_p2  ;;  %p3201_p12 = por %p3200_p6, %p3199_p9 }
  0x6e   : > { %p3202_p3 = pnand %p3201_p12, %p3195_p5 }
  0x70   : > { %3205 = shalt.err (!%p3202_p3)
}
  0x71   : > { %s3294_s19 = smov 128   ;;  %s3295_s17 = smov 8  }
  0x72   : > { %2895 = dma.hbm_to_vmem [thread:$0]  (!%p3491_p7), %s3489_s9, 1024, %s3495_s13, %s3497_s16, %s3294_s19, %s3294_s19, %s3295_s17  }
  0x73   : > { %p3975_p1 = scmp.ne.s32.totalorder %s3966_s12, 0 }
  0x74   : > { %s3521_s1 = sand.u32 (!%p3975_p1), 1, %s3274_s28   ;;  %p3976_p3 = scmp.ne.s32.totalorder (!%p3975_p1), %s3971_s22, 0 }
  0x75   : > { %338 = sbr.rel (%p3975_p1) target bundleno = 2066 (0x812), region = 52  ;;  %s2505_s2 = sshll.u32 (!%p3975_p1), %s3521_s1, 6 }
  0x76   : > { %s341_s24 = scalar_lea.sflag (!%p3975_p1), [#allocation3], %s3521_s1  ;;  %s3527_s26 = scalar_lea.vmem (!%p3975_p1), [#allocation2], %s2505_s2 }
  0x7a   : > { %3249 = dma.done.wait (%p3976_p3), %s341_s24, 1024  }
  0x7b   : > { %3251 = vsyncadd (%p3976_p3), %s341_s24, 4294966272  ;;  %p3977_p4 = scmp.eq.s32.totalorder %s3368_s11, 0 }
  0x7d   : > { %3253 = dma.done.wait (%p3977_p4), [#allocation6], 8704   ;;  %p3978_p12 = pmov %p3977_p4 }
  0x7e   : > { %p3979_p6 = pmov %p3977_p4 }
  0x7f   : > { %3255 = vsyncadd (%p3978_p12), [#allocation6], 4294958592 }
  0x80   : > { %3257 = dma.done.wait (%p3979_p6), [#allocation9], 2048   ;;  %p3980_p2 = pmov %p3977_p4 }
  0x82   : > { %3259 = vsyncadd (%p3980_p2), [#allocation9], 4294965248  ;;  %p3981_p7 = pmov %p3980_p2 }
  0x83   : > { %p3982_p8 = pmov %p3980_p2 }
  0x84   : > { %3261 = dma.done.wait (%p3981_p7), [#allocation12], 1024  }
  0x85   : > { %3263 = vsyncadd (%p3982_p8), [#allocation12], 4294966272  ;;  %v3296_v0 = vmov 0   ;;  %v466_v1 = vld [vmem:[#allocation7 + $0x1c0] sm:$0xff]  ;;  %v468_v31 = vld [vmem:[#allocation7 + $0x1d0] sm:$0xff]  ;;  %vm1183_vm0 = vcmask 523264  }
  0x86   : > { %826 = vmatprep.mubr.bf16.mxu0 %v3296_v0  ;;  %899 = vmatprep.mubr.bf16.mxu1 %v3296_v0  ;;  %v470_v2 = vld [vmem:[#allocation7 + $0x1e0] sm:$0xff]  ;;  %v472_v32 = vld [vmem:[#allocation7 + $0x1f0] sm:$0xff]  ;;  %v3551_v35 = vld [vmem:[%s3527_s26 + $0x8] sm:$0xff]  ;;  %vm3298_vm1 = vmmov 0   ;;  %s3891_s10 = scalar_lea.vmem [#allocation13], %s2505_s2  ;;  %s2624_s25 = sshll.u32 %s3368_s11, 10 }
  0x87   : > { %v458_v3 = vld [vmem:[#allocation7 + $0x180] sm:$0xff]  ;;  %v2569_v4 = vcombine.high %v466_v1, %v470_v2  ;;  %v2568_v5 = vcombine.low %v466_v1, %v470_v2  ;;  %v2573_v37 = vcombine.high %v468_v31, %v472_v32  ;;  %v460_v38 = vld [vmem:[#allocation7 + $0x190] sm:$0xff]  ;;  %v2572_v41 = vcombine.low %v468_v31, %v472_v32  ;;  %v3563_v46 = vld [vmem:[%s3527_s26 + $0x18] sm:$0xff]  ;;  %s2372_s21 = sshll.u32 %s3891_s10, 4  ;;  %s3906_s2 = scalar_lea.hbm %s3959_s8, %s2624_s25  ;;  %s3900_s21 = int_to_ptr.vmem [resolvable:$true] %s2372_s21 }
  0x88   : > { %v462_v6 = vld [vmem:[#allocation7 + $0x1a0] sm:$0xff]  ;;  %v464_v39 = vld [vmem:[#allocation7 + $0x1b0] sm:$0xff]  ;;  %v3575_v57 = vld [vmem:[%s3527_s26 + $0x28] sm:$0xff]  ;;  %s2359_s24 = scalar_lea.sflag [#allocation4], %s3521_s1  ;;  %p3983_p11 = scmp.ne.s32.totalorder %s3972_s20, 0 }
  0x89   : > { %v2561_v7 = vcombine.high %v458_v3, %v462_v6  ;;  %v450_v8 = vld [vmem:[#allocation7 + $0x140] sm:$0xff]  ;;  %794 = vmatprep.subr.bf16.mxu0 %v2569_v4  ;;  %v2560_v10 = vcombine.low %v458_v3, %v462_v6  ;;  %v2565_v42 = vcombine.high %v460_v38, %v464_v39  ;;  %v452_v43 = vld [vmem:[#allocation7 + $0x150] sm:$0xff]  ;;  %v2564_v47 = vcombine.low %v460_v38, %v464_v39  ;;  %s3299_s11 = smov [#allocation13]  }
  0x8a   : > { %v454_v9 = vld [vmem:[#allocation7 + $0x160] sm:$0xff]  ;;  %795 = vmatpush1.bf16.msra.mxu0 %v2568_v5  ;;  %v456_v44 = vld [vmem:[#allocation7 + $0x170] sm:$0xff]  ;;  %v3587_v5 = vld [vmem:[%s3527_s26 + $0x38] sm:$0xff]  ;;  %s3210_s12 = sshll.u32 %s3299_s11, 4  ;;  %s3211_s12 = int_to_ptr.vmem [resolvable:$false] %s3210_s12 }
  0x8b   : > { %796 = vmatprep.subr.bf16.mxu0 %v2561_v7  ;;  %v2553_v11 = vcombine.high %v450_v8, %v454_v9  ;;  %v442_v12 = vld [vmem:[#allocation7 + $0x100] sm:$0xff]  ;;  %v2552_v14 = vcombine.low %v450_v8, %v454_v9  ;;  %v3560_v45 = vld [vmem:[%s3527_s26 + $0x10] sm:$0xff]  ;;  %v2557_v48 = vcombine.high %v452_v43, %v456_v44  ;;  %v2556_v52 = vcombine.low %v452_v43, %v456_v44  ;;  %s3212_s22 = scalar_lea.vmem %s3211_s12, 2048  ;;  %p3213_p5 = scmp.lt.s32.totalorder %s3900_s21, %s3211_s12 }
  0x8c   : > { %v446_v13 = vld [vmem:[#allocation7 + $0x120] sm:$0xff]  ;;  %v444_v49 = vld [vmem:[#allocation7 + $0x110] sm:$0xff]  ;;  %v3567_v51 = vpack.c.bf16 %v3563_v46, %v3560_v45 }
  0x8d   : > { %v2545_v15 = vcombine.high %v442_v12, %v446_v13  ;;  %v434_v16 = vld [vmem:[#allocation7 + $0xc0] sm:$0xff]  ;;  %v2544_v18 = vcombine.low %v442_v12, %v446_v13  ;;  %v448_v50 = vld [vmem:[#allocation7 + $0x130] sm:$0xff] }
  0x8e   : > { %797 = vmatpush1.bf16.msra.mxu0 %v2560_v10  ;;  %v438_v17 = vld [vmem:[#allocation7 + $0xe0] sm:$0xff]  ;;  %v2549_v53 = vcombine.high %v444_v49, %v448_v50  ;;  %v436_v54 = vld [vmem:[#allocation7 + $0xd0] sm:$0xff]  ;;  %v2548_v58 = vcombine.low %v444_v49, %v448_v50 }
  0x8f   : > { %798 = vmatprep.subr.bf16.mxu0 %v2553_v11  ;;  %v426_v19 = vld [vmem:[#allocation7 + $0x80] sm:$0xff]  ;;  %v2537_v20 = vcombine.high %v434_v16, %v438_v17  ;;  %v2536_v22 = vcombine.low %v434_v16, %v438_v17  ;;  %v440_v55 = vld [vmem:[#allocation7 + $0xf0] sm:$0xff]  ;;  %v459_v16 = vld [vmem:[#allocation7 + $0x188] sm:$0xff] }
  0x90   : > { %v430_v21 = vld [vmem:[#allocation7 + $0xa0] sm:$0xff]  ;;  %v2541_v59 = vcombine.high %v436_v54, %v440_v55  ;;  %v428_v60 = vld [vmem:[#allocation7 + $0x90] sm:$0xff]  ;;  %v2540_v63 = vcombine.low %v436_v54, %v440_v55 }
  0x91   : > { %v418_v23 = vld [vmem:[#allocation7 + $0x40] sm:$0xff]  ;;  %v2529_v25 = vcombine.high %v426_v19, %v430_v21  ;;  %v2528_v26 = vcombine.low %v426_v19, %v430_v21  ;;  %v432_v61 = vld [vmem:[#allocation7 + $0xb0] sm:$0xff]  ;;  %v463_v19 = vld [vmem:[#allocation7 + $0x1a8] sm:$0xff] }
  0x92   : > { %799 = vmatpush1.bf16.msra.mxu0 %v2552_v14  ;;  %v422_v24 = vld [vmem:[#allocation7 + $0x60] sm:$0xff]  ;;  %v2533_v1 = vcombine.high %v428_v60, %v432_v61  ;;  %v420_v2 = vld [vmem:[#allocation7 + $0x50] sm:$0xff]  ;;  %v2532_v6 = vcombine.low %v428_v60, %v432_v61  ;;  %v467_v14 = vld [vmem:[#allocation7 + $0x1c8] sm:$0xff] }
  0x93   : > { %800 = vmatprep.subr.bf16.mxu0 %v2545_v15  ;;  %v410_v27 = vld [vmem:[#allocation7] sm:$0xff]  ;;  %v2521_v29 = vcombine.high %v418_v23, %v422_v24  ;;  %v2520_v30 = vcombine.low %v418_v23, %v422_v24  ;;  %v424_v3 = vld [vmem:[#allocation7 + $0x70] sm:$0xff]  ;;  %v471_v15 = vld [vmem:[#allocation7 + $0x1e8] sm:$0xff]  ;;  %v2562_v23 = vcombine.low %v459_v16, %v463_v19 }
  0x94   : > { %v414_v28 = vld [vmem:[#allocation7 + $0x20] sm:$0xff]  ;;  %v3584_v4 = vld [vmem:[%s3527_s26 + $0x30] sm:$0xff]  ;;  %v2525_v7 = vcombine.high %v420_v2, %v424_v3  ;;  %v2524_v11 = vcombine.low %v420_v2, %v424_v3  ;;  %v2571_v17 = vcombine.high %v467_v14, %v471_v15  ;;  %v451_v21 = vld [vmem:[#allocation7 + $0x148] sm:$0xff] }
  0x95   : > { %v2513_v33 = vcombine.high %v410_v27, %v414_v28  ;;  %v3548_v34 = vld [vmem:[%s3527_s26] sm:$0xff]  ;;  %v2512_v36 = vcombine.low %v410_v27, %v414_v28  ;;  %v412_v8 = vld [vmem:[#allocation7 + $0x10] sm:$0xff]  ;;  %v3591_v10 = vpack.c.bf16 %v3587_v5, %v3584_v4 }
  0x96   : > { %801 = vmatpush1.bf16.msra.mxu0 %v2544_v18  ;;  %v3555_v40 = vpack.c.bf16 %v3551_v35, %v3548_v34  ;;  %v3572_v56 = vld [vmem:[%s3527_s26 + $0x20] sm:$0xff]  ;;  %v416_v9 = vld [vmem:[#allocation7 + $0x30] sm:$0xff]  ;;  %v2570_v18 = vcombine.low %v467_v14, %v471_v15  ;;  %867 = vmatprep.subr.bf16.mxu1 %v2571_v17  ;;  %s3206_s26 = scalar_lea.vmem %s3900_s21, 1024 }
  0x97   : > { %802 = vmatprep.subr.bf16.mxu0 %v2537_v20  ;;  %v3579_v62 = vpack.c.bf16 %v3575_v57, %v3572_v56  ;;  %v2517_v12 = vcombine.high %v412_v8, %v416_v9  ;;  %v2516_v13 = vcombine.low %v412_v8, %v416_v9  ;;  %v2563_v20 = vcombine.high %v459_v16, %v463_v19  ;;  %p3207_p10 = scmp.ne.s32.totalorder %s3900_s21, %s3206_s26  ;;  %p3214_p9 = scmp.lt.s32.totalorder %s3212_s22, %s3206_s26 }
  0x98   : > { %868 = vmatpush1.bf16.msra.mxu1 %v2570_v18 }
  0x99   : > { %869 = vmatprep.subr.bf16.mxu1 %v2563_v20  ;;  %p3208_p0 = pnand %p3207_p10, %p3983_p11  ;;  %p3215_p1 = por %p3214_p9, %p3213_p5 }
  0x9a   : > { %803 = vmatpush1.bf16.msra.mxu0 %v2536_v22  ;;  %v455_v22 = vld [vmem:[#allocation7 + $0x168] sm:$0xff] }
  0x9b   : > { %804 = vmatprep.subr.bf16.mxu0 %v2529_v25  ;;  %v2555_v24 = vcombine.high %v451_v21, %v455_v22  ;;  %v2554_v25 = vcombine.low %v451_v21, %v455_v22  ;;  %v443_v21 = vld [vmem:[#allocation7 + $0x108] sm:$0xff]  ;;  %p3209_p13 = pneg %p3208_p0 }
  0x9c   : > { %870 = vmatpush1.bf16.msra.mxu1 %v2562_v23  ;;  %v447_v22 = vld [vmem:[#allocation7 + $0x128] sm:$0xff] }
  0x9d   : > { %871 = vmatprep.subr.bf16.mxu1 %v2555_v24  ;;  %v2547_v23 = vcombine.high %v443_v21, %v447_v22  ;;  %v2546_v24 = vcombine.low %v443_v21, %v447_v22  ;;  %p3216_p3 = pnand %p3215_p1, %p3209_p13 }
  0x9e   : > { %805 = vmatpush1.bf16.msra.mxu0 %v2528_v26 }
  0x9f   : > { %806 = vmatprep.subr.bf16.mxu0 %v2521_v29 }
  0xa0   : > { %872 = vmatpush1.bf16.msra.mxu1 %v2554_v25  ;;  %v435_v25 = vld [vmem:[#allocation7 + $0xc8] sm:$0xff] }
  0xa1   : > { %873 = vmatprep.subr.bf16.mxu1 %v2547_v23  ;;  %v421_v23 = vld [vmem:[#allocation7 + $0x58] sm:$0xff] }
  0xa2   : > { %807 = vmatpush1.bf16.msra.mxu0 %v2520_v30 }
  0xa3   : > { %808 = vmatprep.subr.bf16.mxu0 %v2513_v33 }
  0xa4   : > { %874 = vmatpush1.bf16.msra.mxu1 %v2546_v24  ;;  %v425_v24 = vld [vmem:[#allocation7 + $0x78] sm:$0xff] }
  0xa6   : > { %809 = vmatpush1.bf16.msra.mxu0 %v2512_v36 }
  0xa7   : > { %940 = vmatprep.subr.bf16.mxu0 %v2573_v37 }
  0xa9   : > { %827 = vmatmul.mubr.bf16.vlgmr.msra.gmra.mxu0 %v3555_v40 }
  0xaa   : > { %836 = vmatprep.mubr.bf16.mxu0 %v3296_v0  ;;  %941 = vmatpush1.bf16.msra.mxu0 %v2572_v41 }
  0xab   : > { %942 = vmatprep.subr.bf16.mxu0 %v2565_v42 }
  0xae   : > { %943 = vmatpush1.bf16.msra.mxu0 %v2564_v47 }
  0xaf   : > { %944 = vmatprep.subr.bf16.mxu0 %v2557_v48 }
  0xb1   : > { %837 = vmatmul.mubr.bf16.gmra.mxu0 %v3567_v51 }
  0xb2   : > { %846 = vmatprep.mubr.bf16.mxu0 %v3296_v0  ;;  %945 = vmatpush1.bf16.msra.mxu0 %v2556_v52 }
  0xb3   : > { %946 = vmatprep.subr.bf16.mxu0 %v2549_v53 }
  0xb6   : > { %947 = vmatpush1.bf16.msra.mxu0 %v2548_v58 }
  0xb7   : > { %948 = vmatprep.subr.bf16.mxu0 %v2541_v59 }
  0xb9   : > { %847 = vmatmul.mubr.bf16.gmra.mxu0 %v3579_v62 }
  0xba   : > { %856 = vmatprep.mubr.bf16.mxu0 %v3296_v0  ;;  %949 = vmatpush1.bf16.msra.mxu0 %v2540_v63 }
  0xbb   : > { %950 = vmatprep.subr.bf16.mxu0 %v2533_v1 }
  0xbe   : > { %951 = vmatpush1.bf16.msra.mxu0 %v2532_v6 }
  0xbf   : > { %952 = vmatprep.subr.bf16.mxu0 %v2525_v7 }
  0xc1   : > { %857 = vmatmul.mubr.bf16.gmra.mxu0 %v3591_v10 }
  0xc2   : > { %953 = vmatpush1.bf16.msra.mxu0 %v2524_v11  ;;  %972 = vmatprep.mubr.bf16.mxu0 %v3296_v0 }
  0xc3   : > { %954 = vmatprep.subr.bf16.mxu0 %v2517_v12 }
  0xc6   : > { %955 = vmatpush1.bf16.msra.mxu0 %v2516_v13 }
  0xc9   : > { %973 = vmatmul.mubr.bf16.vlgmr.msra.gmra.mxu0 %v3555_v40 }
  0xca   : > { %982 = vmatprep.mubr.bf16.mxu0 %v3296_v0 }
  0xd1   : > { %983 = vmatmul.mubr.bf16.gmra.mxu0 %v3567_v51 }
  0xd2   : > { %992 = vmatprep.mubr.bf16.mxu0 %v3296_v0 }
  0xd9   : > { %993 = vmatmul.mubr.bf16.gmra.mxu0 %v3579_v62 }
  0xda   : > { %1002 = vmatprep.mubr.bf16.mxu0 %v3296_v0 }
  0xe1   : > { %1003 = vmatmul.mubr.bf16.gmra.mxu0 %v3591_v10 }
 0x169   : > { %v828_v26 = vpop.f32.mrf.mxu0 }
 0x16b   : > { %v830_v27 = vpop.f32.mrf.mxu0 }
 0x16d   : > { %v832_v28 = vpop.f32.mrf.mxu0 }
 0x16e   : > { %v1110_v29 = vpack.c.bf16 %v832_v28, %v828_v26  ;;  %v439_v26 = vld [vmem:[#allocation7 + $0xe8] sm:$0xff] }
 0x16f   : > { %v834_v30 = vpop.f32.mrf.mxu0  ;;  %v2538_v28 = vcombine.low %v435_v25, %v439_v26 }
 0x170   : > { %2721 = vmatprep.mubr.bf16.mxu0 %v1110_v29  ;;  %v1114_v3 = vpack.c.bf16 %v834_v30, %v830_v27  ;;  %v2539_v27 = vcombine.high %v435_v25, %v439_v26  ;;  %v427_v29 = vld [vmem:[#allocation7 + $0x88] sm:$0xff]  ;;  %v2527_v26 = vcombine.high %v421_v23, %v425_v24 }
 0x171   : > { %v838_v31 = vpop.f32.mrf.mxu0  ;;  %v431_v30 = vld [vmem:[#allocation7 + $0xa8] sm:$0xff] }
 0x172   : > { %875 = vmatprep.subr.bf16.mxu1 %v2539_v27  ;;  %v413_v27 = vld [vmem:[#allocation7 + $0x18] sm:$0xff] }
 0x173   : > { %v840_v32 = vpop.f32.mrf.mxu0  ;;  %876 = vmatpush1.bf16.msra.mxu1 %v2538_v28  ;;  %v417_v28 = vld [vmem:[#allocation7 + $0x38] sm:$0xff] }
 0x175   : > { %v842_v33 = vpop.f32.mrf.mxu0 }
 0x176   : > { %v1111_v15 = vpack.c.bf16 %v842_v33, %v838_v31  ;;  %v2531_v31 = vcombine.high %v427_v29, %v431_v30  ;;  %v419_v33 = vld [vmem:[#allocation7 + $0x48] sm:$0xff] }
 0x177   : > { %v844_v36 = vpop.f32.mrf.mxu0 }
 0x178   : > { %v1115_v59 = vpack.c.bf16 %v844_v36, %v840_v32  ;;  %v2530_v32 = vcombine.low %v427_v29, %v431_v30  ;;  %877 = vmatprep.subr.bf16.mxu1 %v2531_v31  ;;  %v423_v36 = vld [vmem:[#allocation7 + $0x68] sm:$0xff]  ;;  %v2526_v29 = vcombine.low %v421_v23, %v425_v24  ;;  %v2519_v30 = vcombine.high %v413_v27, %v417_v28 }
 0x179   : > { %v848_v37 = vpop.f32.mrf.mxu0  ;;  %v2518_v31 = vcombine.low %v413_v27, %v417_v28 }
 0x17a   : > { %878 = vmatpush1.bf16.msra.mxu1 %v2530_v32 }
 0x17b   : > { %v850_v38 = vpop.f32.mrf.mxu0 }
 0x17d   : > { %v852_v39 = vpop.f32.mrf.mxu0 }
 0x17e   : > { %v1112_v17 = vpack.c.bf16 %v852_v39, %v848_v37  ;;  %v2523_v37 = vcombine.high %v419_v33, %v423_v36  ;;  %v411_v39 = vld [vmem:[#allocation7 + $0x8] sm:$0xff] }
 0x17f   : > { %v854_v41 = vpop.f32.mrf.mxu0 }
 0x180   : > { %v1116_v50 = vpack.c.bf16 %v854_v41, %v850_v38  ;;  %v2522_v38 = vcombine.low %v419_v33, %v423_v36  ;;  %879 = vmatprep.subr.bf16.mxu1 %v2523_v37  ;;  %v415_v41 = vld [vmem:[#allocation7 + $0x28] sm:$0xff] }
 0x181   : > { %v858_v42 = vpop.f32.mrf.mxu0 }
 0x182   : > { %880 = vmatpush1.bf16.msra.mxu1 %v2522_v38 }
 0x183   : > { %v860_v43 = vpop.f32.mrf.mxu0 }
 0x185   : > { %v862_v44 = vpop.f32.mrf.mxu0 }
 0x186   : > { %v1113_v19 = vpack.c.bf16 %v862_v44, %v858_v42  ;;  %v2515_v42 = vcombine.high %v411_v39, %v415_v41  ;;  %v469_v44 = vld [vmem:[#allocation7 + $0x1d8] sm:$0xff] }
 0x187   : > { %v864_v47 = vpop.f32.mrf.mxu0 }
 0x188   : > { %v1117_v48 = vpack.c.bf16 %v864_v47, %v860_v43  ;;  %v2514_v43 = vcombine.low %v411_v39, %v415_v41  ;;  %881 = vmatprep.subr.bf16.mxu1 %v2515_v42  ;;  %v473_v47 = vld [vmem:[#allocation7 + $0x1f8] sm:$0xff] }
 0x189   : > { %v974_v49 = vpop.f32.mrf.mxu0 }
 0x18a   : > { %2713 = vmatprep.subr.bf16.mxu0 %v1117_v48  ;;  %882 = vmatpush1.bf16.msra.mxu1 %v2514_v43 }
 0x18b   : > { %2714 = vmatpush3.bf16.xpose.msra.mxu0 %v1117_v48  ;;  %v3602_v52 = vpop.f32.mrf.mxu0  ;;  %v461_v48 = vld [vmem:[#allocation7 + $0x198] sm:$0xff] }
 0x18c   : > { %2715 = vmatprep.subr.bf16.mxu0 %v1116_v50 }
 0x18d   : > { %v978_v53 = vpop.f32.mrf.mxu0  ;;  %900 = vmatmul.mubr.bf16.vlgmr.msra.gmra.mxu1 %v3555_v40 }
 0x18e   : > { %v1088_v20 = vpack.c.bf16 %v978_v53, %v974_v49  ;;  %v2574_v49 = vcombine.low %v469_v44, %v473_v47  ;;  %v465_v53 = vld [vmem:[#allocation7 + $0x1b8] sm:$0xff]  ;;  %909 = vmatprep.mubr.bf16.mxu1 %v3296_v0 }
 0x18f   : > { %v3604_v54 = vpop.f32.mrf.mxu0 }
 0x190   : > { %v1098_v55 = vpack.c.bf16 %v3604_v54, %v3602_v52 }
 0x191   : > { %v984_v58 = vpop.f32.mrf.mxu0 }
 0x193   : > { %2716 = vmatpush3.bf16.xpose.msra.mxu0 %v1116_v50  ;;  %v3608_v60 = vpop.f32.mrf.mxu0  ;;  %v2575_v50 = vcombine.high %v469_v44, %v473_v47 }
 0x194   : > { %2717 = vmatprep.subr.bf16.mxu0 %v1115_v59 }
 0x195   : > { %v988_v61 = vpop.f32.mrf.mxu0  ;;  %1013 = vmatprep.subr.bf16.mxu1 %v2575_v50  ;;  %910 = vmatmul.mubr.bf16.gmra.mxu1 %v3567_v51 }
 0x196   : > { %v1091_v18 = vpack.c.bf16 %v988_v61, %v984_v58  ;;  %v2567_v58 = vcombine.high %v461_v48, %v465_v53  ;;  %v457_v61 = vld [vmem:[#allocation7 + $0x178] sm:$0xff]  ;;  %1014 = vmatpush1.bf16.msra.mxu1 %v2574_v49  ;;  %919 = vmatprep.mubr.bf16.mxu1 %v3296_v0 }
 0x197   : > { %v3610_v63 = vpop.f32.mrf.mxu0 }
 0x198   : > { %v1101_v1 = vpack.c.bf16 %v3610_v63, %v3608_v60  ;;  %1015 = vmatprep.subr.bf16.mxu1 %v2567_v58 }
 0x199   : > { %v994_v2 = vpop.f32.mrf.mxu0 }
 0x19b   : > { %2718 = vmatpush3.bf16.xpose.msra.mxu0 %v1115_v59  ;;  %v3614_v6 = vpop.f32.mrf.mxu0  ;;  %v453_v59 = vld [vmem:[#allocation7 + $0x158] sm:$0xff] }
 0x19c   : > { %2719 = vmatprep.subr.bf16.mxu0 %v1114_v3 }
 0x19d   : > { %v998_v7 = vpop.f32.mrf.mxu0  ;;  %920 = vmatmul.mubr.bf16.gmra.mxu1 %v3579_v62 }
 0x19e   : > { %v1094_v16 = vpack.c.bf16 %v998_v7, %v994_v2  ;;  %v2566_v2 = vcombine.low %v461_v48, %v465_v53  ;;  %v445_v7 = vld [vmem:[#allocation7 + $0x118] sm:$0xff]  ;;  %929 = vmatprep.mubr.bf16.mxu1 %v3296_v0 }
 0x19f   : > { %v3616_v8 = vpop.f32.mrf.mxu0 }
 0x1a0   : > { %v1104_v9 = vpack.c.bf16 %v3616_v8, %v3614_v6  ;;  %1016 = vmatpush1.bf16.msra.mxu1 %v2566_v2 }
 0x1a1   : > { %v1004_v11 = vpop.f32.mrf.mxu0 }
 0x1a3   : > { %2720 = vmatpush3.bf16.xpose.msra.mxu0 %v1114_v3  ;;  %v3620_v12 = vpop.f32.mrf.mxu0  ;;  %v2559_v3 = vcombine.high %v453_v59, %v457_v61 }
 0x1a5   : > { %v1008_v13 = vpop.f32.mrf.mxu0  ;;  %1017 = vmatprep.subr.bf16.mxu1 %v2559_v3  ;;  %930 = vmatmul.mubr.bf16.gmra.mxu1 %v3591_v10 }
 0x1a6   : > { %v1097_v14 = vpack.c.bf16 %v1008_v13, %v1004_v11  ;;  %v449_v11 = vld [vmem:[#allocation7 + $0x138] sm:$0xff]  ;;  %v2558_v13 = vcombine.low %v453_v59, %v457_v61  ;;  %1045 = vmatprep.mubr.bf16.mxu1 %v3296_v0 }
 0x1a7   : > { %v3638_v32 = vpop.f32.mrf.mxu0 }
 0x1a8   : > { %2729 = vmatprep.subr.bf16.mxu0 %v1097_v14  ;;  %1018 = vmatpush1.bf16.msra.mxu1 %v2558_v13 }
 0x1aa   : > { %2722 = vmatmul.mubr.bf16.vlgmr.msra.gmra.mxu0 %v1111_v15  ;;  %v437_v15 = vld [vmem:[#allocation7 + $0xd8] sm:$0xff] }
 0x1ab   : > { %2725 = vmatprep.mubr.bf16.mxu0 %v1112_v17  ;;  %2730 = vmatpush3.bf16.msra.mxu0 %v1097_v14  ;;  %v2551_v14 = vcombine.high %v445_v7, %v449_v11  ;;  %v2550_v17 = vcombine.low %v445_v7, %v449_v11 }
 0x1ac   : > { %2731 = vmatprep.subr.bf16.mxu0 %v1094_v16 }
 0x1ad   : > { %1019 = vmatprep.subr.bf16.mxu1 %v2551_v14 }
 0x1ae   : > { %1020 = vmatpush1.bf16.msra.mxu1 %v2550_v17 }
 0x1af   : > { %2732 = vmatpush3.bf16.msra.mxu0 %v1094_v16  ;;  %v441_v16 = vld [vmem:[#allocation7 + $0xf8] sm:$0xff] }
 0x1b0   : > { %2733 = vmatprep.subr.bf16.mxu0 %v1091_v18  ;;  %v2542_v21 = vcombine.low %v437_v15, %v441_v16 }
 0x1b2   : > { %2726 = vmatmul.mubr.bf16.gmra.mxu0 %v1113_v19  ;;  %v429_v19 = vld [vmem:[#allocation7 + $0x98] sm:$0xff] }
 0x1b3   : > { %2734 = vmatpush3.bf16.msra.mxu0 %v1091_v18  ;;  %v2543_v18 = vcombine.high %v437_v15, %v441_v16 }
 0x1b4   : > { %2735 = vmatprep.subr.bf16.mxu0 %v1088_v20 }
 0x1b5   : > { %1021 = vmatprep.subr.bf16.mxu1 %v2543_v18 }
 0x1b6   : > { %1022 = vmatpush1.bf16.msra.mxu1 %v2542_v21 }
 0x1b7   : > { %2736 = vmatpush3.bf16.msra.mxu0 %v1088_v20  ;;  %v433_v20 = vld [vmem:[#allocation7 + $0xb8] sm:$0xff] }
 0x1b8   : > { %v2535_v22 = vcombine.high %v429_v19, %v433_v20  ;;  %v2534_v25 = vcombine.low %v429_v19, %v433_v20 }
 0x1ba   : > { %1023 = vmatprep.subr.bf16.mxu1 %v2535_v22 }
 0x1bb   : > { %1024 = vmatpush1.bf16.msra.mxu1 %v2534_v25 }
 0x1bc   : > { %1025 = vmatprep.subr.bf16.mxu1 %v2527_v26 }
 0x1bf   : > { %1026 = vmatpush1.bf16.msra.mxu1 %v2526_v29 }
 0x1c0   : > { %1027 = vmatprep.subr.bf16.mxu1 %v2519_v30 }
 0x1c3   : > { %1028 = vmatpush1.bf16.msra.mxu1 %v2518_v31 }
 0x1c6   : > { %1046 = vmatmul.mubr.bf16.vlgmr.msra.gmra.mxu1 %v3555_v40 }
 0x1c7   : > { %1055 = vmatprep.mubr.bf16.mxu1 %v3296_v0 }
 0x1ce   : > { %1056 = vmatmul.mubr.bf16.gmra.mxu1 %v3567_v51 }
 0x1cf   : > { %1065 = vmatprep.mubr.bf16.mxu1 %v3296_v0 }
 0x1d6   : > { %1066 = vmatmul.mubr.bf16.gmra.mxu1 %v3579_v62 }
 0x1d7   : > { %1075 = vmatprep.mubr.bf16.mxu1 %v3296_v0 }
 0x1de   : > { %1076 = vmatmul.mubr.bf16.gmra.mxu1 %v3591_v10 }
 0x1df   : > { %1320 = vmatprep.mubr.bf16.mxu1 %v3296_v0 }
 0x24d   : > { %v901_v61 = vpop.f32.mrf.mxu1 }
 0x24f   : > { %v903_v2 = vpop.f32.mrf.mxu1 }
 0x251   : > { %v905_v3 = vpop.f32.mrf.mxu1 }
 0x253   : > { %v907_v7 = vpop.f32.mrf.mxu1 }
 0x255   : > { %v911_v11 = vpop.f32.mrf.mxu1 }
 0x257   : > { %v913_v13 = vpop.f32.mrf.mxu1 }
 0x259   : > { %v915_v14 = vpop.f32.mrf.mxu1 }
 0x25b   : > { %v917_v15 = vpop.f32.mrf.mxu1 }
 0x25c   : > { %v1090_v30 = vpack.c.bf16 %v917_v15, %v913_v13 }
 0x25d   : > { %v921_v16 = vpop.f32.mrf.mxu1 }
 0x25f   : > { %v923_v17 = vpop.f32.mrf.mxu1 }
 0x261   : > { %v925_v18 = vpop.f32.mrf.mxu1 }
 0x262   : > { %v1092_v28 = vpack.c.bf16 %v925_v18, %v921_v16 }
 0x263   : > { %v927_v19 = vpop.f32.mrf.mxu1 }
 0x264   : > { %v1093_v25 = vpack.c.bf16 %v927_v19, %v923_v17 }
 0x265   : > { %v931_v20 = vpop.f32.mrf.mxu1 }
 0x267   : > { %v933_v21 = vpop.f32.mrf.mxu1 }
 0x269   : > { %v935_v22 = vpop.f32.mrf.mxu1 }
 0x26a   : > { %v3640_v33 = vpop.f32.mrf.mxu0  ;;  %v1095_v23 = vpack.c.bf16 %v935_v22, %v931_v20 }
 0x26b   : > { %v1190_v36 = vsel %vm1183_vm0, %v3640_v33, -inf  ;;  %v937_v24 = vpop.f32.mrf.mxu1 }
 0x26c   : > { %1191 = vmax.xlane.f32.xlu1 %v1190_v36  ;;  %v3644_v37 = vpop.f32.mrf.mxu0  ;;  %v1096_v26 = vpack.c.bf16 %v937_v24, %v933_v21 }
 0x26d   : > { %v1184_v38 = vsel %vm1183_vm0, %v3644_v37, -inf }
 0x26e   : > { %1185 = vmax.xlane.f32.xlu0 %v1184_v38  ;;  %v3648_v39 = vpop.f32.mrf.mxu0  ;;  %1296 = vmatprep.subr.bf16.mxu1 %v1096_v26  ;;  %v1089_v38 = vpack.c.bf16 %v915_v14, %v911_v11 }
 0x26f   : > { %v1193_v41 = vsel %vm1183_vm0, %v3648_v39, -inf  ;;  %1297 = vmatpush1.bf16.msra.mxu1 %v1095_v23 }
 0x270   : > { %1194 = vmax.xlane.f32.xlu1 %v1193_v41  ;;  %v3652_v42 = vpop.f32.mrf.mxu0  ;;  %1298 = vmatprep.subr.bf16.mxu1 %v1093_v25  ;;  %v1087_v41 = vpack.c.bf16 %v907_v7, %v903_v2 }
 0x271   : > { %v1187_v43 = vsel %vm1183_vm0, %v3652_v42, -inf }
 0x272   : > { %1188 = vmax.xlane.f32.xlu0 %v1187_v43  ;;  %v3656_v44 = vpop.f32.mrf.mxu0  ;;  %v1086_v43 = vpack.c.bf16 %v905_v3, %v901_v61 }
 0x273   : > { %v1202_v53 = vsel %vm1183_vm0, %v3656_v44, -inf  ;;  %1299 = vmatpush1.bf16.msra.mxu1 %v1092_v28 }
 0x274   : > { %v3658_v47 = vpop.f32.mrf.mxu0  ;;  %1300 = vmatprep.subr.bf16.mxu1 %v1090_v30 }
 0x275   : > { %v1196_v48 = vsel %vm1183_vm0, %v3658_v47, -inf }
 0x276   : > { %1197 = vmax.xlane.f32.xlu0 %v1196_v48  ;;  %v3662_v49 = vpop.f32.mrf.mxu0 }
 0x277   : > { %v1205_v59 = vsel %vm1183_vm0, %v3662_v49, -inf  ;;  %1301 = vmatpush1.bf16.msra.mxu1 %v1089_v38 }
 0x278   : > { %v3664_v50 = vpop.f32.mrf.mxu0  ;;  %1302 = vmatprep.subr.bf16.mxu1 %v1087_v41 }
 0x279   : > { %v1199_v58 = vsel %vm1183_vm0, %v3664_v50, -inf }
 0x27a   : > { %1203 = vmax.xlane.f32.xlu0 %v1202_v53  ;;  %1200 = vmax.xlane.f32.xlu1 %v1199_v58 }
 0x27b   : > { %1303 = vmatpush1.bf16.msra.mxu1 %v1086_v43 }
 0x27e   : > { %1206 = vmax.xlane.f32.xlu1 %v1205_v59 }
 0x286   : > { %v3672_v27 = vpop.f32.mrf.mxu1 }
 0x288   : > { %v3674_v29 = vpop.f32.mrf.mxu1 }
 0x28a   : > { %v3676_v31 = vpop.f32.mrf.mxu1 }
 0x28b   : > { %v1099_v36 = vpack.c.bf16 %v3676_v31, %v3672_v27 }
 0x2f5   : > { %v1192_v48 = vpop.xlane.xlu1 %1191 }
 0x2f6   : > { %v1210_v53 = vsub.f32 %v3640_v33, %v1192_v48 }
 0x2f7   : > { %v1186_v58 = vpop.xlane.xlu0 %1185 }
 0x2f8   : > { %v1208_v59 = vsub.f32 %v3644_v37, %v1186_v58  ;;  %v1220_v15 = vmul.f32 1.442695, %v1210_v53  ;;  %v1053_v53 = vpop.f32.mrf.mxu1 }
 0x2f9   : > { %v1195_v13 = vpop.xlane.xlu1 %1194 }
 0x2fa   : > { %v1216_v16 = vmul.f32 1.442695, %v1208_v59  ;;  %v1211_v17 = vsub.f32 %v3648_v39, %v1195_v13  ;;  %v3716_v59 = vpop.f32.mrf.mxu1 }
 0x2fb   : > { %v1189_v18 = vpop.xlane.xlu0 %1188 }
 0x2fc   : > { %2984 = vpow2.f32 %v1216_v16  ;;  %v1209_v2 = vsub.f32 %v3652_v42, %v1189_v18  ;;  %v1222_v61 = vmul.f32 1.442695, %v1211_v17  ;;  %v1059_v16 = vpop.f32.mrf.mxu1 }
 0x2fd   : > { %2986 = vpow2.f32 %v1220_v15 }
 0x2fe   : > { %v1218_v3 = vmul.f32 1.442695, %v1209_v2  ;;  %v3722_v17 = vpop.f32.mrf.mxu1 }
 0x2ff   : > { %v1198_v7 = vpop.xlane.xlu0 %1197 }
 0x300   : > { %2988 = vpow2.f32 %v1218_v3  ;;  %v1212_v11 = vsub.f32 %v3658_v47, %v1198_v7  ;;  %v1063_v18 = vpop.f32.mrf.mxu1  ;;  %v3727_v3 = vpack.c.bf16 %v1053_v53, %v3674_v29 }
 0x301   : > { %2990 = vpow2.f32 %v1222_v61 }
 0x302   : > { %v1224_v33 = vmul.f32 1.442695, %v1212_v11  ;;  %v3724_v2 = vpop.f32.mrf.mxu1 }
 0x303   : > { %v1204_v14 = vpop.xlane.xlu0 %1203  ;;  %v1201_v37 = vpop.xlane.xlu1 %1200 }
 0x304   : > { %2992 = vpow2.f32 %v1224_v33  ;;  %v1214_v19 = vsub.f32 %v3656_v44, %v1204_v14  ;;  %v1213_v39 = vsub.f32 %v3664_v50, %v1201_v37  ;;  %v1069_v61 = vpop.f32.mrf.mxu1  ;;  %v1102_v14 = vpack.c.bf16 %v3722_v17, %v3716_v59 }
 0x306   : > { %v1228_v20 = vmul.f32 1.442695, %v1214_v19  ;;  %v1226_v21 = vmul.f32 1.442695, %v1213_v39  ;;  %v3729_v7 = vpop.f32.mrf.mxu1  ;;  %v3297_v39 = vmov 0.0  }
 0x307   : > { %v1207_v22 = vpop.xlane.xlu1 %1206  ;;  %2745 = vmatprep.subr.mxu1 %v3297_v39  ;;  %v1105_v29 = vpack.c.bf16 %v3729_v7, %v3724_v2 }
 0x308   : > { %2994 = vpow2.f32 %v1228_v20  ;;  %v1215_v42 = vsub.f32 %v3662_v49, %v1207_v22  ;;  %v1073_v11 = vpop.f32.mrf.mxu1 }
 0x309   : > { %v3688_v23 = vpop.eup %2984  ;;  %2996 = vpow2.f32 %v1226_v21  ;;  %v3736_v21 = vpack.c.bf16 %v1063_v18, %v1059_v16  ;;  %v3740_v22 = vpack.c.bf16 %v1073_v11, %v1069_v61 }
 0x30a   : > { %v1230_v24 = vmul.f32 1.442695, %v1215_v42  ;;  %v1232_v47 = vsel %vm1183_vm0, %v3688_v23, 0.0  ;;  %v3692_v25 = vpop.eup %2986  ;;  %v1077_v33 = vpop.f32.mrf.mxu1  ;;  %v2584_v42 = vld [vmem:[%s3954_s3 + $0x1] ss:$0 sm:$0xff] }
 0x30b   : > { %1233 = vadd.xlane.f32.xlu0 %v1232_v47  ;;  %v1238_v50 = vsel %vm1183_vm0, %v3692_v25, 0.0  ;;  %v1543_v47 = vmul.f32 %v2584_v42, %v3551_v35  ;;  %v1549_v53 = vmul.f32 %v2584_v42, %v3587_v5 }
 0x30c   : > { %2998 = vpow2.f32 %v1230_v24  ;;  %v3733_v37 = vpop.f32.mrf.mxu1  ;;  %v1542_v24 = vmul.f32 %v2584_v42, %v3548_v34 }
 0x30d   : > { %v3694_v44 = vpop.eup %2988 }
 0x30e   : > { %v1235_v26 = vsel %vm1183_vm0, %v3694_v44, 0.0  ;;  %v3700_v49 = vpop.eup %2990  ;;  %v1081_v19 = vpop.f32.mrf.mxu1 }
 0x30f   : > { %1239 = vadd.xlane.f32.xlu0 %v1238_v50  ;;  %1236 = vadd.xlane.f32.xlu1 %v1235_v26  ;;  %v1241_v38 = vsel %vm1183_vm0, %v3700_v49, 0.0  ;;  %v1108_v20 = vpack.c.bf16 %v1081_v19, %v1077_v33  ;;  %v1544_v50 = vmul.f32 %v2584_v42, %v3560_v45  ;;  %v1545_v26 = vmul.f32 %v2584_v42, %v3563_v46 }
 0x311   : > { %v3702_v28 = vpop.eup %2992  ;;  %1762 = vmatprep.subr.bf16.mxu0 %v1108_v20 }
 0x312   : > { %v1244_v30 = vsel %vm1183_vm0, %v3702_v28, 0.0 }
 0x313   : > { %1245 = vadd.xlane.f32.xlu0 %v1244_v30  ;;  %1242 = vadd.xlane.f32.xlu1 %v1241_v38  ;;  %v1546_v30 = vmul.f32 %v2584_v42, %v3572_v56  ;;  %v1547_v38 = vmul.f32 %v2584_v42, %v3575_v57 }
 0x315   : > { %v3708_v41 = vpop.eup %2994 }
 0x316   : > { %v3710_v43 = vpop.eup %2996  ;;  %v1250_v48 = vsel %vm1183_vm0, %v3708_v41, 0.0 }
 0x317   : > { %1251 = vadd.xlane.f32.xlu0 %v1250_v48  ;;  %v1247_v58 = vsel %vm1183_vm0, %v3710_v43, 0.0  ;;  %v1548_v48 = vmul.f32 %v2584_v42, %v3584_v4 }
 0x318   : > { %1248 = vadd.xlane.f32.xlu1 %v1247_v58 }
 0x319   : > { %v3718_v13 = vpop.eup %2998 }
 0x31a   : > { %v1253_v15 = vsel %vm1183_vm0, %v3718_v13, 0.0 }
 0x31b   : > { %1550 = vadd.xlane.f32.xlu0 %v1542_v24 }
 0x31c   : > { %1254 = vadd.xlane.f32.xlu1 %v1253_v15 }
 0x31f   : > { %1554 = vadd.xlane.f32.xlu0 %v1544_v50 }
 0x320   : > { %1552 = vadd.xlane.f32.xlu1 %v1543_v47 }
 0x323   : > { %1558 = vadd.xlane.f32.xlu0 %v1546_v30 }
 0x324   : > { %1556 = vadd.xlane.f32.xlu1 %v1545_v26 }
 0x327   : > { %1562 = vadd.xlane.f32.xlu0 %v1548_v48 }
 0x328   : > { %1560 = vadd.xlane.f32.xlu1 %v1547_v38 }
 0x32c   : > { %1564 = vadd.xlane.f32.xlu1 %v1549_v53 }
 0x394   : > { %v1234_v58 = vpop.xlane.xlu0 %1233 }
 0x395   : > { %3000 = vrcp.f32 %v1234_v58 }
 0x398   : > { %v1240_v15 = vpop.xlane.xlu0 %1239  ;;  %v1237_v16 = vpop.xlane.xlu1 %1236 }
 0x399   : > { %3002 = vrcp.f32 %v1237_v16 }
 0x39a   : > { %3004 = vrcp.f32 %v1240_v15 }
 0x39c   : > { %v1246_v18 = vpop.xlane.xlu0 %1245  ;;  %v1243_v2 = vpop.xlane.xlu1 %1242 }
 0x39d   : > { %3006 = vrcp.f32 %v1243_v2 }
 0x39e   : > { %3008 = vrcp.f32 %v1246_v18 }
 0x3a0   : > { %v1252_v61 = vpop.xlane.xlu0 %1251 }
 0x3a1   : > { %v1249_v7 = vpop.xlane.xlu1 %1248 }
 0x3a2   : > { %3010 = vrcp.f32 %v1249_v7  ;;  %v3001_v11 = vpop.eup %3000 }
 0x3a3   : > { %3012 = vrcp.f32 %v1252_v61  ;;  %v1264_v20 = vmul.f32 %v3001_v11, %v3688_v23 }
 0x3a4   : > { %v1551_v11 = vpop.xlane.xlu0 %1550 }
 0x3a5   : > { %v1255_v33 = vpop.xlane.xlu1 %1254 }
 0x3a6   : > { %3014 = vrcp.f32 %v1255_v33  ;;  %v3003_v19 = vpop.eup %3002 }
 0x3a7   : > { %v1265_v42 = vmul.f32 %v3003_v19, %v3694_v44  ;;  %v3005_v24 = vpop.eup %3004  ;;  %v1107_v44 = vpack.c.bf16 %v3638_v32, %v3620_v12 }
 0x3a8   : > { %v1266_v26 = vmul.f32 %v3005_v24, %v3692_v25 }
 0x3a9   : > { %v1272_v47 = vpack.c.bf16 %v1265_v42, %v1264_v20  ;;  %v1553_v33 = vpop.xlane.xlu1 %1552 }
 0x3aa   : > { %v3007_v50 = vpop.eup %3006 }
 0x3ab   : > { %v1267_v30 = vmul.f32 %v3007_v50, %v3700_v49  ;;  %2576 = vmatmul.mubr.msk.bf16.vlgmr.msra.gmra.mxu1 %vm1183_vm0, %v1272_v47  ;;  %2737 = vmatprep.mubr.msk.bf16.mxu0 %vm1183_vm0, %v1272_v47  ;;  %v3009_v38 = vpop.eup %3008 }
 0x3ac   : > { %2746 = vmatpush3.xpose.msra.mxu1 %v3587_v5  ;;  %1330 = vmatprep.mubr.bf16.mxu1 %v3296_v0  ;;  %v1268_v25 = vmul.f32 %v3009_v38, %v3702_v28 }
 0x3ad   : > { %v1273_v48 = vpack.c.bf16 %v1267_v30, %v1266_v26  ;;  %2747 = vmatprep.subr.mxu1 %v3297_v39 }
 0x3af   : > { %v3011_v23 = vpop.eup %3010  ;;  %2738 = vmatmul.mubr.msk.bf16.vlgmr.msra.gmra.mxu0 %vm1183_vm0, %v1273_v48 }
 0x3b0   : > { %v1269_v49 = vmul.f32 %v3011_v23, %v3710_v43  ;;  %v3013_v53 = vpop.eup %3012  ;;  %1763 = vmatpush1.bf16.msra.mxu0 %v1107_v44  ;;  %2748 = vmatpush3.xpose.msra.mxu1 %v3584_v4 }
 0x3b1   : > { %1764 = vmatprep.subr.bf16.mxu0 %v1105_v29  ;;  %2749 = vmatprep.subr.mxu1 %v3297_v39  ;;  %v1270_v12 = vmul.f32 %v3013_v53, %v3708_v41  ;;  %v1555_v53 = vpop.xlane.xlu0 %1554 }
 0x3b2   : > { %v1274_v5 = vpack.c.bf16 %v1269_v49, %v1268_v25 }
 0x3b3   : > { %v3015_v58 = vpop.eup %3014  ;;  %2577 = vmatmul.mubr.msk.bf16.gmra.mxu1 %vm1183_vm0, %v1273_v48  ;;  %v1566_v48 = vlaneseq }
 0x3b4   : > { %2741 = vmatprep.mubr.msk.bf16.mxu0 %vm1183_vm0, %v1274_v5  ;;  %v1271_v32 = vmul.f32 %v3015_v58, %v3718_v13  ;;  %1765 = vmatpush1.bf16.msra.mxu0 %v1104_v9  ;;  %v1557_v58 = vpop.xlane.xlu1 %1556 }
 0x3b5   : > { %2750 = vmatpush3.xpose.msra.mxu1 %v3575_v57  ;;  %1766 = vmatprep.subr.bf16.mxu0 %v1102_v14 }
 0x3b6   : > { %v1275_v4 = vpack.c.bf16 %v1271_v32, %v1270_v12  ;;  %2751 = vmatprep.subr.mxu1 %v3297_v39  ;;  %1340 = vmatprep.mubr.bf16.mxu1 %v3296_v0 }
 0x3b8   : > { %2742 = vmatmul.mubr.msk.bf16.gmra.mxu0 %vm1183_vm0, %v1275_v4 }
 0x3b9   : > { %1767 = vmatpush1.bf16.msra.mxu0 %v1101_v1  ;;  %2752 = vmatpush3.xpose.msra.mxu1 %v3572_v56  ;;  %v1083_v56 = vpop.f32.mrf.mxu1 }
 0x3ba   : > { %1768 = vmatprep.subr.bf16.mxu0 %v1099_v36  ;;  %2753 = vmatprep.subr.mxu1 %v3297_v39 }
 0x3bb   : > { %1786 = vmatprep.mubr.bf16.mxu0 %v3296_v0  ;;  %2578 = vmatmul.mubr.msk.bf16.gmra.mxu1 %vm1183_vm0, %v1274_v5 }
 0x3bc   : > { %1350 = vmatprep.mubr.bf16.mxu1 %v3296_v0 }
 0x3bd   : > { %1769 = vmatpush1.bf16.msra.mxu0 %v1098_v55  ;;  %2754 = vmatpush3.xpose.msra.mxu1 %v3563_v46  ;;  %v1109_v46 = vpack.c.bf16 %v1083_v56, %v3733_v37  ;;  %v1567_v56 = vshrl.u32 %v1566_v48, 7 }
 0x3be   : > { %2755 = vmatprep.subr.mxu1 %v3297_v39 }
 0x3c1   : > { %2756 = vmatpush3.xpose.msra.mxu1 %v3560_v45  ;;  %v1466_v45 = vld [vmem:[%s3954_s3] sm:$0x1] }
 0x3c2   : > { %2757 = vmatprep.subr.mxu1 %v3297_v39 }
 0x3c3   : > { %2579 = vmatmul.mubr.msk.bf16.gmra.mxu1 %vm1183_vm0, %v1275_v4 }
 0x3c4   : > { %2761 = vmatprep.mubr.msk.f32.mxu1 %vm3298_vm1, %v3297_v39 }
 0x3c5   : > { %2758 = vmatpush3.xpose.msra.mxu1 %v3551_v35 }
 0x3c6   : > { %2759 = vmatprep.subr.mxu1 %v3297_v39 }
 0x3c9   : > { %2760 = vmatpush3.xpose.msra.mxu1 %v3548_v34 }
 0x3ca   : > { %2764 = vmatprep.subr.bf16.mxu1 %v1109_v46 }
 0x3cc   : > { %2762 = vmatmul.mubr.f32.vlgmr.msra.gmra.mxu1 %v1466_v45 }
 0x3cd   : > { %2765 = vmatpush3.bf16.msra.mxu1 %v1109_v46 }
 0x3ce   : > { %2766 = vmatprep.subr.bf16.mxu1 %v3740_v22 }
 0x3d1   : > { %2767 = vmatpush3.bf16.msra.mxu1 %v3740_v22 }
 0x3d2   : > { %2768 = vmatprep.subr.bf16.mxu1 %v3736_v21 }
 0x3d5   : > { %2769 = vmatpush3.bf16.msra.mxu1 %v3736_v21 }
 0x3d6   : > { %2770 = vmatprep.subr.bf16.mxu1 %v3727_v3 }
 0x3d9   : > { %2771 = vmatpush3.bf16.msra.mxu1 %v3727_v3 }
 0x46b   : > { %v1322_v34 = vpop.f32.mrf.mxu1 }
 0x46c   : > { %v1426_v57 = vmax.f32 %v1322_v34, 0.0 }
 0x46d   : > { %v1324_v35 = vpop.f32.mrf.mxu1 }
 0x46e   : > { %v1427_v52 = vmax.f32 %v1324_v35, 0.0 }
 0x46f   : > { %v1326_v54 = vpop.f32.mrf.mxu1  ;;  %v2739_v55 = vpop.f32.mrf.mxu0 }
 0x470   : > { %v1450_v60 = vadd.f32 %v1427_v52, %v1426_v57  ;;  %v1429_v6 = vmax.f32 %v1326_v54, 0.0  ;;  %v1434_v2 = vmax.f32 %v2739_v55, 0.0  ;;  %v1559_v55 = vpop.xlane.xlu0 %1558 }
 0x471   : > { %v1328_v63 = vpop.f32.mrf.mxu1  ;;  %v1395_v1 = vpop.f32.mrf.mxu0 }
 0x472   : > { %v1430_v8 = vmax.f32 %v1328_v63, 0.0  ;;  %v1428_v36 = vmax.f32 %v1395_v1, 0.0  ;;  %v2643_v63 = vld [vmem:[#allocation5 + $0x18] sm:$0xff]  }
 0x473   : > { %v1332_v9 = vpop.f32.mrf.mxu1  ;;  %v2740_v27 = vpop.f32.mrf.mxu0 }
 0x474   : > { %v1451_v31 = vadd.f32 %v1430_v8, %v1429_v6  ;;  %v1432_v43 = vmax.f32 %v1332_v9, 0.0  ;;  %v3818_v14 = vadd.f32 %v1450_v60, %v1428_v36  ;;  %v1437_v61 = vmax.f32 %v2740_v27, 0.0  ;;  %v1561_v8 = vpop.xlane.xlu1 %1560  ;;  %v2626_v9 = vld [vmem:[#allocation5] sm:$0xff]   ;;  %v2641_v36 = vld [vmem:[#allocation5 + $0x8] sm:$0xff]  }
 0x475   : > { %v1334_v28 = vpop.f32.mrf.mxu1  ;;  %v1398_v41 = vpop.f32.mrf.mxu0  ;;  %v1568_v60 = vsub.s32 0, %v1567_v56 }
 0x476   : > { %v1433_v59 = vmax.f32 %v1334_v28, 0.0  ;;  %v1431_v13 = vmax.f32 %v1398_v41, 0.0  ;;  %v2642_v28 = vld [vmem:[#allocation5 + $0x10] sm:$0xff]  }
 0x477   : > { %v1336_v17 = vpop.f32.mrf.mxu1 }
 0x478   : > { %v3816_v3 = vpop.f32.mrf.mxu0  ;;  %v1452_v37 = vadd.f32 %v1433_v59, %v1432_v43  ;;  %v3820_v39 = vadd.f32 %v1451_v31, %v1431_v13  ;;  %v1435_v22 = vmax.f32 %v1336_v17, 0.0  ;;  %v2639_v43 = vunpack.c.l.bf16 %v2643_v63 }
 0x479   : > { %v1338_v21 = vpop.f32.mrf.mxu1 }
 0x47a   : > { %v1411_v29 = vpop.f32.mrf.mxu0  ;;  %v1436_v15 = vmax.f32 %v1338_v21, 0.0  ;;  %v1948_v16 = vpack.c.bf16 %v3820_v39, %v3818_v14  ;;  %v3824_v42 = vadd.f32 %v1452_v37, %v1434_v2  ;;  %v2627_v37 = vunpack.c.l.bf16 %v2626_v9  ;;  %v2978_v14 = vld [vmem:[#allocation11 + $0x28] sm:$0xff]   ;;  %v2980_v39 = vld [vmem:[#allocation11 + $0x18] sm:$0xff]  }
 0x47b   : > { %v1342_v18 = vpop.f32.mrf.mxu1  ;;  %v1440_v12 = vmax.f32 %v1411_v29, 0.0  ;;  %v2628_v29 = vunpack.c.h.bf16 %v2626_v9  ;;  %v1446_v2 = vmax.f32 %v3816_v3, 0.0 }
 0x47c   : > { %v1453_v7 = vadd.f32 %v1436_v15, %v1435_v22  ;;  %v2744_v19 = vpop.f32.mrf.mxu0  ;;  %v1438_v47 = vmax.f32 %v1342_v18, 0.0  ;;  %v2631_v22 = vunpack.c.l.bf16 %v2641_v36  ;;  %v2632_v15 = vunpack.c.h.bf16 %v2641_v36 }
 0x47d   : > { %v1344_v20 = vpop.f32.mrf.mxu1  ;;  %v1449_v59 = vmax.f32 %v2744_v19, 0.0  ;;  %v2635_v18 = vunpack.c.l.bf16 %v2642_v28 }
 0x47e   : > { %v3826_v24 = vadd.f32 %v1453_v7, %v1437_v61  ;;  %v1439_v50 = vmax.f32 %v1344_v20, 0.0  ;;  %v1414_v23 = vpop.f32.mrf.mxu0  ;;  %v1563_v7 = vpop.xlane.xlu0 %1562 }
 0x47f   : > { %v1346_v26 = vpop.f32.mrf.mxu1  ;;  %v1443_v32 = vmax.f32 %v1414_v23, 0.0 }
 0x480   : > { %v1949_v30 = vpack.c.bf16 %v3826_v24, %v3824_v42  ;;  %v1454_v38 = vadd.f32 %v1439_v50, %v1438_v47  ;;  %v1441_v25 = vmax.f32 %v1346_v26, 0.0  ;;  %v2636_v47 = vunpack.c.h.bf16 %v2642_v28  ;;  %v1565_v50 = vpop.xlane.xlu1 %1564  ;;  %v2982_v42 = vld [vmem:[#allocation11 + $0x8] sm:$0xff]  }
 0x481   : > { %v1348_v44 = vpop.f32.mrf.mxu1 }
 0x482   : > { %v1442_v49 = vmax.f32 %v1348_v44, 0.0  ;;  %v3830_v45 = vadd.f32 %v1454_v38, %v1440_v12  ;;  %v2640_v44 = vunpack.c.h.bf16 %v2643_v63 }
 0x483   : > { %v1352_v5 = vpop.f32.mrf.mxu1 }
 0x484   : > { %v1455_v4 = vadd.f32 %v1442_v49, %v1441_v25  ;;  %v1444_v35 = vmax.f32 %v1352_v5, 0.0 }
 0x485   : > { %v1354_v46 = vpop.f32.mrf.mxu1 }
 0x486   : > { %v3832_v34 = vadd.f32 %v1455_v4, %v1443_v32  ;;  %v1445_v57 = vmax.f32 %v1354_v46, 0.0 }
 0x487   : > { %v1356_v52 = vpop.f32.mrf.mxu1 }
 0x488   : > { %v1456_v54 = vadd.f32 %v1445_v57, %v1444_v35  ;;  %v1950_v1 = vpack.c.bf16 %v3832_v34, %v3830_v45  ;;  %v1447_v27 = vmax.f32 %v1356_v52, 0.0 }
 0x489   : > { %v1358_v6 = vpop.f32.mrf.mxu1 }
 0x48a   : > { %v1448_v31 = vmax.f32 %v1358_v6, 0.0  ;;  %v3839_v23 = vadd.f32 %v1456_v54, %v1446_v2 }
 0x48c   : > { %v1534_v41 = vpop.f32.mrf.mxu1  ;;  %v1457_v13 = vadd.f32 %v1448_v31, %v1447_v27 }
 0x48d   : > { %v1569_v17 = vrot.slane %v1534_v41, %v1568_v60 }
 0x48e   : > { %v2763_v21 = vpop.f32.mrf.mxu1  ;;  %v3837_v61 = vadd.f32 %v1457_v13, %v1449_v59 }
 0x48f   : > { %v1570_v20 = vadd.f32 %v1569_v17, %v1551_v11  ;;  %v1571_v26 = vadd.f32 %v1569_v17, %v1553_v33  ;;  %v1572_v38 = vadd.f32 %v1569_v17, %v1555_v53  ;;  %v1573_v48 = vadd.f32 %v1569_v17, %v1557_v58 }
 0x490   : > { %v1574_v19 = vadd.f32 %v1569_v17, %v1559_v55  ;;  %v1575_v49 = vadd.f32 %v1569_v17, %v1561_v8  ;;  %v1576_v5 = vadd.f32 %v1569_v17, %v1563_v7  ;;  %v1577_v3 = vadd.f32 %v1569_v17, %v1565_v50 }
 0x491   : > { %v1594_v25 = vadd.f32 %v2627_v37, %v1570_v20  ;;  %v1595_v12 = vadd.f32 %v2628_v29, %v1571_v26  ;;  %v1596_v32 = vadd.f32 %v2631_v22, %v1572_v38  ;;  %v1597_v4 = vadd.f32 %v2632_v15, %v1573_v48 }
 0x492   : > { %v1598_v46 = vadd.f32 %v2635_v18, %v1574_v19  ;;  %v1599_v35 = vadd.f32 %v2636_v47, %v1575_v49  ;;  %v1951_v33 = vpack.c.bf16 %v3837_v61, %v3839_v23  ;;  %v1600_v54 = vadd.f32 %v2639_v43, %v1576_v5 }
 0x493   : > { %v1602_v56 = vmul.f32 0.2, %v1594_v25  ;;  %v1603_v11 = vmul.f32 0.2, %v1595_v12  ;;  %v1604_v57 = vmul.f32 0.2, %v1596_v32  ;;  %v1601_v6 = vadd.f32 %v2640_v44, %v1577_v3 }
 0x494   : > { %v1605_v52 = vmul.f32 0.2, %v1597_v4  ;;  %v1606_v63 = vmul.f32 0.2, %v1598_v46  ;;  %v1607_v27 = vmul.f32 0.2, %v1599_v35 }
 0x495   : > { %v1610_v53 = vmax.f32 %v1594_v25, %v1602_v56  ;;  %v1611_v58 = vmax.f32 %v1595_v12, %v1603_v11  ;;  %v1612_v60 = vmax.f32 %v1596_v32, %v1604_v57  ;;  %v1608_v28 = vmul.f32 0.2, %v1600_v54 }
 0x496   : > { %v1613_v9 = vmax.f32 %v1597_v4, %v1605_v52  ;;  %v1614_v36 = vmax.f32 %v1598_v46, %v1606_v63  ;;  %v1615_v59 = vmax.f32 %v1599_v35, %v1607_v27  ;;  %v1609_v43 = vmul.f32 0.2, %v1601_v6 }
 0x497   : > { %v1618_v55 = vsel %vm1183_vm0, %v1610_v53, -inf  ;;  %v1621_v8 = vsel %vm1183_vm0, %v1611_v58, -inf  ;;  %v1624_v31 = vsel %vm1183_vm0, %v1612_v60, -inf  ;;  %v1616_v17 = vmax.f32 %v1600_v54, %v1608_v28 }
 0x498   : > { %1619 = vmax.xlane.f32.xlu0 %v1618_v55  ;;  %1622 = vmax.xlane.f32.xlu1 %v1621_v8  ;;  %v1627_v41 = vsel %vm1183_vm0, %v1613_v9, -inf  ;;  %v1630_v13 = vsel %vm1183_vm0, %v1614_v36, -inf  ;;  %v1633_v37 = vsel %vm1183_vm0, %v1615_v59, -inf  ;;  %v1617_v21 = vmax.f32 %v1601_v6, %v1609_v43 }
 0x499   : > { %v1636_v29 = vsel %vm1183_vm0, %v1616_v17, -inf }
 0x49a   : > { %v1639_v22 = vsel %vm1183_vm0, %v1617_v21, -inf }
 0x49c   : > { %1625 = vmax.xlane.f32.xlu0 %v1624_v31  ;;  %1628 = vmax.xlane.f32.xlu1 %v1627_v41 }
 0x4a0   : > { %1631 = vmax.xlane.f32.xlu0 %v1630_v13  ;;  %1634 = vmax.xlane.f32.xlu1 %v1633_v37 }
 0x4a4   : > { %1637 = vmax.xlane.f32.xlu0 %v1636_v29  ;;  %1640 = vmax.xlane.f32.xlu1 %v1639_v22 }
 0x521   : > { %v1620_v15 = vpop.xlane.xlu0 %1619  ;;  %v1623_v2 = vpop.xlane.xlu1 %1622 }
 0x522   : > { %v1642_v18 = vsub.f32 %v1610_v53, %v1620_v15  ;;  %v1643_v7 = vsub.f32 %v1611_v58, %v1623_v2 }
 0x524   : > { %v1650_v20 = vmul.f32 1.442695, %v1642_v18  ;;  %v1652_v47 = vmul.f32 1.442695, %v1643_v7 }
 0x525   : > { %v1626_v50 = vpop.xlane.xlu0 %1625  ;;  %v1629_v38 = vpop.xlane.xlu1 %1628 }
 0x526   : > { %3016 = vpow2.f32 %v1650_v20  ;;  %v1644_v26 = vsub.f32 %v1612_v60, %v1626_v50  ;;  %v1645_v48 = vsub.f32 %v1613_v9, %v1629_v38 }
 0x527   : > { %3018 = vpow2.f32 %v1652_v47  ;;  %v2960_v47 = vld [vmem:[#allocation10 + $0x38] sm:$0xff]  }
 0x528   : > { %v1654_v19 = vmul.f32 1.442695, %v1644_v26  ;;  %v1656_v44 = vmul.f32 1.442695, %v1645_v48  ;;  %2780 = vmatprep.subr.bf16.mxu0 %v2960_v47  ;;  %v2962_v48 = vld [vmem:[#allocation8 + $0x38] sm:$0xff]  }
 0x529   : > { %v1632_v25 = vpop.xlane.xlu0 %1631  ;;  %v1635_v5 = vpop.xlane.xlu1 %1634  ;;  %2804 = vmatprep.subr.bf16.mxu1 %v2962_v48 }
 0x52a   : > { %3020 = vpow2.f32 %v1654_v19  ;;  %v1646_v49 = vsub.f32 %v1614_v36, %v1632_v25  ;;  %v1647_v12 = vsub.f32 %v1615_v59, %v1635_v5 }
 0x52b   : > { %3022 = vpow2.f32 %v1656_v44 }
 0x52c   : > { %v1658_v32 = vmul.f32 1.442695, %v1646_v49  ;;  %v1660_v4 = vmul.f32 1.442695, %v1647_v12 }
 0x52d   : > { %v1638_v3 = vpop.xlane.xlu0 %1637  ;;  %v1641_v46 = vpop.xlane.xlu1 %1640 }
 0x52e   : > { %3024 = vpow2.f32 %v1658_v32  ;;  %v1648_v56 = vsub.f32 %v1616_v17, %v1638_v3  ;;  %v1649_v35 = vsub.f32 %v1617_v21, %v1641_v46 }
 0x52f   : > { %3026 = vpow2.f32 %v1660_v4 }
 0x530   : > { %v1662_v11 = vmul.f32 1.442695, %v1648_v56  ;;  %v1664_v57 = vmul.f32 1.442695, %v1649_v35 }
 0x532   : > { %3028 = vpow2.f32 %v1662_v11  ;;  %v2961_v11 = vld [vmem:[#allocation10 + $0x30] sm:$0xff]  }
 0x533   : > { %v3017_v52 = vpop.eup %3016  ;;  %3030 = vpow2.f32 %v1664_v57 }
 0x534   : > { %v3019_v53 = vpop.eup %3018  ;;  %v1666_v58 = vsel %vm1183_vm0, %v3017_v52, 0.0 }
 0x535   : > { %1667 = vadd.xlane.f32.xlu0 %v1666_v58  ;;  %v1669_v54 = vsel %vm1183_vm0, %v3019_v53, 0.0 }
 0x536   : > { %1670 = vadd.xlane.f32.xlu1 %v1669_v54  ;;  %v2964_v54 = vld [vmem:[#allocation8 + $0x30] sm:$0xff]  }
 0x537   : > { %v3021_v55 = vpop.eup %3020 }
 0x538   : > { %v3023_v60 = vpop.eup %3022  ;;  %v1672_v63 = vsel %vm1183_vm0, %v3021_v55, 0.0 }
 0x539   : > { %1673 = vadd.xlane.f32.xlu0 %v1672_v63  ;;  %v1675_v6 = vsel %vm1183_vm0, %v3023_v60, 0.0  ;;  %v2966_v63 = vld [vmem:[#allocation8 + $0x28] sm:$0xff]  }
 0x53a   : > { %1676 = vadd.xlane.f32.xlu1 %v1675_v6  ;;  %v2967_v6 = vld [vmem:[#allocation10 + $0x18] sm:$0xff]  }
 0x53b   : > { %v3025_v8 = vpop.eup %3024 }
 0x53c   : > { %v3027_v9 = vpop.eup %3026  ;;  %v1678_v27 = vsel %vm1183_vm0, %v3025_v8, 0.0 }
 0x53d   : > { %1679 = vadd.xlane.f32.xlu0 %v1678_v27  ;;  %v1681_v31 = vsel %vm1183_vm0, %v3027_v9, 0.0  ;;  %v2968_v27 = vld [vmem:[#allocation8 + $0x20] sm:$0xff]  }
 0x53e   : > { %1682 = vadd.xlane.f32.xlu1 %v1681_v31  ;;  %v2969_v31 = vld [vmem:[#allocation10 + $0x10] sm:$0xff]  }
 0x53f   : > { %v3029_v36 = vpop.eup %3028 }
 0x540   : > { %v3031_v28 = vpop.eup %3030  ;;  %v1684_v41 = vsel %vm1183_vm0, %v3029_v36, 0.0 }
 0x541   : > { %1685 = vadd.xlane.f32.xlu0 %v1684_v41  ;;  %v1687_v59 = vsel %vm1183_vm0, %v3031_v28, 0.0  ;;  %v2971_v41 = vld [vmem:[#allocation10 + $0x8] sm:$0xff]  }
 0x542   : > { %1688 = vadd.xlane.f32.xlu1 %v1687_v59 }
 0x5be   : > { %v1668_v43 = vpop.xlane.xlu0 %1667 }
 0x5bf   : > { %3032 = vrcp.f32 %v1668_v43  ;;  %v1671_v13 = vpop.xlane.xlu1 %1670 }
 0x5c0   : > { %3034 = vrcp.f32 %v1671_v13  ;;  %v2972_v13 = vld [vmem:[#allocation8 + $0x10] sm:$0xff]  }
 0x5c2   : > { %v1674_v17 = vpop.xlane.xlu0 %1673 }
 0x5c3   : > { %3036 = vrcp.f32 %v1674_v17  ;;  %v1677_v37 = vpop.xlane.xlu1 %1676  ;;  %v2973_v17 = vld [vmem:[#allocation10] sm:$0xff]  }
 0x5c4   : > { %3038 = vrcp.f32 %v1677_v37  ;;  %v2976_v37 = vld [vmem:[#allocation11 + $0x38] sm:$0xff]  }
 0x5c6   : > { %v1680_v21 = vpop.xlane.xlu0 %1679 }
 0x5c7   : > { %3040 = vrcp.f32 %v1680_v21  ;;  %v1683_v18 = vpop.xlane.xlu1 %1682  ;;  %v2975_v21 = vld [vmem:[#allocation8] sm:$0xff]  }
 0x5c8   : > { %3042 = vrcp.f32 %v1683_v18 }
 0x5ca   : > { %v1686_v20 = vpop.xlane.xlu0 %1685 }
 0x5cb   : > { %3044 = vrcp.f32 %v1686_v20  ;;  %v1689_v38 = vpop.xlane.xlu1 %1688 }
 0x5cc   : > { %v3033_v29 = vpop.eup %3032  ;;  %3046 = vrcp.f32 %v1689_v38 }
 0x5cd   : > { %v1698_v22 = vmul.f32 %v3033_v29, %v3017_v52  ;;  %v3035_v15 = vpop.eup %3034  ;;  %v2963_v52 = vld [vmem:[#allocation10 + $0x28] sm:$0xff]   ;;  %v2977_v29 = vld [vmem:[#allocation11 + $0x30] sm:$0xff]  }
 0x5ce   : > { %v1699_v2 = vmul.f32 %v3035_v15, %v3019_v53 }
 0x5cf   : > { %1706 = vxpose.xlu0.b32.start [1/8] (short) (narrow) %v1698_v22, 64 }
 0x5d0   : > { %v3037_v7 = vpop.eup %3036 }
 0x5d1   : > { %v1700_v50 = vmul.f32 %v3037_v7, %v3021_v55  ;;  %v3039_v26 = vpop.eup %3038  ;;  %v2965_v55 = vld [vmem:[#allocation10 + $0x20] sm:$0xff]  }
 0x5d2   : > { %v1701_v19 = vmul.f32 %v3039_v26, %v3023_v60 }
 0x5d3   : > { %1707 = vxpose.xlu0.b32.cont [2/8] (short) (narrow) %v1699_v2, 64 }
 0x5d4   : > { %v3041_v44 = vpop.eup %3040 }
 0x5d5   : > { %v1702_v25 = vmul.f32 %v3041_v44, %v3025_v8  ;;  %v3043_v49 = vpop.eup %3042 }
 0x5d6   : > { %v1703_v5 = vmul.f32 %v3043_v49, %v3027_v9 }
 0x5d7   : > { %1708 = vxpose.xlu0.b32.cont [3/8] (short) (narrow) %v1700_v50, 64 }
 0x5d8   : > { %v3045_v12 = vpop.eup %3044 }
 0x5d9   : > { %v1704_v32 = vmul.f32 %v3045_v12, %v3029_v36  ;;  %v3047_v4 = vpop.eup %3046 }
 0x5da   : > { %v1705_v3 = vmul.f32 %v3047_v4, %v3031_v28  ;;  %v2970_v28 = vld [vmem:[#allocation8 + $0x18] sm:$0xff]  }
 0x5db   : > { %1709 = vxpose.xlu0.b32.cont [4/8] (short) (narrow) %v1701_v19, 64 }
 0x5df   : > { %1710 = vxpose.xlu0.b32.cont [5/8] (short) (narrow) %v1702_v25, 64 }
 0x5e3   : > { %1711 = vxpose.xlu0.b32.cont [6/8] (short) (narrow) %v1703_v5, 64 }
 0x5e7   : > { %1712 = vxpose.xlu0.b32.cont [7/8] (short) (narrow) %v1704_v32, 64 }
 0x5eb   : > { %1713 = vxpose.xlu0.b32.end [8/8] (short) (narrow) %v1705_v3, 64 }
 0x64b   : > { %v1722_v56 = vpop.trf.xlu0 }
 0x64f   : > { %v1723_v46 = vpop.trf.xlu0 }
 0x650   : > { %v1738_v35 = vpack.c.bf16 %v1723_v46, %v1722_v56 }
 0x652   : > { %2585 = vmatmul.mubr.msk.bf16.vlgmr.msra.gmra.mxu0 %vm1183_vm0, %v1738_v35  ;;  %2772 = vmatprep.mubr.msk.bf16.mxu1 %vm1183_vm0, %v1738_v35 }
 0x653   : > { %v1724_v57 = vpop.trf.xlu0  ;;  %2781 = vmatpush3.bf16.msra.mxu0 %v2960_v47  ;;  %1796 = vmatprep.mubr.bf16.mxu0 %v3296_v0 }
 0x654   : > { %2782 = vmatprep.subr.bf16.mxu0 %v2961_v11 }
 0x657   : > { %v1725_v53 = vpop.trf.xlu0  ;;  %2783 = vmatpush3.bf16.msra.mxu0 %v2961_v11 }
 0x658   : > { %v1739_v58 = vpack.c.bf16 %v1725_v53, %v1724_v57  ;;  %2784 = vmatprep.subr.bf16.mxu0 %v2963_v52 }
 0x65a   : > { %2586 = vmatmul.mubr.msk.bf16.gmra.mxu0 %vm1183_vm0, %v1739_v58  ;;  %2773 = vmatmul.mubr.msk.bf16.vlgmr.msra.gmra.mxu1 %vm1183_vm0, %v1739_v58 }
 0x65b   : > { %2805 = vmatpush3.bf16.msra.mxu1 %v2962_v48  ;;  %v1726_v60 = vpop.trf.xlu0  ;;  %2785 = vmatpush3.bf16.msra.mxu0 %v2963_v52 }
 0x65c   : > { %2806 = vmatprep.subr.bf16.mxu1 %v2964_v54  ;;  %2786 = vmatprep.subr.bf16.mxu0 %v2965_v55 }
 0x65d   : > { %1806 = vmatprep.mubr.bf16.mxu0 %v3296_v0 }
 0x65f   : > { %2807 = vmatpush3.bf16.msra.mxu1 %v2964_v54  ;;  %v1727_v8 = vpop.trf.xlu0  ;;  %2787 = vmatpush3.bf16.msra.mxu0 %v2965_v55 }
 0x660   : > { %v1740_v9 = vpack.c.bf16 %v1727_v8, %v1726_v60  ;;  %2808 = vmatprep.subr.bf16.mxu1 %v2966_v63  ;;  %2788 = vmatprep.subr.bf16.mxu0 %v2967_v6 }
 0x662   : > { %2587 = vmatmul.mubr.msk.bf16.gmra.mxu0 %vm1183_vm0, %v1740_v9  ;;  %2776 = vmatprep.mubr.msk.bf16.mxu1 %vm1183_vm0, %v1740_v9 }
 0x663   : > { %2809 = vmatpush3.bf16.msra.mxu1 %v2966_v63  ;;  %v1728_v36 = vpop.trf.xlu0  ;;  %2789 = vmatpush3.bf16.msra.mxu0 %v2967_v6 }
 0x664   : > { %2810 = vmatprep.subr.bf16.mxu1 %v2968_v27  ;;  %2790 = vmatprep.subr.bf16.mxu0 %v2969_v31 }
 0x665   : > { %1816 = vmatprep.mubr.bf16.mxu0 %v3296_v0  ;;  %v2974_v0 = vld [vmem:[#allocation8 + $0x8] sm:$0xff]  }
 0x667   : > { %2811 = vmatpush3.bf16.msra.mxu1 %v2968_v27  ;;  %v1729_v59 = vpop.trf.xlu0  ;;  %2791 = vmatpush3.bf16.msra.mxu0 %v2969_v31 }
 0x668   : > { %v1741_v43 = vpack.c.bf16 %v1729_v59, %v1728_v36  ;;  %2812 = vmatprep.subr.bf16.mxu1 %v2970_v28  ;;  %2792 = vmatprep.subr.bf16.mxu0 %v2971_v41 }
 0x66a   : > { %2588 = vmatmul.mubr.msk.bf16.gmra.mxu0 %vm1183_vm0, %v1741_v43  ;;  %2777 = vmatmul.mubr.msk.bf16.gmra.mxu1 %vm1183_vm0, %v1741_v43 }
 0x66b   : > { %2813 = vmatpush3.bf16.msra.mxu1 %v2970_v28  ;;  %2793 = vmatpush3.bf16.msra.mxu0 %v2971_v41 }
 0x66c   : > { %2796 = vmatprep.mubr.bf16.mxu0 %v1948_v16  ;;  %2814 = vmatprep.subr.bf16.mxu1 %v2972_v13  ;;  %v2981_v16 = vld [vmem:[#allocation11 + $0x10] sm:$0xff]  }
 0x66d   : > { %2794 = vmatprep.subr.bf16.mxu0 %v2973_v17  ;;  %2820 = vmatprep.mubr.bf16.mxu1 %v3555_v40  ;;  %v2979_v40 = vld [vmem:[#allocation11 + $0x20] sm:$0xff]  }
 0x66f   : > { %2815 = vmatpush3.bf16.msra.mxu1 %v2972_v13  ;;  %2795 = vmatpush3.bf16.msra.mxu0 %v2973_v17 }
 0x670   : > { %2816 = vmatprep.subr.bf16.mxu1 %v2974_v0  ;;  %2828 = vmatprep.subr.bf16.mxu0 %v2976_v37 }
 0x672   : > { %2797 = vmatmul.mubr.bf16.vlgmr.msra.gmra.mxu0 %v1949_v30 }
 0x673   : > { %2817 = vmatpush3.bf16.msra.mxu1 %v2974_v0  ;;  %2800 = vmatprep.mubr.bf16.mxu0 %v1950_v1 }
 0x674   : > { %2818 = vmatprep.subr.bf16.mxu1 %v2975_v21  ;;  %2829 = vmatpush3.bf16.msra.mxu0 %v2976_v37 }
 0x675   : > { %2830 = vmatprep.subr.bf16.mxu0 %v2977_v29 }
 0x677   : > { %2819 = vmatpush3.bf16.msra.mxu1 %v2975_v21 }
 0x678   : > { %2831 = vmatpush3.bf16.msra.mxu0 %v2977_v29 }
 0x679   : > { %2832 = vmatprep.subr.bf16.mxu0 %v2978_v14 }
 0x67a   : > { %2821 = vmatmul.mubr.bf16.vlgmr.msra.gmra.mxu1 %v3567_v51  ;;  %2801 = vmatmul.mubr.bf16.gmra.mxu0 %v1951_v33  ;;  %v2983_v51 = vld [vmem:[#allocation11] sm:$0xff]  }
 0x67b   : > { %2824 = vmatprep.mubr.bf16.mxu1 %v3579_v62 }
 0x67c   : > { %2833 = vmatpush3.bf16.msra.mxu0 %v2978_v14 }
 0x67d   : > { %2834 = vmatprep.subr.bf16.mxu0 %v2979_v40 }
 0x680   : > { %2835 = vmatpush3.bf16.msra.mxu0 %v2979_v40 }
 0x681   : > { %2836 = vmatprep.subr.bf16.mxu0 %v2980_v39 }
 0x682   : > { %2825 = vmatmul.mubr.bf16.gmra.mxu1 %v3591_v10 }
 0x684   : > { %2837 = vmatpush3.bf16.msra.mxu0 %v2980_v39 }
 0x685   : > { %2838 = vmatprep.subr.bf16.mxu0 %v2981_v16 }
 0x688   : > { %2839 = vmatpush3.bf16.msra.mxu0 %v2981_v16 }
 0x689   : > { %2840 = vmatprep.subr.bf16.mxu0 %v2982_v42 }
 0x68c   : > { %2841 = vmatpush3.bf16.msra.mxu0 %v2982_v42 }
 0x68d   : > { %2842 = vmatprep.subr.bf16.mxu0 %v2983_v51 }
 0x690   : > { %2843 = vmatpush3.bf16.msra.mxu0 %v2983_v51 }
 0x712   : > { %v1788_v24 = vpop.f32.mrf.mxu0 }
 0x713   : > { %v1892_v15 = vmax.f32 %v1788_v24, 0.0 }
 0x714   : > { %v1790_v62 = vpop.f32.mrf.mxu0 }
 0x715   : > { %v1893_v1 = vmax.f32 %v1790_v62, 0.0 }
 0x716   : > { %v1792_v30 = vpop.f32.mrf.mxu0 }
 0x717   : > { %v1895_v18 = vmax.f32 %v1792_v30, 0.0  ;;  %v1916_v50 = vadd.f32 %v1893_v1, %v1892_v15 }
 0x718   : > { %v1794_v45 = vpop.f32.mrf.mxu0 }
 0x719   : > { %v1896_v61 = vmax.f32 %v1794_v45, 0.0 }
 0x71a   : > { %v1798_v10 = vpop.f32.mrf.mxu0  ;;  %v2774_v34 = vpop.f32.mrf.mxu1 }
 0x71b   : > { %v1898_v20 = vmax.f32 %v1798_v10, 0.0  ;;  %v1917_v26 = vadd.f32 %v1896_v61, %v1895_v18  ;;  %v1900_v5 = vmax.f32 %v2774_v34, 0.0 }
 0x71c   : > { %v1800_v23 = vpop.f32.mrf.mxu0  ;;  %v1861_v33 = vpop.f32.mrf.mxu1 }
 0x71d   : > { %v1899_v22 = vmax.f32 %v1800_v23, 0.0  ;;  %v1894_v47 = vmax.f32 %v1861_v33, 0.0 }
 0x71e   : > { %v1802_v2 = vpop.f32.mrf.mxu0  ;;  %v2775_v7 = vpop.f32.mrf.mxu1 }
 0x71f   : > { %v1918_v19 = vadd.f32 %v1899_v22, %v1898_v20  ;;  %v1901_v44 = vmax.f32 %v1802_v2, 0.0  ;;  %v1924_v32 = vadd.f32 %v1916_v50, %v1894_v47  ;;  %v1903_v4 = vmax.f32 %v2775_v7, 0.0  ;;  %v2617_v50 = vld [vmem:[%s3958_s7] ss:$0 sm:$0xff] }
 0x720   : > { %v1804_v38 = vpop.f32.mrf.mxu0  ;;  %v1864_v48 = vpop.f32.mrf.mxu1 }
 0x721   : > { %v1902_v25 = vmax.f32 %v1804_v38, 0.0  ;;  %v1897_v49 = vmax.f32 %v1864_v48, 0.0  ;;  %v1926_v35 = vadd.f32 %v1918_v19, %v1900_v5 }
 0x722   : > { %v1808_v12 = vpop.f32.mrf.mxu0 }
 0x723   : > { %v1919_v3 = vadd.f32 %v1902_v25, %v1901_v44  ;;  %v1925_v56 = vadd.f32 %v1917_v26, %v1897_v49  ;;  %v1904_v27 = vmax.f32 %v1808_v12, 0.0 }
 0x724   : > { %v1810_v46 = vpop.f32.mrf.mxu0 }
 0x725   : > { %v1927_v11 = vadd.f32 %v1919_v3, %v1903_v4  ;;  %v2194_v57 = vpack.c.bf16 %v1925_v56, %v1924_v32  ;;  %v1905_v60 = vmax.f32 %v1810_v46, 0.0 }
 0x726   : > { %v1812_v52 = vpop.f32.mrf.mxu0 }
 0x727   : > { %v2195_v53 = vpack.c.bf16 %v1927_v11, %v1926_v35  ;;  %2844 = vmatprep.mubr.bf16.mxu0 %v2194_v57  ;;  %v1907_v31 = vmax.f32 %v1812_v52, 0.0  ;;  %v1920_v43 = vadd.f32 %v1905_v60, %v1904_v27 }
 0x728   : > { %v1814_v58 = vpop.f32.mrf.mxu0 }
 0x729   : > { %2845 = vmatmul.mubr.bf16.vlgmr.msra.gmra.mxu0 %v2195_v53  ;;  %v1908_v63 = vmax.f32 %v1814_v58, 0.0 }
 0x72a   : > { %v1818_v54 = vpop.f32.mrf.mxu0  ;;  %v2778_v55 = vpop.f32.mrf.mxu1 }
 0x72b   : > { %v1910_v41 = vmax.f32 %v1818_v54, 0.0  ;;  %v1921_v13 = vadd.f32 %v1908_v63, %v1907_v31  ;;  %v1912_v40 = vmax.f32 %v2778_v55, 0.0 }
 0x72c   : > { %v1820_v6 = vpop.f32.mrf.mxu0  ;;  %v1877_v8 = vpop.f32.mrf.mxu1 }
 0x72d   : > { %v1911_v9 = vmax.f32 %v1820_v6, 0.0  ;;  %v1906_v59 = vmax.f32 %v1877_v8, 0.0 }
 0x72e   : > { %v1822_v36 = vpop.f32.mrf.mxu0  ;;  %v2779_v28 = vpop.f32.mrf.mxu1 }
 0x72f   : > { %v1922_v37 = vadd.f32 %v1911_v9, %v1910_v41  ;;  %v1913_v21 = vmax.f32 %v1822_v36, 0.0  ;;  %v1928_v39 = vadd.f32 %v1920_v43, %v1906_v59  ;;  %v1915_v16 = vmax.f32 %v2779_v28, 0.0 }
 0x730   : > { %v1824_v17 = vpop.f32.mrf.mxu0  ;;  %v1880_v0 = vpop.f32.mrf.mxu1 }
 0x731   : > { %v1914_v29 = vmax.f32 %v1824_v17, 0.0  ;;  %v1909_v14 = vmax.f32 %v1880_v0, 0.0  ;;  %v1930_v24 = vadd.f32 %v1922_v37, %v1912_v40 }
 0x732   : > { %v2798_v10 = vpop.f32.mrf.mxu0 }
 0x733   : > { %v1923_v42 = vadd.f32 %v1914_v29, %v1913_v21  ;;  %v1929_v51 = vadd.f32 %v1921_v13, %v1909_v14 }
 0x734   : > { %v2050_v34 = vpop.f32.mrf.mxu0 }
 0x735   : > { %v1931_v62 = vadd.f32 %v1923_v42, %v1915_v16  ;;  %v2196_v30 = vpack.c.bf16 %v1929_v51, %v1928_v39 }
 0x736   : > { %v2799_v1 = vpop.f32.mrf.mxu0 }
 0x737   : > { %2848 = vmatprep.mubr.bf16.mxu0 %v2196_v30  ;;  %v2197_v45 = vpack.c.bf16 %v1931_v62, %v1930_v24 }
 0x738   : > { %v2053_v61 = vpop.f32.mrf.mxu0 }
 0x739   : > { %2849 = vmatmul.mubr.bf16.gmra.mxu0 %v2197_v45 }
 0x73a   : > { %v2802_v23 = vpop.f32.mrf.mxu0  ;;  %v2822_v33 = vpop.f32.mrf.mxu1 }
 0x73b   : > { %v2172_v20 = vadd.f32 %v2822_v33, %v2798_v10 }
 0x73c   : > { %v2066_v22 = vpop.f32.mrf.mxu0  ;;  %v2163_v15 = vpop.f32.mrf.mxu1 }
 0x73d   : > { %v2164_v26 = vadd.f32 %v2163_v15, %v2050_v34 }
 0x73e   : > { %v2803_v18 = vpop.f32.mrf.mxu0  ;;  %v2823_v2 = vpop.f32.mrf.mxu1 }
 0x73f   : > { %v2175_v44 = vadd.f32 %v2823_v2, %v2799_v1 }
 0x740   : > { %v2069_v7 = vpop.f32.mrf.mxu0  ;;  %v2166_v48 = vpop.f32.mrf.mxu1 }
 0x741   : > { %v2167_v12 = vadd.f32 %v2166_v48, %v2053_v61 }
 0x742   : > { %v2826_v3 = vpop.f32.mrf.mxu1 }
 0x743   : > { %v2188_v53 = vadd.f32 %v2826_v3, %v2802_v23 }
 0x744   : > { %v2179_v57 = vpop.f32.mrf.mxu1 }
 0x745   : > { %v2180_v54 = vadd.f32 %v2179_v57, %v2066_v22 }
 0x746   : > { %v2827_v52 = vpop.f32.mrf.mxu1 }
 0x747   : > { %v2191_v6 = vadd.f32 %v2827_v52, %v2803_v18 }
 0x748   : > { %v2182_v60 = vpop.f32.mrf.mxu1 }
 0x749   : > { %v2183_v31 = vadd.f32 %v2182_v60, %v2069_v7 }
 0x7e9   : > { %v2846_v47 = vpop.f32.mrf.mxu0 }
 0x7ea   : > { %v2329_v38 = vadd.f32 %v2846_v47, %v2172_v20 }
 0x7eb   : > { %v2296_v19 = vpop.f32.mrf.mxu0 }
 0x7ec   : > { %v2344_v25 = vadd.f32 %v2617_v50, %v2329_v38  ;;  %v2327_v49 = vadd.f32 %v2296_v19, %v2164_v26 }
 0x7ed   : > { %v2847_v5 = vpop.f32.mrf.mxu0 }
 0x7ee   : > { %2352 = vst [vmem:[%s3891_s10 + $0x10] sm:$0xff] %v2344_v25  ;;  %v2342_v32 = vadd.f32 %v2617_v50, %v2327_v49  ;;  %v2330_v4 = vadd.f32 %v2847_v5, %v2175_v44 }
 0x7ef   : > { %v2299_v56 = vpop.f32.mrf.mxu0 }
 0x7f0   : > { %2350 = vst [vmem:[%s3891_s10] sm:$0xff] %v2342_v32  ;;  %v2345_v46 = vadd.f32 %v2617_v50, %v2330_v4  ;;  %v2328_v35 = vadd.f32 %v2299_v56, %v2167_v12 }
 0x7f2   : > { %2353 = vst [vmem:[%s3891_s10 + $0x18] sm:$0xff] %v2345_v46  ;;  %v2343_v11 = vadd.f32 %v2617_v50, %v2328_v35 }
 0x7f4   : > { %2351 = vst [vmem:[%s3891_s10 + $0x8] sm:$0xff] %v2343_v11 }
 0x7f9   : > { %v2850_v58 = vpop.f32.mrf.mxu0 }
 0x7fa   : > { %v2333_v55 = vadd.f32 %v2850_v58, %v2188_v53 }
 0x7fb   : > { %v2312_v63 = vpop.f32.mrf.mxu0 }
 0x7fc   : > { %v2348_v8 = vadd.f32 %v2617_v50, %v2333_v55  ;;  %v2331_v9 = vadd.f32 %v2312_v63, %v2180_v54 }
 0x7fd   : > { %v2851_v27 = vpop.f32.mrf.mxu0 }
 0x7fe   : > { %2356 = vst [vmem:[%s3891_s10 + $0x30] sm:$0xff] %v2348_v8  ;;  %v2346_v36 = vadd.f32 %v2617_v50, %v2331_v9  ;;  %v2334_v28 = vadd.f32 %v2851_v27, %v2191_v6 }
 0x7ff   : > { %v2315_v41 = vpop.f32.mrf.mxu0 }
 0x800   : > { %2354 = vst [vmem:[%s3891_s10 + $0x20] sm:$0xff] %v2346_v36  ;;  %v2349_v59 = vadd.f32 %v2617_v50, %v2334_v28  ;;  %v2332_v43 = vadd.f32 %v2315_v41, %v2183_v31 }
 0x802   : > { %2357 = vst [vmem:[%s3891_s10 + $0x38] sm:$0xff] %v2349_v59  ;;  %v2347_v13 = vadd.f32 %v2617_v50, %v2332_v43 }
 0x804   : > { %2355 = vst [vmem:[%s3891_s10 + $0x28] sm:$0xff] %v2347_v13 }
 0x805   : > { %3219 = shalt.err (!%p3216_p3)
}
 0x806   : > { %s3220_s9 = scalar_lea.hbm %s3906_s2, 1024  ;;  %s3224_s16 = scalar_lea.hbm %s3959_s8, 2048 }
 0x807   : > { %p3221_p4 = scmp.ne.s32.totalorder %s3906_s2, %s3220_s9  ;;  %p3225_p2 = scmp.lt.s32.totalorder %s3906_s2, %s3959_s8 }
 0x808   : > { %p3226_p7 = scmp.lt.s32.totalorder %s3224_s16, %s3220_s9 }
 0x809   : > { %p3222_p12 = pnand %p3221_p4, %p3983_p11 }
 0x80a   : > { %p3227_p8 = por %p3226_p7, %p3225_p2 }
 0x80b   : > { %p3223_p6 = pneg %p3222_p12 }
 0x80d   : > { %p3228_p10 = pnand %p3227_p8, %p3223_p6 }
 0x80f   : > { %3231 = shalt.err (!%p3228_p10)
}
 0x810   : > { %s3300_s19 = smov 128   ;;  %s3301_s17 = smov 8  }
 0x811   : > { %2874 = dma.vmem_to_hbm [thread:$0]  (%p3983_p11), %s3900_s21, 1024, %s3906_s2, %s2359_s24, %s3300_s19, %s3300_s19, %s3301_s17  }
 0x812 PF: > { %s2387_s26 = sand.u32 1, %s3270_s27   ;;  %p3984_p0 = scmp.ne.s32.totalorder %s3973_s23, 0 }
 0x813   : > { %p3985_p13 = scmp.ge.s32.totalorder %s3282_s30, 2  ;;  %s2388_s11 = scalar_lea.sflag [#allocation4], %s2387_s26 }
 0x815   : > { %p2897_p5 = pnand %p3985_p13, %p3984_p0 }
 0x817   : > { %p2898_p9 = pneg %p2897_p5 }
 0x819   : > { %3265 = dma.done.wait (%p2898_p9), %s2388_s11, 1024  }
 0x81a   : > { %3267 = vsyncadd (%p2898_p9), %s2388_s11, 4294966272  ;;  %p24_p1 = scmp.ge.s32.totalorder %s3455_s18, 4   ;;  %s3986_s27 = smov %s3274_s28 }
 0x81b   : > { %s3987_s28 = smov %s3278_s29  ;;  %s3988_s29 = smov %s3467_s14 }
 0x81c   : > { %s3989_s30 = smov %s3455_s18  ;;  %26 = sbr.rel (!%p24_p1) target bundleno = 11 (0xb), region = 117 }
 0x821   :  { %2393 = vsyncpa [#allocation3], 1 }
 0x822   :  { %2395 = vsyncpa [#allocation3 + $0x1], 1 }
 0x823   :  { %2396 = vsyncpa [#allocation6], 1 }
 0x824   :  { %2397 = vsyncpa [#allocation9], 1 }
 0x825   :  { %2398 = vsyncpa [#allocation12], 1 }
 0x826   :  { %2399 = vsyncpa [#allocation4], 1 }
 0x827   :  { %2401 = vsyncpa [#allocation4 + $0x1], 1 }

// kernel: tpu_custom_call.1
= control target key start
LH: loop header
LB: loop body
LE: loop exit
PB: predicated region body
PF: predicated region fallthrough
CT: control target
= control target key end

     0   :  { %s3951_s0 = inlined_call_operand.hbm [shape: f32[2,64,128], index: 0, kind: input, shape index: {}]   ;;  %s3952_s1 = inlined_call_operand.hbm [shape: bf16[64,64], index: 1, kind: input, shape index: {}]   ;;  %s3953_s2 = inlined_call_operand.hbm [shape: bf16[128,1024], index: 2, kind: input, shape index: {}]   ;;  %s3954_s3 = inlined_call_operand.vmem [shape: f32[2,128], index: 3, kind: input, shape index: {}]   ;;  %s3955_s4 = inlined_call_operand.hbm [shape: bf16[128,128], index: 4, kind: input, shape index: {}]   ;;  %s3956_s5 = inlined_call_operand.hbm [shape: bf16[128,128], index: 5, kind: input, shape index: {}]   ;;  %s3957_s6 = inlined_call_operand.hbm [shape: bf16[128,128], index: 6, kind: input, shape index: {}]   ;;  %s3958_s7 = inlined_call_operand.vmem [shape: f32[1,128], index: 7, kind: input, shape index: {}]   ;;  %s3959_s8 = inlined_call_operand.hbm [shape: f32[2,64,128], index: 8, kind: output, shape index: {}]  }
   0x1   :  { %3964 = sst [smem:[#allocation19_spill]] %s3952_s1 }
   0x2   :  { %3965 = sst [smem:[#allocation20_spill]] %s3953_s2 }
   0x3   :  { %13 = vsyncpa [#allocation3], 0 }
   0x4   :  { %15 = vsyncpa [#allocation3 + $0x1], 0 }
   0x5   :  { %16 = vsyncpa [#allocation6], 0 }
   0x6   :  { %17 = vsyncpa [#allocation9], 0 }
   0x7   :  { %18 = vsyncpa [#allocation12], 0 }
   0x8   :  { %19 = vsyncpa [#allocation4], 0 }
   0x9   :  { %21 = vsyncpa [#allocation4 + $0x1], 0  ;;  %s3347_s27 = smov 0   ;;  %s3349_s28 = smov 0  }
   0xa   :  { %s3351_s29 = smov 0   ;;  %s3353_s30 = smov 0  }
   0xb LB: > { %s3284_s9 = smov [#allocation5]   ;;  %s3368_s11 = sadd.s32 4294967295, %s3282_s30   ;;  %s3282_s30 = sphi %s3353_s30, %s3989_s30   ;;  %s3278_s29 = sphi %s3351_s29, %s3988_s29   ;;  %s3274_s28 = sphi %s3349_s28, %s3987_s28   ;;  %s3270_s27 = sphi %s3347_s27, %s3986_s27  }
   0xc   : > { %s243_s10 = sshll.u32 %s3284_s9, 4  ;;  %p2494_p0 = scmp.ge.s32.totalorder %s3282_s30, 1  ;;  %s244_s10 = int_to_ptr.vmem [resolvable:$true] %s243_s10 }
   0xd   : > { %p3960_p1 = scmp.eq.s32.totalorder %s3368_s11, 0  ;;  %p231_p2 = scmp.lt.s32.totalorder %s3282_s30, 3 }
   0xe   : > { %s3285_s13 = smov [#allocation8]   ;;  %s3286_s16 = smov [#allocation7]  }
   0xf   : > { %p3373_p3 = pnand %p2494_p0, %p231_p2  ;;  %s272_s14 = sshll.u32 %s3285_s13, 4  ;;  %s3386_s14 = int_to_ptr.vmem [resolvable:$true] %s272_s14 }
  0x10   : > { %s256_s17 = sshll.u32 %s3286_s16, 4  ;;  %s3059_s19 = scalar_lea.vmem %s244_s10, 512  ;;  %s3388_s17 = int_to_ptr.vmem [resolvable:$true] %s256_s17 }
  0x11   : > { %s3966_s12 = scalar_select %p3373_p3, 1, 0 }
  0x12   : > { %p2876_p5 = pneg %p3373_p3  ;;  %p3060_p8 = scmp.ne.s32.totalorder %s244_s10, %s3059_s19 }
  0x13   : > { %p3067_p11 = scmp.lt.s32.totalorder %s244_s10, %s244_s10  ;;  %p3068_p12 = scmp.lt.s32.totalorder %s3059_s19, %s3059_s19 }
  0x14   : > { %p3382_p6 = pnand %p2876_p5, %p3960_p1 }
  0x15   : > { %p3069_p13 = por %p3068_p12, %p3067_p11 }
  0x16   : > { %p3392_p7 = pneg %p3382_p6 }
  0x18   : > { %p3062_p9 = pnand %p3060_p8, %p3392_p7 }
  0x1a   : > { %p3063_p10 = pneg %p3062_p9 }
  0x1c   : > { %p3070_p0 = pnand %p3069_p13, %p3063_p10 }
  0x1e   : > { %3073 = shalt.err (!%p3070_p0)
}
  0x1f   : > { %s3287_s20 = smov 64   ;;  %s3288_s21 = smov 4  }
  0x20   : > { %s3969_s1 = sld [smem:[#allocation19_spill]]  ;;  %s3085_s24 = scalar_lea.vmem %s3386_s14, 1024 }
  0x21   : > { %p3086_p2 = scmp.ne.s32.totalorder %s3386_s14, %s3085_s24  ;;  %p3093_p9 = scmp.lt.s32.totalorder %s3386_s14, %s3386_s14 }
  0x22   : > { %p3094_p10 = scmp.lt.s32.totalorder %s3085_s24, %s3085_s24 }
  0x23   : > { %p3088_p5 = pnand %p3086_p2, %p3392_p7 }
  0x24   : > { %p3095_p11 = por %p3094_p10, %p3093_p9 }
  0x25   : > { %p3089_p8 = pneg %p3088_p5 }
  0x26   : > { %2879 = dma.hbm_to_vmem [thread:$0]  (!%p3382_p6), %s3969_s1, 512, %s244_s10, [#allocation6], %s3287_s20, %s3287_s20, %s3288_s21  }
  0x27   : > { %p3096_p12 = pnand %p3095_p11, %p3089_p8 }
  0x29   : > { %3099 = shalt.err (!%p3096_p12)
}
  0x2a   : > { %2885 = dma.hbm_to_vmem [thread:$0]  (!%p3382_p6), %s3955_s4, 1024, %s3386_s14, [#allocation9], %s3287_s20, %s3287_s20, %s3288_s21  }
  0x2b   : > { %s3111_s9 = scalar_lea.vmem %s3388_s17, 8192  ;;  %p3119_p5 = scmp.lt.s32.totalorder %s3388_s17, %s3388_s17 }
  0x2c   : > { %p3112_p13 = scmp.ne.s32.totalorder %s3388_s17, %s3111_s9  ;;  %p3120_p8 = scmp.lt.s32.totalorder %s3111_s9, %s3111_s9 }
  0x2e   : > { %p3114_p0 = pnand %p3112_p13, %p3392_p7  ;;  %p3121_p9 = por %p3120_p8, %p3119_p5 }
  0x30   : > { %p3115_p2 = pneg %p3114_p0 }
  0x32   : > { %p3122_p10 = pnand %p3121_p9, %p3115_p2 }
  0x34   : > { %3125 = shalt.err (!%p3122_p10)
}
  0x35   : > { %s3289_s10 = smov 512   ;;  %s3290_s13 = smov 32  }
  0x36   : > { %s3970_s2 = sld [smem:[#allocation20_spill]]  ;;  %s3291_s14 = smov [#allocation10]  }
  0x37   : > { %s285_s22 = sshll.u32 %s3291_s14, 4  ;;  %s3292_s23 = smov [#allocation11]   ;;  %s286_s22 = int_to_ptr.vmem [resolvable:$true] %s285_s22 }
  0x38   : > { %s298_s24 = sshll.u32 %s3292_s23, 4  ;;  %s3137_s25 = scalar_lea.vmem %s286_s22, 1024  ;;  %s299_s24 = int_to_ptr.vmem [resolvable:$true] %s298_s24 }
  0x39   : > { %p3138_p11 = scmp.ne.s32.totalorder %s286_s22, %s3137_s25  ;;  %p3145_p0 = scmp.lt.s32.totalorder %s286_s22, %s286_s22 }
  0x3a   : > { %p3146_p2 = scmp.lt.s32.totalorder %s3137_s25, %s3137_s25 }
  0x3b   : > { %p3140_p12 = pnand %p3138_p11, %p3392_p7 }
  0x3c   : > { %2882 = dma.hbm_to_vmem [thread:$0]  (!%p3382_p6), %s3970_s2, 8192, %s3388_s17, [#allocation6], %s3289_s10, %s3289_s10, %s3290_s13  }
  0x3d   : > { %p3141_p13 = pneg %p3140_p12  ;;  %p3147_p5 = por %p3146_p2, %p3145_p0 }
  0x3f   : > { %p3148_p8 = pnand %p3147_p5, %p3141_p13 }
  0x41   : > { %3151 = shalt.err (!%p3148_p8)
}
  0x42   : > { %2888 = dma.hbm_to_vmem [thread:$0]  (!%p3382_p6), %s3956_s5, 1024, %s286_s22, [#allocation9], %s3287_s20, %s3287_s20, %s3288_s21  }
  0x43   : > { %s3163_s9 = scalar_lea.vmem %s299_s24, 1024  ;;  %p3171_p12 = scmp.lt.s32.totalorder %s299_s24, %s299_s24 }
  0x44   : > { %p3164_p9 = scmp.ne.s32.totalorder %s299_s24, %s3163_s9  ;;  %p3172_p0 = scmp.lt.s32.totalorder %s3163_s9, %s3163_s9 }
  0x46   : > { %p3166_p10 = pnand %p3164_p9, %p3392_p7  ;;  %p3173_p13 = por %p3172_p0, %p3171_p12 }
  0x48   : > { %p3167_p11 = pneg %p3166_p10 }
  0x4a   : > { %p3174_p2 = pnand %p3173_p13, %p3167_p11 }
  0x4c   : > { %3177 = shalt.err (!%p3174_p2)
}
  0x4d   : > { %2891 = dma.hbm_to_vmem [thread:$0]  (!%p3382_p6), %s3957_s6, 1024, %s299_s24, [#allocation12], %s3287_s20, %s3287_s20, %s3288_s21  }
  0x4e   : > { %s2493_s15 = sadd.s32 4294967294, %s3282_s30   ;;  %s3455_s18 = sadd.s32 1, %s3282_s30  }
  0x4f   : > { %s34_s16 = sadd.s32 1, %s3278_s29  ;;  %s31_s19 = ssub.s32 %s3282_s30, %s3455_s18 }
  0x50   : > { %p41_p7 = scmp.ne.s32.totalorder %s3278_s29, %s3274_s28  ;;  %p32_p5 = scmp.eq.s32.totalorder %s31_s19, 0 }
  0x51   : > { %p42_p8 = scmp.eq.s32.totalorder %s3282_s30, 0  ;;  %p47_p9 = scmp.ne.s32.totalorder %s3274_s28, %s3270_s27 }
  0x52   : > { %p218_p10 = scmp.eq.s32.totalorder %s3368_s11, 1  ;;  %p224_p0 = scmp.eq.s32.totalorder %s2493_s15, 1 }
  0x53   : > { %s3467_s14 = scalar_select %p32_p5, %s3278_s29, %s34_s16  }
  0x54   : > { %p43_p11 = por %p42_p8, %p41_p7  ;;  %p3471_p12 = por %p3960_p1, %p47_p9 }
  0x55   : > { %p3475_p6 = por %p218_p10, %p41_p7  ;;  %p2905_p13 = scmp.lt.s32.totalorder %s3282_s30, 2 }
  0x56   : > { %s3971_s22 = scalar_select %p3471_p12, 1, 0 }
  0x57   : > { %s3972_s20 = scalar_select %p3475_p6, 1, 0 }
  0x58   : > { %s315_s21 = sand.u32 1, %s3278_s29   ;;  %p3481_p2 = por %p224_p0, %p47_p9 }
  0x59   : > { %s2501_s24 = sshll.u32 %s315_s21, 6  ;;  %s2623_s25 = sshll.u32 %s3282_s30, 10 }
  0x5a   : > { %s3973_s23 = scalar_select %p3481_p2, 1, 0 }
  0x5b   : > { %s3489_s9 = scalar_lea.hbm %s3951_s0, %s2623_s25  ;;  %s319_s10 = scalar_lea.vmem [#allocation2], %s2501_s24 }
  0x5c   : > { %s326_s13 = sshll.u32 %s319_s10, 4  ;;  %p3491_p7 = pnand %p2905_p13, %p43_p11  ;;  %s3495_s13 = int_to_ptr.vmem [resolvable:$true] %s326_s13 }
  0x5d   : > { %s3497_s16 = scalar_lea.sflag [#allocation3], %s315_s21  ;;  %s3178_s19 = scalar_lea.hbm %s3489_s9, 1024 }
  0x5e   : > { %p3179_p5 = scmp.ne.s32.totalorder %s3489_s9, %s3178_s19  ;;  %p3180_p8 = pneg %p3491_p7 }
  0x5f   : > { %s3183_s24 = scalar_lea.hbm %s3951_s0, 2048  ;;  %p3184_p11 = scmp.lt.s32.totalorder %s3489_s9, %s3951_s0 }
  0x60   : > { %p3181_p9 = pnand %p3180_p8, %p3179_p5  ;;  %p3185_p0 = scmp.lt.s32.totalorder %s3183_s24, %s3178_s19 }
  0x62   : > { %p3182_p10 = pneg %p3181_p9  ;;  %p3186_p13 = por %p3185_p0, %p3184_p11 }
  0x64   : > { %p3187_p4 = pnand %p3186_p13, %p3182_p10 }
  0x66   : > { %3190 = shalt.err (!%p3187_p4)
}
  0x67   : > { %s3191_s21 = scalar_lea.vmem %s3495_s13, 1024  ;;  %s3293_s1 = smov [#allocation2]  }
  0x68   : > { %p3192_p1 = scmp.ne.s32.totalorder %s3495_s13, %s3191_s21  ;;  %s3196_s2 = sshll.u32 %s3293_s1, 4  ;;  %s3197_s2 = int_to_ptr.vmem [resolvable:$false] %s3196_s2 }
  0x69   : > { %s3198_s25 = scalar_lea.vmem %s3197_s2, 2048  ;;  %p3199_p9 = scmp.lt.s32.totalorder %s3495_s13, %s3197_s2 }
  0x6a   : > { %p3194_p2 = pnand %p3192_p1, %p3180_p8  ;;  %p3200_p6 = scmp.lt.s32.totalorder %s3198_s25, %s3191_s21 }
  0x6c   : > { %p3195_p5 = pneg %p3194_p2  ;;  %p3201_p12 = por %p3200_p6, %p3199_p9 }
  0x6e   : > { %p3202_p3 = pnand %p3201_p12, %p3195_p5 }
  0x70   : > { %3205 = shalt.err (!%p3202_p3)
}
  0x71   : > { %s3294_s19 = smov 128   ;;  %s3295_s17 = smov 8  }
  0x72   : > { %2895 = dma.hbm_to_vmem [thread:$0]  (!%p3491_p7), %s3489_s9, 1024, %s3495_s13, %s3497_s16, %s3294_s19, %s3294_s19, %s3295_s17  }
  0x73   : > { %p3975_p1 = scmp.ne.s32.totalorder %s3966_s12, 0 }
  0x74   : > { %s3521_s1 = sand.u32 (!%p3975_p1), 1, %s3274_s28   ;;  %p3976_p3 = scmp.ne.s32.totalorder (!%p3975_p1), %s3971_s22, 0 }
  0x75   : > { %338 = sbr.rel (%p3975_p1) target bundleno = 2066 (0x812), region = 52  ;;  %s2505_s2 = sshll.u32 (!%p3975_p1), %s3521_s1, 6 }
  0x76   : > { %s341_s24 = scalar_lea.sflag (!%p3975_p1), [#allocation3], %s3521_s1  ;;  %s3527_s26 = scalar_lea.vmem (!%p3975_p1), [#allocation2], %s2505_s2 }
  0x7a   : > { %3249 = dma.done.wait (%p3976_p3), %s341_s24, 1024  }
  0x7b   : > { %3251 = vsyncadd (%p3976_p3), %s341_s24, 4294966272  ;;  %p3977_p4 = scmp.eq.s32.totalorder %s3368_s11, 0 }
  0x7d   : > { %3253 = dma.done.wait (%p3977_p4), [#allocation6], 8704   ;;  %p3978_p12 = pmov %p3977_p4 }
  0x7e   : > { %p3979_p6 = pmov %p3977_p4 }
  0x7f   : > { %3255 = vsyncadd (%p3978_p12), [#allocation6], 4294958592 }
  0x80   : > { %3257 = dma.done.wait (%p3979_p6), [#allocation9], 2048   ;;  %p3980_p2 = pmov %p3977_p4 }
  0x82   : > { %3259 = vsyncadd (%p3980_p2), [#allocation9], 4294965248  ;;  %p3981_p7 = pmov %p3980_p2 }
  0x83   : > { %p3982_p8 = pmov %p3980_p2 }
  0x84   : > { %3261 = dma.done.wait (%p3981_p7), [#allocation12], 1024  }
  0x85   : > { %3263 = vsyncadd (%p3982_p8), [#allocation12], 4294966272  ;;  %v3296_v0 = vmov 0   ;;  %v466_v1 = vld [vmem:[#allocation7 + $0x1c0] sm:$0xff]  ;;  %v468_v31 = vld [vmem:[#allocation7 + $0x1d0] sm:$0xff]  ;;  %vm1183_vm0 = vcmask 523264  }
  0x86   : > { %826 = vmatprep.mubr.bf16.mxu0 %v3296_v0  ;;  %899 = vmatprep.mubr.bf16.mxu1 %v3296_v0  ;;  %v470_v2 = vld [vmem:[#allocation7 + $0x1e0] sm:$0xff]  ;;  %v472_v32 = vld [vmem:[#allocation7 + $0x1f0] sm:$0xff]  ;;  %v3551_v35 = vld [vmem:[%s3527_s26 + $0x8] sm:$0xff]  ;;  %vm3298_vm1 = vmmov 0   ;;  %s3891_s10 = scalar_lea.vmem [#allocation13], %s2505_s2  ;;  %s2624_s25 = sshll.u32 %s3368_s11, 10 }
  0x87   : > { %v458_v3 = vld [vmem:[#allocation7 + $0x180] sm:$0xff]  ;;  %v2569_v4 = vcombine.high %v466_v1, %v470_v2  ;;  %v2568_v5 = vcombine.low %v466_v1, %v470_v2  ;;  %v2573_v37 = vcombine.high %v468_v31, %v472_v32  ;;  %v460_v38 = vld [vmem:[#allocation7 + $0x190] sm:$0xff]  ;;  %v2572_v41 = vcombine.low %v468_v31, %v472_v32  ;;  %v3563_v46 = vld [vmem:[%s3527_s26 + $0x18] sm:$0xff]  ;;  %s2372_s21 = sshll.u32 %s3891_s10, 4  ;;  %s3906_s2 = scalar_lea.hbm %s3959_s8, %s2624_s25  ;;  %s3900_s21 = int_to_ptr.vmem [resolvable:$true] %s2372_s21 }
  0x88   : > { %v462_v6 = vld [vmem:[#allocation7 + $0x1a0] sm:$0xff]  ;;  %v464_v39 = vld [vmem:[#allocation7 + $0x1b0] sm:$0xff]  ;;  %v3575_v57 = vld [vmem:[%s3527_s26 + $0x28] sm:$0xff]  ;;  %s2359_s24 = scalar_lea.sflag [#allocation4], %s3521_s1  ;;  %p3983_p11 = scmp.ne.s32.totalorder %s3972_s20, 0 }
  0x89   : > { %v2561_v7 = vcombine.high %v458_v3, %v462_v6  ;;  %v450_v8 = vld [vmem:[#allocation7 + $0x140] sm:$0xff]  ;;  %794 = vmatprep.subr.bf16.mxu0 %v2569_v4  ;;  %v2560_v10 = vcombine.low %v458_v3, %v462_v6  ;;  %v2565_v42 = vcombine.high %v460_v38, %v464_v39  ;;  %v452_v43 = vld [vmem:[#allocation7 + $0x150] sm:$0xff]  ;;  %v2564_v47 = vcombine.low %v460_v38, %v464_v39  ;;  %s3299_s11 = smov [#allocation13]  }
  0x8a   : > { %v454_v9 = vld [vmem:[#allocation7 + $0x160] sm:$0xff]  ;;  %795 = vmatpush1.bf16.msra.mxu0 %v2568_v5  ;;  %v456_v44 = vld [vmem:[#allocation7 + $0x170] sm:$0xff]  ;;  %v3587_v5 = vld [vmem:[%s3527_s26 + $0x38] sm:$0xff]  ;;  %s3210_s12 = sshll.u32 %s3299_s11, 4  ;;  %s3211_s12 = int_to_ptr.vmem [resolvable:$false] %s3210_s12 }
  0x8b   : > { %796 = vmatprep.subr.bf16.mxu0 %v2561_v7  ;;  %v2553_v11 = vcombine.high %v450_v8, %v454_v9  ;;  %v442_v12 = vld [vmem:[#allocation7 + $0x100] sm:$0xff]  ;;  %v2552_v14 = vcombine.low %v450_v8, %v454_v9  ;;  %v3560_v45 = vld [vmem:[%s3527_s26 + $0x10] sm:$0xff]  ;;  %v2557_v48 = vcombine.high %v452_v43, %v456_v44  ;;  %v2556_v52 = vcombine.low %v452_v43, %v456_v44  ;;  %s3212_s22 = scalar_lea.vmem %s3211_s12, 2048  ;;  %p3213_p5 = scmp.lt.s32.totalorder %s3900_s21, %s3211_s12 }
  0x8c   : > { %v446_v13 = vld [vmem:[#allocation7 + $0x120] sm:$0xff]  ;;  %v444_v49 = vld [vmem:[#allocation7 + $0x110] sm:$0xff]  ;;  %v3567_v51 = vpack.c.bf16 %v3563_v46, %v3560_v45 }
  0x8d   : > { %v2545_v15 = vcombine.high %v442_v12, %v446_v13  ;;  %v434_v16 = vld [vmem:[#allocation7 + $0xc0] sm:$0xff]  ;;  %v2544_v18 = vcombine.low %v442_v12, %v446_v13  ;;  %v448_v50 = vld [vmem:[#allocation7 + $0x130] sm:$0xff] }
  0x8e   : > { %797 = vmatpush1.bf16.msra.mxu0 %v2560_v10  ;;  %v438_v17 = vld [vmem:[#allocation7 + $0xe0] sm:$0xff]  ;;  %v2549_v53 = vcombine.high %v444_v49, %v448_v50  ;;  %v436_v54 = vld [vmem:[#allocation7 + $0xd0] sm:$0xff]  ;;  %v2548_v58 = vcombine.low %v444_v49, %v448_v50 }
  0x8f   : > { %798 = vmatprep.subr.bf16.mxu0 %v2553_v11  ;;  %v426_v19 = vld [vmem:[#allocation7 + $0x80] sm:$0xff]  ;;  %v2537_v20 = vcombine.high %v434_v16, %v438_v17  ;;  %v2536_v22 = vcombine.low %v434_v16, %v438_v17  ;;  %v440_v55 = vld [vmem:[#allocation7 + $0xf0] sm:$0xff]  ;;  %v459_v16 = vld [vmem:[#allocation7 + $0x188] sm:$0xff] }
  0x90   : > { %v430_v21 = vld [vmem:[#allocation7 + $0xa0] sm:$0xff]  ;;  %v2541_v59 = vcombine.high %v436_v54, %v440_v55  ;;  %v428_v60 = vld [vmem:[#allocation7 + $0x90] sm:$0xff]  ;;  %v2540_v63 = vcombine.low %v436_v54, %v440_v55 }
  0x91   : > { %v418_v23 = vld [vmem:[#allocation7 + $0x40] sm:$0xff]  ;;  %v2529_v25 = vcombine.high %v426_v19, %v430_v21  ;;  %v2528_v26 = vcombine.low %v426_v19, %v430_v21  ;;  %v432_v61 = vld [vmem:[#allocation7 + $0xb0] sm:$0xff]  ;;  %v463_v19 = vld [vmem:[#allocation7 + $0x1a8] sm:$0xff] }
  0x92   : > { %799 = vmatpush1.bf16.msra.mxu0 %v2552_v14  ;;  %v422_v24 = vld [vmem:[#allocation7 + $0x60] sm:$0xff]  ;;  %v2533_v1 = vcombine.high %v428_v60, %v432_v61  ;;  %v420_v2 = vld [vmem:[#allocation7 + $0x50] sm:$0xff]  ;;  %v2532_v6 = vcombine.low %v428_v60, %v432_v61  ;;  %v467_v14 = vld [vmem:[#allocation7 + $0x1c8] sm:$0xff] }
  0x93   : > { %800 = vmatprep.subr.bf16.mxu0 %v2545_v15  ;;  %v410_v27 = vld [vmem:[#allocation7] sm:$0xff]  ;;  %v2521_v29 = vcombine.high %v418_v23, %v422_v24  ;;  %v2520_v30 = vcombine.low %v418_v23, %v422_v24  ;;  %v424_v3 = vld [vmem:[#allocation7 + $0x70] sm:$0xff]  ;;  %v471_v15 = vld [vmem:[#allocation7 + $0x1e8] sm:$0xff]  ;;  %v2562_v23 = vcombine.low %v459_v16, %v463_v19 }
  0x94   : > { %v414_v28 = vld [vmem:[#allocation7 + $0x20] sm:$0xff]  ;;  %v3584_v4 = vld [vmem:[%s3527_s26 + $0x30] sm:$0xff]  ;;  %v2525_v7 = vcombine.high %v420_v2, %v424_v3  ;;  %v2524_v11 = vcombine.low %v420_v2, %v424_v3  ;;  %v2571_v17 = vcombine.high %v467_v14, %v471_v15  ;;  %v451_v21 = vld [vmem:[#allocation7 + $0x148] sm:$0xff] }
  0x95   : > { %v2513_v33 = vcombine.high %v410_v27, %v414_v28  ;;  %v3548_v34 = vld [vmem:[%s3527_s26] sm:$0xff]  ;;  %v2512_v36 = vcombine.low %v410_v27, %v414_v28  ;;  %v412_v8 = vld [vmem:[#allocation7 + $0x10] sm:$0xff]  ;;  %v3591_v10 = vpack.c.bf16 %v3587_v5, %v3584_v4 }
  0x96   : > { %801 = vmatpush1.bf16.msra.mxu0 %v2544_v18  ;;  %v3555_v40 = vpack.c.bf16 %v3551_v35, %v3548_v34  ;;  %v3572_v56 = vld [vmem:[%s3527_s26 + $0x20] sm:$0xff]  ;;  %v416_v9 = vld [vmem:[#allocation7 + $0x30] sm:$0xff]  ;;  %v2570_v18 = vcombine.low %v467_v14, %v471_v15  ;;  %867 = vmatprep.subr.bf16.mxu1 %v2571_v17  ;;  %s3206_s26 = scalar_lea.vmem %s3900_s21, 1024 }
  0x97   : > { %802 = vmatprep.subr.bf16.mxu0 %v2537_v20  ;;  %v3579_v62 = vpack.c.bf16 %v3575_v57, %v3572_v56  ;;  %v2517_v12 = vcombine.high %v412_v8, %v416_v9  ;;  %v2516_v13 = vcombine.low %v412_v8, %v416_v9  ;;  %v2563_v20 = vcombine.high %v459_v16, %v463_v19  ;;  %p3207_p10 = scmp.ne.s32.totalorder %s3900_s21, %s3206_s26  ;;  %p3214_p9 = scmp.lt.s32.totalorder %s3212_s22, %s3206_s26 }
  0x98   : > { %868 = vmatpush1.bf16.msra.mxu1 %v2570_v18 }
  0x99   : > { %869 = vmatprep.subr.bf16.mxu1 %v2563_v20  ;;  %p3208_p0 = pnand %p3207_p10, %p3983_p11  ;;  %p3215_p1 = por %p3214_p9, %p3213_p5 }
  0x9a   : > { %803 = vmatpush1.bf16.msra.mxu0 %v2536_v22  ;;  %v455_v22 = vld [vmem:[#allocation7 + $0x168] sm:$0xff] }
  0x9b   : > { %804 = vmatprep.subr.bf16.mxu0 %v2529_v25  ;;  %v2555_v24 = vcombine.high %v451_v21, %v455_v22  ;;  %v2554_v25 = vcombine.low %v451_v21, %v455_v22  ;;  %v443_v21 = vld [vmem:[#allocation7 + $0x108] sm:$0xff]  ;;  %p3209_p13 = pneg %p3208_p0 }
  0x9c   : > { %870 = vmatpush1.bf16.msra.mxu1 %v2562_v23  ;;  %v447_v22 = vld [vmem:[#allocation7 + $0x128] sm:$0xff] }
  0x9d   : > { %871 = vmatprep.subr.bf16.mxu1 %v2555_v24  ;;  %v2547_v23 = vcombine.high %v443_v21, %v447_v22  ;;  %v2546_v24 = vcombine.low %v443_v21, %v447_v22  ;;  %p3216_p3 = pnand %p3215_p1, %p3209_p13 }
  0x9e   : > { %805 = vmatpush1.bf16.msra.mxu0 %v2528_v26 }
  0x9f   : > { %806 = vmatprep.subr.bf16.mxu0 %v2521_v29 }
  0xa0   : > { %872 = vmatpush1.bf16.msra.mxu1 %v2554_v25  ;;  %v435_v25 = vld [vmem:[#allocation7 + $0xc8] sm:$0xff] }
  0xa1   : > { %873 = vmatprep.subr.bf16.mxu1 %v2547_v23  ;;  %v421_v23 = vld [vmem:[#allocation7 + $0x58] sm:$0xff] }
  0xa2   : > { %807 = vmatpush1.bf16.msra.mxu0 %v2520_v30 }
  0xa3   : > { %808 = vmatprep.subr.bf16.mxu0 %v2513_v33 }
  0xa4   : > { %874 = vmatpush1.bf16.msra.mxu1 %v2546_v24  ;;  %v425_v24 = vld [vmem:[#allocation7 + $0x78] sm:$0xff] }
  0xa6   : > { %809 = vmatpush1.bf16.msra.mxu0 %v2512_v36 }
  0xa7   : > { %940 = vmatprep.subr.bf16.mxu0 %v2573_v37 }
  0xa9   : > { %827 = vmatmul.mubr.bf16.vlgmr.msra.gmra.mxu0 %v3555_v40 }
  0xaa   : > { %836 = vmatprep.mubr.bf16.mxu0 %v3296_v0  ;;  %941 = vmatpush1.bf16.msra.mxu0 %v2572_v41 }
  0xab   : > { %942 = vmatprep.subr.bf16.mxu0 %v2565_v42 }
  0xae   : > { %943 = vmatpush1.bf16.msra.mxu0 %v2564_v47 }
  0xaf   : > { %944 = vmatprep.subr.bf16.mxu0 %v2557_v48 }
  0xb1   : > { %837 = vmatmul.mubr.bf16.gmra.mxu0 %v3567_v51 }
  0xb2   : > { %846 = vmatprep.mubr.bf16.mxu0 %v3296_v0  ;;  %945 = vmatpush1.bf16.msra.mxu0 %v2556_v52 }
  0xb3   : > { %946 = vmatprep.subr.bf16.mxu0 %v2549_v53 }
  0xb6   : > { %947 = vmatpush1.bf16.msra.mxu0 %v2548_v58 }
  0xb7   : > { %948 = vmatprep.subr.bf16.mxu0 %v2541_v59 }
  0xb9   : > { %847 = vmatmul.mubr.bf16.gmra.mxu0 %v3579_v62 }
  0xba   : > { %856 = vmatprep.mubr.bf16.mxu0 %v3296_v0  ;;  %949 = vmatpush1.bf16.msra.mxu0 %v2540_v63 }
  0xbb   : > { %950 = vmatprep.subr.bf16.mxu0 %v2533_v1 }
  0xbe   : > { %951 = vmatpush1.bf16.msra.mxu0 %v2532_v6 }
  0xbf   : > { %952 = vmatprep.subr.bf16.mxu0 %v2525_v7 }
  0xc1   : > { %857 = vmatmul.mubr.bf16.gmra.mxu0 %v3591_v10 }
  0xc2   : > { %953 = vmatpush1.bf16.msra.mxu0 %v2524_v11  ;;  %972 = vmatprep.mubr.bf16.mxu0 %v3296_v0 }
  0xc3   : > { %954 = vmatprep.subr.bf16.mxu0 %v2517_v12 }
  0xc6   : > { %955 = vmatpush1.bf16.msra.mxu0 %v2516_v13 }
  0xc9   : > { %973 = vmatmul.mubr.bf16.vlgmr.msra.gmra.mxu0 %v3555_v40 }
  0xca   : > { %982 = vmatprep.mubr.bf16.mxu0 %v3296_v0 }
  0xd1   : > { %983 = vmatmul.mubr.bf16.gmra.mxu0 %v3567_v51 }
  0xd2   : > { %992 = vmatprep.mubr.bf16.mxu0 %v3296_v0 }
  0xd9   : > { %993 = vmatmul.mubr.bf16.gmra.mxu0 %v3579_v62 }
  0xda   : > { %1002 = vmatprep.mubr.bf16.mxu0 %v3296_v0 }
  0xe1   : > { %1003 = vmatmul.mubr.bf16.gmra.mxu0 %v3591_v10 }
 0x169   : > { %v828_v26 = vpop.f32.mrf.mxu0 }
 0x16b   : > { %v830_v27 = vpop.f32.mrf.mxu0 }
 0x16d   : > { %v832_v28 = vpop.f32.mrf.mxu0 }
 0x16e   : > { %v1110_v29 = vpack.c.bf16 %v832_v28, %v828_v26  ;;  %v439_v26 = vld [vmem:[#allocation7 + $0xe8] sm:$0xff] }
 0x16f   : > { %v834_v30 = vpop.f32.mrf.mxu0  ;;  %v2538_v28 = vcombine.low %v435_v25, %v439_v26 }
 0x170   : > { %2721 = vmatprep.mubr.bf16.mxu0 %v1110_v29  ;;  %v1114_v3 = vpack.c.bf16 %v834_v30, %v830_v27  ;;  %v2539_v27 = vcombine.high %v435_v25, %v439_v26  ;;  %v427_v29 = vld [vmem:[#allocation7 + $0x88] sm:$0xff]  ;;  %v2527_v26 = vcombine.high %v421_v23, %v425_v24 }
 0x171   : > { %v838_v31 = vpop.f32.mrf.mxu0  ;;  %v431_v30 = vld [vmem:[#allocation7 + $0xa8] sm:$0xff] }
 0x172   : > { %875 = vmatprep.subr.bf16.mxu1 %v2539_v27  ;;  %v413_v27 = vld [vmem:[#allocation7 + $0x18] sm:$0xff] }
 0x173   : > { %v840_v32 = vpop.f32.mrf.mxu0  ;;  %876 = vmatpush1.bf16.msra.mxu1 %v2538_v28  ;;  %v417_v28 = vld [vmem:[#allocation7 + $0x38] sm:$0xff] }
 0x175   : > { %v842_v33 = vpop.f32.mrf.mxu0 }
 0x176   : > { %v1111_v15 = vpack.c.bf16 %v842_v33, %v838_v31  ;;  %v2531_v31 = vcombine.high %v427_v29, %v431_v30  ;;  %v419_v33 = vld [vmem:[#allocation7 + $0x48] sm:$0xff] }
 0x177   : > { %v844_v36 = vpop.f32.mrf.mxu0 }
 0x178   : > { %v1115_v59 = vpack.c.bf16 %v844_v36, %v840_v32  ;;  %v2530_v32 = vcombine.low %v427_v29, %v431_v30  ;;  %877 = vmatprep.subr.bf16.mxu1 %v2531_v31  ;;  %v423_v36 = vld [vmem:[#allocation7 + $0x68] sm:$0xff]  ;;  %v2526_v29 = vcombine.low %v421_v23, %v425_v24  ;;  %v2519_v30 = vcombine.high %v413_v27, %v417_v28 }
 0x179   : > { %v848_v37 = vpop.f32.mrf.mxu0  ;;  %v2518_v31 = vcombine.low %v413_v27, %v417_v28 }
 0x17a   : > { %878 = vmatpush1.bf16.msra.mxu1 %v2530_v32 }
 0x17b   : > { %v850_v38 = vpop.f32.mrf.mxu0 }
 0x17d   : > { %v852_v39 = vpop.f32.mrf.mxu0 }
 0x17e   : > { %v1112_v17 = vpack.c.bf16 %v852_v39, %v848_v37  ;;  %v2523_v37 = vcombine.high %v419_v33, %v423_v36  ;;  %v411_v39 = vld [vmem:[#allocation7 + $0x8] sm:$0xff] }
 0x17f   : > { %v854_v41 = vpop.f32.mrf.mxu0 }
 0x180   : > { %v1116_v50 = vpack.c.bf16 %v854_v41, %v850_v38  ;;  %v2522_v38 = vcombine.low %v419_v33, %v423_v36  ;;  %879 = vmatprep.subr.bf16.mxu1 %v2523_v37  ;;  %v415_v41 = vld [vmem:[#allocation7 + $0x28] sm:$0xff] }
 0x181   : > { %v858_v42 = vpop.f32.mrf.mxu0 }
 0x182   : > { %880 = vmatpush1.bf16.msra.mxu1 %v2522_v38 }
 0x183   : > { %v860_v43 = vpop.f32.mrf.mxu0 }
 0x185   : > { %v862_v44 = vpop.f32.mrf.mxu0 }
 0x186   : > { %v1113_v19 = vpack.c.bf16 %v862_v44, %v858_v42  ;;  %v2515_v42 = vcombine.high %v411_v39, %v415_v41  ;;  %v469_v44 = vld [vmem:[#allocation7 + $0x1d8] sm:$0xff] }
 0x187   : > { %v864_v47 = vpop.f32.mrf.mxu0 }
 0x188   : > { %v1117_v48 = vpack.c.bf16 %v864_v47, %v860_v43  ;;  %v2514_v43 = vcombine.low %v411_v39, %v415_v41  ;;  %881 = vmatprep.subr.bf16.mxu1 %v2515_v42  ;;  %v473_v47 = vld [vmem:[#allocation7 + $0x1f8] sm:$0xff] }
 0x189   : > { %v974_v49 = vpop.f32.mrf.mxu0 }
 0x18a   : > { %2713 = vmatprep.subr.bf16.mxu0 %v1117_v48  ;;  %882 = vmatpush1.bf16.msra.mxu1 %v2514_v43 }
 0x18b   : > { %2714 = vmatpush3.bf16.xpose.msra.mxu0 %v1117_v48  ;;  %v3602_v52 = vpop.f32.mrf.mxu0  ;;  %v461_v48 = vld [vmem:[#allocation7 + $0x198] sm:$0xff] }
 0x18c   : > { %2715 = vmatprep.subr.bf16.mxu0 %v1116_v50 }
 0x18d   : > { %v978_v53 = vpop.f32.mrf.mxu0  ;;  %900 = vmatmul.mubr.bf16.vlgmr.msra.gmra.mxu1 %v3555_v40 }
 0x18e   : > { %v1088_v20 = vpack.c.bf16 %v978_v53, %v974_v49  ;;  %v2574_v49 = vcombine.low %v469_v44, %v473_v47  ;;  %v465_v53 = vld [vmem:[#allocation7 + $0x1b8] sm:$0xff]  ;;  %909 = vmatprep.mubr.bf16.mxu1 %v3296_v0 }
 0x18f   : > { %v3604_v54 = vpop.f32.mrf.mxu0 }
 0x190   : > { %v1098_v55 = vpack.c.bf16 %v3604_v54, %v3602_v52 }
 0x191   : > { %v984_v58 = vpop.f32.mrf.mxu0 }
 0x193   : > { %2716 = vmatpush3.bf16.xpose.msra.mxu0 %v1116_v50  ;;  %v3608_v60 = vpop.f32.mrf.mxu0  ;;  %v2575_v50 = vcombine.high %v469_v44, %v473_v47 }
 0x194   : > { %2717 = vmatprep.subr.bf16.mxu0 %v1115_v59 }
 0x195   : > { %v988_v61 = vpop.f32.mrf.mxu0  ;;  %1013 = vmatprep.subr.bf16.mxu1 %v2575_v50  ;;  %910 = vmatmul.mubr.bf16.gmra.mxu1 %v3567_v51 }
 0x196   : > { %v1091_v18 = vpack.c.bf16 %v988_v61, %v984_v58  ;;  %v2567_v58 = vcombine.high %v461_v48, %v465_v53  ;;  %v457_v61 = vld [vmem:[#allocation7 + $0x178] sm:$0xff]  ;;  %1014 = vmatpush1.bf16.msra.mxu1 %v2574_v49  ;;  %919 = vmatprep.mubr.bf16.mxu1 %v3296_v0 }
 0x197   : > { %v3610_v63 = vpop.f32.mrf.mxu0 }
 0x198   : > { %v1101_v1 = vpack.c.bf16 %v3610_v63, %v3608_v60  ;;  %1015 = vmatprep.subr.bf16.mxu1 %v2567_v58 }
 0x199   : > { %v994_v2 = vpop.f32.mrf.mxu0 }
 0x19b   : > { %2718 = vmatpush3.bf16.xpose.msra.mxu0 %v1115_v59  ;;  %v3614_v6 = vpop.f32.mrf.mxu0  ;;  %v453_v59 = vld [vmem:[#allocation7 + $0x158] sm:$0xff] }
 0x19c   : > { %2719 = vmatprep.subr.bf16.mxu0 %v1114_v3 }
 0x19d   : > { %v998_v7 = vpop.f32.mrf.mxu0  ;;  %920 = vmatmul.mubr.bf16.gmra.mxu1 %v3579_v62 }
 0x19e   : > { %v1094_v16 = vpack.c.bf16 %v998_v7, %v994_v2  ;;  %v2566_v2 = vcombine.low %v461_v48, %v465_v53  ;;  %v445_v7 = vld [vmem:[#allocation7 + $0x118] sm:$0xff]  ;;  %929 = vmatprep.mubr.bf16.mxu1 %v3296_v0 }
 0x19f   : > { %v3616_v8 = vpop.f32.mrf.mxu0 }
 0x1a0   : > { %v1104_v9 = vpack.c.bf16 %v3616_v8, %v3614_v6  ;;  %1016 = vmatpush1.bf16.msra.mxu1 %v2566_v2 }
 0x1a1   : > { %v1004_v11 = vpop.f32.mrf.mxu0 }
 0x1a3   : > { %2720 = vmatpush3.bf16.xpose.msra.mxu0 %v1114_v3  ;;  %v3620_v12 = vpop.f32.mrf.mxu0  ;;  %v2559_v3 = vcombine.high %v453_v59, %v457_v61 }
 0x1a5   : > { %v1008_v13 = vpop.f32.mrf.mxu0  ;;  %1017 = vmatprep.subr.bf16.mxu1 %v2559_v3  ;;  %930 = vmatmul.mubr.bf16.gmra.mxu1 %v3591_v10 }
 0x1a6   : > { %v1097_v14 = vpack.c.bf16 %v1008_v13, %v1004_v11  ;;  %v449_v11 = vld [vmem:[#allocation7 + $0x138] sm:$0xff]  ;;  %v2558_v13 = vcombine.low %v453_v59, %v457_v61  ;;  %1045 = vmatprep.mubr.bf16.mxu1 %v3296_v0 }
 0x1a7   : > { %v3638_v32 = vpop.f32.mrf.mxu0 }
 0x1a8   : > { %2729 = vmatprep.subr.bf16.mxu0 %v1097_v14  ;;  %1018 = vmatpush1.bf16.msra.mxu1 %v2558_v13 }
 0x1aa   : > { %2722 = vmatmul.mubr.bf16.vlgmr.msra.gmra.mxu0 %v1111_v15  ;;  %v437_v15 = vld [vmem:[#allocation7 + $0xd8] sm:$0xff] }
 0x1ab   : > { %2725 = vmatprep.mubr.bf16.mxu0 %v1112_v17  ;;  %2730 = vmatpush3.bf16.msra.mxu0 %v1097_v14  ;;  %v2551_v14 = vcombine.high %v445_v7, %v449_v11  ;;  %v2550_v17 = vcombine.low %v445_v7, %v449_v11 }
 0x1ac   : > { %2731 = vmatprep.subr.bf16.mxu0 %v1094_v16 }
 0x1ad   : > { %1019 = vmatprep.subr.bf16.mxu1 %v2551_v14 }
 0x1ae   : > { %1020 = vmatpush1.bf16.msra.mxu1 %v2550_v17 }
 0x1af   : > { %2732 = vmatpush3.bf16.msra.mxu0 %v1094_v16  ;;  %v441_v16 = vld [vmem:[#allocation7 + $0xf8] sm:$0xff] }
 0x1b0   : > { %2733 = vmatprep.subr.bf16.mxu0 %v1091_v18  ;;  %v2542_v21 = vcombine.low %v437_v15, %v441_v16 }
 0x1b2   : > { %2726 = vmatmul.mubr.bf16.gmra.mxu0 %v1113_v19  ;;  %v429_v19 = vld [vmem:[#allocation7 + $0x98] sm:$0xff] }
 0x1b3   : > { %2734 = vmatpush3.bf16.msra.mxu0 %v1091_v18  ;;  %v2543_v18 = vcombine.high %v437_v15, %v441_v16 }
 0x1b4   : > { %2735 = vmatprep.subr.bf16.mxu0 %v1088_v20 }
 0x1b5   : > { %1021 = vmatprep.subr.bf16.mxu1 %v2543_v18 }
 0x1b6   : > { %1022 = vmatpush1.bf16.msra.mxu1 %v2542_v21 }
 0x1b7   : > { %2736 = vmatpush3.bf16.msra.mxu0 %v1088_v20  ;;  %v433_v20 = vld [vmem:[#allocation7 + $0xb8] sm:$0xff] }
 0x1b8   : > { %v2535_v22 = vcombine.high %v429_v19, %v433_v20  ;;  %v2534_v25 = vcombine.low %v429_v19, %v433_v20 }
 0x1ba   : > { %1023 = vmatprep.subr.bf16.mxu1 %v2535_v22 }
 0x1bb   : > { %1024 = vmatpush1.bf16.msra.mxu1 %v2534_v25 }
 0x1bc   : > { %1025 = vmatprep.subr.bf16.mxu1 %v2527_v26 }
 0x1bf   : > { %1026 = vmatpush1.bf16.msra.mxu1 %v2526_v29 }
 0x1c0   : > { %1027 = vmatprep.subr.bf16.mxu1 %v2519_v30 }
 0x1c3   : > { %1028 = vmatpush1.bf16.msra.mxu1 %v2518_v31 }
 0x1c6   : > { %1046 = vmatmul.mubr.bf16.vlgmr.msra.gmra.mxu1 %v3555_v40 }
 0x1c7   : > { %1055 = vmatprep.mubr.bf16.mxu1 %v3296_v0 }
 0x1ce   : > { %1056 = vmatmul.mubr.bf16.gmra.mxu1 %v3567_v51 }
 0x1cf   : > { %1065 = vmatprep.mubr.bf16.mxu1 %v3296_v0 }
 0x1d6   : > { %1066 = vmatmul.mubr.bf16.gmra.mxu1 %v3579_v62 }
 0x1d7   : > { %1075 = vmatprep.mubr.bf16.mxu1 %v3296_v0 }
 0x1de   : > { %1076 = vmatmul.mubr.bf16.gmra.mxu1 %v3591_v10 }
 0x1df   : > { %1320 = vmatprep.mubr.bf16.mxu1 %v3296_v0 }
 0x24d   : > { %v901_v61 = vpop.f32.mrf.mxu1 }
 0x24f   : > { %v903_v2 = vpop.f32.mrf.mxu1 }
 0x251   : > { %v905_v3 = vpop.f32.mrf.mxu1 }
 0x253   : > { %v907_v7 = vpop.f32.mrf.mxu1 }
 0x255   : > { %v911_v11 = vpop.f32.mrf.mxu1 }
 0x257   : > { %v913_v13 = vpop.f32.mrf.mxu1 }
 0x259   : > { %v915_v14 = vpop.f32.mrf.mxu1 }
 0x25b   : > { %v917_v15 = vpop.f32.mrf.mxu1 }
 0x25c   : > { %v1090_v30 = vpack.c.bf16 %v917_v15, %v913_v13 }
 0x25d   : > { %v921_v16 = vpop.f32.mrf.mxu1 }
 0x25f   : > { %v923_v17 = vpop.f32.mrf.mxu1 }
 0x261   : > { %v925_v18 = vpop.f32.mrf.mxu1 }
 0x262   : > { %v1092_v28 = vpack.c.bf16 %v925_v18, %v921_v16 }
 0x263   : > { %v927_v19 = vpop.f32.mrf.mxu1 }
 0x264   : > { %v1093_v25 = vpack.c.bf16 %v927_v19, %v923_v17 }
 0x265   : > { %v931_v20 = vpop.f32.mrf.mxu1 }
 0x267   : > { %v933_v21 = vpop.f32.mrf.mxu1 }
 0x269   : > { %v935_v22 = vpop.f32.mrf.mxu1 }
 0x26a   : > { %v3640_v33 = vpop.f32.mrf.mxu0  ;;  %v1095_v23 = vpack.c.bf16 %v935_v22, %v931_v20 }
 0x26b   : > { %v1190_v36 = vsel %vm1183_vm0, %v3640_v33, -inf  ;;  %v937_v24 = vpop.f32.mrf.mxu1 }
 0x26c   : > { %1191 = vmax.xlane.f32.xlu1 %v1190_v36  ;;  %v3644_v37 = vpop.f32.mrf.mxu0  ;;  %v1096_v26 = vpack.c.bf16 %v937_v24, %v933_v21 }
 0x26d   : > { %v1184_v38 = vsel %vm1183_vm0, %v3644_v37, -inf }
 0x26e   : > { %1185 = vmax.xlane.f32.xlu0 %v1184_v38  ;;  %v3648_v39 = vpop.f32.mrf.mxu0  ;;  %1296 = vmatprep.subr.bf16.mxu1 %v1096_v26  ;;  %v1089_v38 = vpack.c.bf16 %v915_v14, %v911_v11 }
 0x26f   : > { %v1193_v41 = vsel %vm1183_vm0, %v3648_v39, -inf  ;;  %1297 = vmatpush1.bf16.msra.mxu1 %v1095_v23 }
 0x270   : > { %1194 = vmax.xlane.f32.xlu1 %v1193_v41  ;;  %v3652_v42 = vpop.f32.mrf.mxu0  ;;  %1298 = vmatprep.subr.bf16.mxu1 %v1093_v25  ;;  %v1087_v41 = vpack.c.bf16 %v907_v7, %v903_v2 }
 0x271   : > { %v1187_v43 = vsel %vm1183_vm0, %v3652_v42, -inf }
 0x272   : > { %1188 = vmax.xlane.f32.xlu0 %v1187_v43  ;;  %v3656_v44 = vpop.f32.mrf.mxu0  ;;  %v1086_v43 = vpack.c.bf16 %v905_v3, %v901_v61 }
 0x273   : > { %v1202_v53 = vsel %vm1183_vm0, %v3656_v44, -inf  ;;  %1299 = vmatpush1.bf16.msra.mxu1 %v1092_v28 }
 0x274   : > { %v3658_v47 = vpop.f32.mrf.mxu0  ;;  %1300 = vmatprep.subr.bf16.mxu1 %v1090_v30 }
 0x275   : > { %v1196_v48 = vsel %vm1183_vm0, %v3658_v47, -inf }
 0x276   : > { %1197 = vmax.xlane.f32.xlu0 %v1196_v48  ;;  %v3662_v49 = vpop.f32.mrf.mxu0 }
 0x277   : > { %v1205_v59 = vsel %vm1183_vm0, %v3662_v49, -inf  ;;  %1301 = vmatpush1.bf16.msra.mxu1 %v1089_v38 }
 0x278   : > { %v3664_v50 = vpop.f32.mrf.mxu0  ;;  %1302 = vmatprep.subr.bf16.mxu1 %v1087_v41 }
 0x279   : > { %v1199_v58 = vsel %vm1183_vm0, %v3664_v50, -inf }
 0x27a   : > { %1203 = vmax.xlane.f32.xlu0 %v1202_v53  ;;  %1200 = vmax.xlane.f32.xlu1 %v1199_v58 }
 0x27b   : > { %1303 = vmatpush1.bf16.msra.mxu1 %v1086_v43 }
 0x27e   : > { %1206 = vmax.xlane.f32.xlu1 %v1205_v59 }
 0x286   : > { %v3672_v27 = vpop.f32.mrf.mxu1 }
 0x288   : > { %v3674_v29 = vpop.f32.mrf.mxu1 }
 0x28a   : > { %v3676_v31 = vpop.f32.mrf.mxu1 }
 0x28b   : > { %v1099_v36 = vpack.c.bf16 %v3676_v31, %v3672_v27 }
 0x2f5   : > { %v1192_v48 = vpop.xlane.xlu1 %1191 }
 0x2f6   : > { %v1210_v53 = vsub.f32 %v3640_v33, %v1192_v48 }
 0x2f7   : > { %v1186_v58 = vpop.xlane.xlu0 %1185 }
 0x2f8   : > { %v1208_v59 = vsub.f32 %v3644_v37, %v1186_v58  ;;  %v1220_v15 = vmul.f32 1.442695, %v1210_v53  ;;  %v1053_v53 = vpop.f32.mrf.mxu1 }
 0x2f9   : > { %v1195_v13 = vpop.xlane.xlu1 %1194 }
 0x2fa   : > { %v1216_v16 = vmul.f32 1.442695, %v1208_v59  ;;  %v1211_v17 = vsub.f32 %v3648_v39, %v1195_v13  ;;  %v3716_v59 = vpop.f32.mrf.mxu1 }
 0x2fb   : > { %v1189_v18 = vpop.xlane.xlu0 %1188 }
 0x2fc   : > { %2984 = vpow2.f32 %v1216_v16  ;;  %v1209_v2 = vsub.f32 %v3652_v42, %v1189_v18  ;;  %v1222_v61 = vmul.f32 1.442695, %v1211_v17  ;;  %v1059_v16 = vpop.f32.mrf.mxu1 }
 0x2fd   : > { %2986 = vpow2.f32 %v1220_v15 }
 0x2fe   : > { %v1218_v3 = vmul.f32 1.442695, %v1209_v2  ;;  %v3722_v17 = vpop.f32.mrf.mxu1 }
 0x2ff   : > { %v1198_v7 = vpop.xlane.xlu0 %1197 }
 0x300   : > { %2988 = vpow2.f32 %v1218_v3  ;;  %v1212_v11 = vsub.f32 %v3658_v47, %v1198_v7  ;;  %v1063_v18 = vpop.f32.mrf.mxu1  ;;  %v3727_v3 = vpack.c.bf16 %v1053_v53, %v3674_v29 }
 0x301   : > { %2990 = vpow2.f32 %v1222_v61 }
 0x302   : > { %v1224_v33 = vmul.f32 1.442695, %v1212_v11  ;;  %v3724_v2 = vpop.f32.mrf.mxu1 }
 0x303   : > { %v1204_v14 = vpop.xlane.xlu0 %1203  ;;  %v1201_v37 = vpop.xlane.xlu1 %1200 }
 0x304   : > { %2992 = vpow2.f32 %v1224_v33  ;;  %v1214_v19 = vsub.f32 %v3656_v44, %v1204_v14  ;;  %v1213_v39 = vsub.f32 %v3664_v50, %v1201_v37  ;;  %v1069_v61 = vpop.f32.mrf.mxu1  ;;  %v1102_v14 = vpack.c.bf16 %v3722_v17, %v3716_v59 }
 0x306   : > { %v1228_v20 = vmul.f32 1.442695, %v1214_v19  ;;  %v1226_v21 = vmul.f32 1.442695, %v1213_v39  ;;  %v3729_v7 = vpop.f32.mrf.mxu1  ;;  %v3297_v39 = vmov 0.0  }
 0x307   : > { %v1207_v22 = vpop.xlane.xlu1 %1206  ;;  %2745 = vmatprep.subr.mxu1 %v3297_v39  ;;  %v1105_v29 = vpack.c.bf16 %v3729_v7, %v3724_v2 }
 0x308   : > { %2994 = vpow2.f32 %v1228_v20  ;;  %v1215_v42 = vsub.f32 %v3662_v49, %v1207_v22  ;;  %v1073_v11 = vpop.f32.mrf.mxu1 }
 0x309   : > { %v3688_v23 = vpop.eup %2984  ;;  %2996 = vpow2.f32 %v1226_v21  ;;  %v3736_v21 = vpack.c.bf16 %v1063_v18, %v1059_v16  ;;  %v3740_v22 = vpack.c.bf16 %v1073_v11, %v1069_v61 }
 0x30a   : > { %v1230_v24 = vmul.f32 1.442695, %v1215_v42  ;;  %v1232_v47 = vsel %vm1183_vm0, %v3688_v23, 0.0  ;;  %v3692_v25 = vpop.eup %2986  ;;  %v1077_v33 = vpop.f32.mrf.mxu1  ;;  %v2584_v42 = vld [vmem:[%s3954_s3 + $0x1] ss:$0 sm:$0xff] }
 0x30b   : > { %1233 = vadd.xlane.f32.xlu0 %v1232_v47  ;;  %v1238_v50 = vsel %vm1183_vm0, %v3692_v25, 0.0  ;;  %v1543_v47 = vmul.f32 %v2584_v42, %v3551_v35  ;;  %v1549_v53 = vmul.f32 %v2584_v42, %v3587_v5 }
 0x30c   : > { %2998 = vpow2.f32 %v1230_v24  ;;  %v3733_v37 = vpop.f32.mrf.mxu1  ;;  %v1542_v24 = vmul.f32 %v2584_v42, %v3548_v34 }
 0x30d   : > { %v3694_v44 = vpop.eup %2988 }
 0x30e   : > { %v1235_v26 = vsel %vm1183_vm0, %v3694_v44, 0.0  ;;  %v3700_v49 = vpop.eup %2990  ;;  %v1081_v19 = vpop.f32.mrf.mxu1 }
 0x30f   : > { %1239 = vadd.xlane.f32.xlu0 %v1238_v50  ;;  %1236 = vadd.xlane.f32.xlu1 %v1235_v26  ;;  %v1241_v38 = vsel %vm1183_vm0, %v3700_v49, 0.0  ;;  %v1108_v20 = vpack.c.bf16 %v1081_v19, %v1077_v33  ;;  %v1544_v50 = vmul.f32 %v2584_v42, %v3560_v45  ;;  %v1545_v26 = vmul.f32 %v2584_v42, %v3563_v46 }
 0x311   : > { %v3702_v28 = vpop.eup %2992  ;;  %1762 = vmatprep.subr.bf16.mxu0 %v1108_v20 }
 0x312   : > { %v1244_v30 = vsel %vm1183_vm0, %v3702_v28, 0.0 }
 0x313   : > { %1245 = vadd.xlane.f32.xlu0 %v1244_v30  ;;  %1242 = vadd.xlane.f32.xlu1 %v1241_v38  ;;  %v1546_v30 = vmul.f32 %v2584_v42, %v3572_v56  ;;  %v1547_v38 = vmul.f32 %v2584_v42, %v3575_v57 }
 0x315   : > { %v3708_v41 = vpop.eup %2994 }
 0x316   : > { %v3710_v43 = vpop.eup %2996  ;;  %v1250_v48 = vsel %vm1183_vm0, %v3708_v41, 0.0 }
 0x317   : > { %1251 = vadd.xlane.f32.xlu0 %v1250_v48  ;;  %v1247_v58 = vsel %vm1183_vm0, %v3710_v43, 0.0  ;;  %v1548_v48 = vmul.f32 %v2584_v42, %v3584_v4 }
 0x318   : > { %1248 = vadd.xlane.f32.xlu1 %v1247_v58 }
 0x319   : > { %v3718_v13 = vpop.eup %2998 }
 0x31a   : > { %v1253_v15 = vsel %vm1183_vm0, %v3718_v13, 0.0 }
 0x31b   : > { %1550 = vadd.xlane.f32.xlu0 %v1542_v24 }
 0x31c   : > { %1254 = vadd.xlane.f32.xlu1 %v1253_v15 }
 0x31f   : > { %1554 = vadd.xlane.f32.xlu0 %v1544_v50 }
 0x320   : > { %1552 = vadd.xlane.f32.xlu1 %v1543_v47 }
 0x323   : > { %1558 = vadd.xlane.f32.xlu0 %v1546_v30 }
 0x324   : > { %1556 = vadd.xlane.f32.xlu1 %v1545_v26 }
 0x327   : > { %1562 = vadd.xlane.f32.xlu0 %v1548_v48 }
 0x328   : > { %1560 = vadd.xlane.f32.xlu1 %v1547_v38 }
 0x32c   : > { %1564 = vadd.xlane.f32.xlu1 %v1549_v53 }
 0x394   : > { %v1234_v58 = vpop.xlane.xlu0 %1233 }
 0x395   : > { %3000 = vrcp.f32 %v1234_v58 }
 0x398   : > { %v1240_v15 = vpop.xlane.xlu0 %1239  ;;  %v1237_v16 = vpop.xlane.xlu1 %1236 }
 0x399   : > { %3002 = vrcp.f32 %v1237_v16 }
 0x39a   : > { %3004 = vrcp.f32 %v1240_v15 }
 0x39c   : > { %v1246_v18 = vpop.xlane.xlu0 %1245  ;;  %v1243_v2 = vpop.xlane.xlu1 %1242 }
 0x39d   : > { %3006 = vrcp.f32 %v1243_v2 }
 0x39e   : > { %3008 = vrcp.f32 %v1246_v18 }
 0x3a0   : > { %v1252_v61 = vpop.xlane.xlu0 %1251 }
 0x3a1   : > { %v1249_v7 = vpop.xlane.xlu1 %1248 }
 0x3a2   : > { %3010 = vrcp.f32 %v1249_v7  ;;  %v3001_v11 = vpop.eup %3000 }
 0x3a3   : > { %3012 = vrcp.f32 %v1252_v61  ;;  %v1264_v20 = vmul.f32 %v3001_v11, %v3688_v23 }
 0x3a4   : > { %v1551_v11 = vpop.xlane.xlu0 %1550 }
 0x3a5   : > { %v1255_v33 = vpop.xlane.xlu1 %1254 }
 0x3a6   : > { %3014 = vrcp.f32 %v1255_v33  ;;  %v3003_v19 = vpop.eup %3002 }
 0x3a7   : > { %v1265_v42 = vmul.f32 %v3003_v19, %v3694_v44  ;;  %v3005_v24 = vpop.eup %3004  ;;  %v1107_v44 = vpack.c.bf16 %v3638_v32, %v3620_v12 }
 0x3a8   : > { %v1266_v26 = vmul.f32 %v3005_v24, %v3692_v25 }
 0x3a9   : > { %v1272_v47 = vpack.c.bf16 %v1265_v42, %v1264_v20  ;;  %v1553_v33 = vpop.xlane.xlu1 %1552 }
 0x3aa   : > { %v3007_v50 = vpop.eup %3006 }
 0x3ab   : > { %v1267_v30 = vmul.f32 %v3007_v50, %v3700_v49  ;;  %2576 = vmatmul.mubr.msk.bf16.vlgmr.msra.gmra.mxu1 %vm1183_vm0, %v1272_v47  ;;  %2737 = vmatprep.mubr.msk.bf16.mxu0 %vm1183_vm0, %v1272_v47  ;;  %v3009_v38 = vpop.eup %3008 }
 0x3ac   : > { %2746 = vmatpush3.xpose.msra.mxu1 %v3587_v5  ;;  %1330 = vmatprep.mubr.bf16.mxu1 %v3296_v0  ;;  %v1268_v25 = vmul.f32 %v3009_v38, %v3702_v28 }
 0x3ad   : > { %v1273_v48 = vpack.c.bf16 %v1267_v30, %v1266_v26  ;;  %2747 = vmatprep.subr.mxu1 %v3297_v39 }
 0x3af   : > { %v3011_v23 = vpop.eup %3010  ;;  %2738 = vmatmul.mubr.msk.bf16.vlgmr.msra.gmra.mxu0 %vm1183_vm0, %v1273_v48 }
 0x3b0   : > { %v1269_v49 = vmul.f32 %v3011_v23, %v3710_v43  ;;  %v3013_v53 = vpop.eup %3012  ;;  %1763 = vmatpush1.bf16.msra.mxu0 %v1107_v44  ;;  %2748 = vmatpush3.xpose.msra.mxu1 %v3584_v4 }
 0x3b1   : > { %1764 = vmatprep.subr.bf16.mxu0 %v1105_v29  ;;  %2749 = vmatprep.subr.mxu1 %v3297_v39  ;;  %v1270_v12 = vmul.f32 %v3013_v53, %v3708_v41  ;;  %v1555_v53 = vpop.xlane.xlu0 %1554 }
 0x3b2   : > { %v1274_v5 = vpack.c.bf16 %v1269_v49, %v1268_v25 }
 0x3b3   : > { %v3015_v58 = vpop.eup %3014  ;;  %2577 = vmatmul.mubr.msk.bf16.gmra.mxu1 %vm1183_vm0, %v1273_v48  ;;  %v1566_v48 = vlaneseq }
 0x3b4   : > { %2741 = vmatprep.mubr.msk.bf16.mxu0 %vm1183_vm0, %v1274_v5  ;;  %v1271_v32 = vmul.f32 %v3015_v58, %v3718_v13  ;;  %1765 = vmatpush1.bf16.msra.mxu0 %v1104_v9  ;;  %v1557_v58 = vpop.xlane.xlu1 %1556 }
 0x3b5   : > { %2750 = vmatpush3.xpose.msra.mxu1 %v3575_v57  ;;  %1766 = vmatprep.subr.bf16.mxu0 %v1102_v14 }
 0x3b6   : > { %v1275_v4 = vpack.c.bf16 %v1271_v32, %v1270_v12  ;;  %2751 = vmatprep.subr.mxu1 %v3297_v39  ;;  %1340 = vmatprep.mubr.bf16.mxu1 %v3296_v0 }
 0x3b8   : > { %2742 = vmatmul.mubr.msk.bf16.gmra.mxu0 %vm1183_vm0, %v1275_v4 }
 0x3b9   : > { %1767 = vmatpush1.bf16.msra.mxu0 %v1101_v1  ;;  %2752 = vmatpush3.xpose.msra.mxu1 %v3572_v56  ;;  %v1083_v56 = vpop.f32.mrf.mxu1 }
 0x3ba   : > { %1768 = vmatprep.subr.bf16.mxu0 %v1099_v36  ;;  %2753 = vmatprep.subr.mxu1 %v3297_v39 }
 0x3bb   : > { %1786 = vmatprep.mubr.bf16.mxu0 %v3296_v0  ;;  %2578 = vmatmul.mubr.msk.bf16.gmra.mxu1 %vm1183_vm0, %v1274_v5 }
 0x3bc   : > { %1350 = vmatprep.mubr.bf16.mxu1 %v3296_v0 }
 0x3bd   : > { %1769 = vmatpush1.bf16.msra.mxu0 %v1098_v55  ;;  %2754 = vmatpush3.xpose.msra.mxu1 %v3563_v46  ;;  %v1109_v46 = vpack.c.bf16 %v1083_v56, %v3733_v37  ;;  %v1567_v56 = vshrl.u32 %v1566_v48, 7 }
 0x3be   : > { %2755 = vmatprep.subr.mxu1 %v3297_v39 }
 0x3c1   : > { %2756 = vmatpush3.xpose.msra.mxu1 %v3560_v45  ;;  %v1466_v45 = vld [vmem:[%s3954_s3] sm:$0x1] }
 0x3c2   : > { %2757 = vmatprep.subr.mxu1 %v3297_v39 }
 0x3c3   : > { %2579 = vmatmul.mubr.msk.bf16.gmra.mxu1 %vm1183_vm0, %v1275_v4 }
 0x3c4   : > { %2761 = vmatprep.mubr.msk.f32.mxu1 %vm3298_vm1, %v3297_v39 }
 0x3c5   : > { %2758 = vmatpush3.xpose.msra.mxu1 %v3551_v35 }
 0x3c6   : > { %2759 = vmatprep.subr.mxu1 %v3297_v39 }
 0x3c9   : > { %2760 = vmatpush3.xpose.msra.mxu1 %v3548_v34 }
 0x3ca   : > { %2764 = vmatprep.subr.bf16.mxu1 %v1109_v46 }
 0x3cc   : > { %2762 = vmatmul.mubr.f32.vlgmr.msra.gmra.mxu1 %v1466_v45 }
 0x3cd   : > { %2765 = vmatpush3.bf16.msra.mxu1 %v1109_v46 }
 0x3ce   : > { %2766 = vmatprep.subr.bf16.mxu1 %v3740_v22 }
 0x3d1   : > { %2767 = vmatpush3.bf16.msra.mxu1 %v3740_v22 }
 0x3d2   : > { %2768 = vmatprep.subr.bf16.mxu1 %v3736_v21 }
 0x3d5   : > { %2769 = vmatpush3.bf16.msra.mxu1 %v3736_v21 }
 0x3d6   : > { %2770 = vmatprep.subr.bf16.mxu1 %v3727_v3 }
 0x3d9   : > { %2771 = vmatpush3.bf16.msra.mxu1 %v3727_v3 }
 0x46b   : > { %v1322_v34 = vpop.f32.mrf.mxu1 }
 0x46c   : > { %v1426_v57 = vmax.f32 %v1322_v34, 0.0 }
 0x46d   : > { %v1324_v35 = vpop.f32.mrf.mxu1 }
 0x46e   : > { %v1427_v52 = vmax.f32 %v1324_v35, 0.0 }
 0x46f   : > { %v1326_v54 = vpop.f32.mrf.mxu1  ;;  %v2739_v55 = vpop.f32.mrf.mxu0 }
 0x470   : > { %v1450_v60 = vadd.f32 %v1427_v52, %v1426_v57  ;;  %v1429_v6 = vmax.f32 %v1326_v54, 0.0  ;;  %v1434_v2 = vmax.f32 %v2739_v55, 0.0  ;;  %v1559_v55 = vpop.xlane.xlu0 %1558 }
 0x471   : > { %v1328_v63 = vpop.f32.mrf.mxu1  ;;  %v1395_v1 = vpop.f32.mrf.mxu0 }
 0x472   : > { %v1430_v8 = vmax.f32 %v1328_v63, 0.0  ;;  %v1428_v36 = vmax.f32 %v1395_v1, 0.0  ;;  %v2643_v63 = vld [vmem:[#allocation5 + $0x18] sm:$0xff]  }
 0x473   : > { %v1332_v9 = vpop.f32.mrf.mxu1  ;;  %v2740_v27 = vpop.f32.mrf.mxu0 }
 0x474   : > { %v1451_v31 = vadd.f32 %v1430_v8, %v1429_v6  ;;  %v1432_v43 = vmax.f32 %v1332_v9, 0.0  ;;  %v3818_v14 = vadd.f32 %v1450_v60, %v1428_v36  ;;  %v1437_v61 = vmax.f32 %v2740_v27, 0.0  ;;  %v1561_v8 = vpop.xlane.xlu1 %1560  ;;  %v2626_v9 = vld [vmem:[#allocation5] sm:$0xff]   ;;  %v2641_v36 = vld [vmem:[#allocation5 + $0x8] sm:$0xff]  }
 0x475   : > { %v1334_v28 = vpop.f32.mrf.mxu1  ;;  %v1398_v41 = vpop.f32.mrf.mxu0  ;;  %v1568_v60 = vsub.s32 0, %v1567_v56 }
 0x476   : > { %v1433_v59 = vmax.f32 %v1334_v28, 0.0  ;;  %v1431_v13 = vmax.f32 %v1398_v41, 0.0  ;;  %v2642_v28 = vld [vmem:[#allocation5 + $0x10] sm:$0xff]  }
 0x477   : > { %v1336_v17 = vpop.f32.mrf.mxu1 }
 0x478   : > { %v3816_v3 = vpop.f32.mrf.mxu0  ;;  %v1452_v37 = vadd.f32 %v1433_v59, %v1432_v43  ;;  %v3820_v39 = vadd.f32 %v1451_v31, %v1431_v13  ;;  %v1435_v22 = vmax.f32 %v1336_v17, 0.0  ;;  %v2639_v43 = vunpack.c.l.bf16 %v2643_v63 }
 0x479   : > { %v1338_v21 = vpop.f32.mrf.mxu1 }
 0x47a   : > { %v1411_v29 = vpop.f32.mrf.mxu0  ;;  %v1436_v15 = vmax.f32 %v1338_v21, 0.0  ;;  %v1948_v16 = vpack.c.bf16 %v3820_v39, %v3818_v14  ;;  %v3824_v42 = vadd.f32 %v1452_v37, %v1434_v2  ;;  %v2627_v37 = vunpack.c.l.bf16 %v2626_v9  ;;  %v2978_v14 = vld [vmem:[#allocation11 + $0x28] sm:$0xff]   ;;  %v2980_v39 = vld [vmem:[#allocation11 + $0x18] sm:$0xff]  }
 0x47b   : > { %v1342_v18 = vpop.f32.mrf.mxu1  ;;  %v1440_v12 = vmax.f32 %v1411_v29, 0.0  ;;  %v2628_v29 = vunpack.c.h.bf16 %v2626_v9  ;;  %v1446_v2 = vmax.f32 %v3816_v3, 0.0 }
 0x47c   : > { %v1453_v7 = vadd.f32 %v1436_v15, %v1435_v22  ;;  %v2744_v19 = vpop.f32.mrf.mxu0  ;;  %v1438_v47 = vmax.f32 %v1342_v18, 0.0  ;;  %v2631_v22 = vunpack.c.l.bf16 %v2641_v36  ;;  %v2632_v15 = vunpack.c.h.bf16 %v2641_v36 }
 0x47d   : > { %v1344_v20 = vpop.f32.mrf.mxu1  ;;  %v1449_v59 = vmax.f32 %v2744_v19, 0.0  ;;  %v2635_v18 = vunpack.c.l.bf16 %v2642_v28 }
 0x47e   : > { %v3826_v24 = vadd.f32 %v1453_v7, %v1437_v61  ;;  %v1439_v50 = vmax.f32 %v1344_v20, 0.0  ;;  %v1414_v23 = vpop.f32.mrf.mxu0  ;;  %v1563_v7 = vpop.xlane.xlu0 %1562 }
 0x47f   : > { %v1346_v26 = vpop.f32.mrf.mxu1  ;;  %v1443_v32 = vmax.f32 %v1414_v23, 0.0 }
 0x480   : > { %v1949_v30 = vpack.c.bf16 %v3826_v24, %v3824_v42  ;;  %v1454_v38 = vadd.f32 %v1439_v50, %v1438_v47  ;;  %v1441_v25 = vmax.f32 %v1346_v26, 0.0  ;;  %v2636_v47 = vunpack.c.h.bf16 %v2642_v28  ;;  %v1565_v50 = vpop.xlane.xlu1 %1564  ;;  %v2982_v42 = vld [vmem:[#allocation11 + $0x8] sm:$0xff]  }
 0x481   : > { %v1348_v44 = vpop.f32.mrf.mxu1 }
 0x482   : > { %v1442_v49 = vmax.f32 %v1348_v44, 0.0  ;;  %v3830_v45 = vadd.f32 %v1454_v38, %v1440_v12  ;;  %v2640_v44 = vunpack.c.h.bf16 %v2643_v63 }
 0x483   : > { %v1352_v5 = vpop.f32.mrf.mxu1 }
 0x484   : > { %v1455_v4 = vadd.f32 %v1442_v49, %v1441_v25  ;;  %v1444_v35 = vmax.f32 %v1352_v5, 0.0 }
 0x485   : > { %v1354_v46 = vpop.f32.mrf.mxu1 }
 0x486   : > { %v3832_v34 = vadd.f32 %v1455_v4, %v1443_v32  ;;  %v1445_v57 = vmax.f32 %v1354_v46, 0.0 }
 0x487   : > { %v1356_v52 = vpop.f32.mrf.mxu1 }
 0x488   : > { %v1456_v54 = vadd.f32 %v1445_v57, %v1444_v35  ;;  %v1950_v1 = vpack.c.bf16 %v3832_v34, %v3830_v45  ;;  %v1447_v27 = vmax.f32 %v1356_v52, 0.0 }
 0x489   : > { %v1358_v6 = vpop.f32.mrf.mxu1 }
 0x48a   : > { %v1448_v31 = vmax.f32 %v1358_v6, 0.0  ;;  %v3839_v23 = vadd.f32 %v1456_v54, %v1446_v2 }
 0x48c   : > { %v1534_v41 = vpop.f32.mrf.mxu1  ;;  %v1457_v13 = vadd.f32 %v1448_v31, %v1447_v27 }
 0x48d   : > { %v1569_v17 = vrot.slane %v1534_v41, %v1568_v60 }
 0x48e   : > { %v2763_v21 = vpop.f32.mrf.mxu1  ;;  %v3837_v61 = vadd.f32 %v1457_v13, %v1449_v59 }
 0x48f   : > { %v1570_v20 = vadd.f32 %v1569_v17, %v1551_v11  ;;  %v1571_v26 = vadd.f32 %v1569_v17, %v1553_v33  ;;  %v1572_v38 = vadd.f32 %v1569_v17, %v1555_v53  ;;  %v1573_v48 = vadd.f32 %v1569_v17, %v1557_v58 }
 0x490   : > { %v1574_v19 = vadd.f32 %v1569_v17, %v1559_v55  ;;  %v1575_v49 = vadd.f32 %v1569_v17, %v1561_v8  ;;  %v1576_v5 = vadd.f32 %v1569_v17, %v1563_v7  ;;  %v1577_v3 = vadd.f32 %v1569_v17, %v1565_v50 }
 0x491   : > { %v1594_v25 = vadd.f32 %v2627_v37, %v1570_v20  ;;  %v1595_v12 = vadd.f32 %v2628_v29, %v1571_v26  ;;  %v1596_v32 = vadd.f32 %v2631_v22, %v1572_v38  ;;  %v1597_v4 = vadd.f32 %v2632_v15, %v1573_v48 }
 0x492   : > { %v1598_v46 = vadd.f32 %v2635_v18, %v1574_v19  ;;  %v1599_v35 = vadd.f32 %v2636_v47, %v1575_v49  ;;  %v1951_v33 = vpack.c.bf16 %v3837_v61, %v3839_v23  ;;  %v1600_v54 = vadd.f32 %v2639_v43, %v1576_v5 }
 0x493   : > { %v1602_v56 = vmul.f32 0.2, %v1594_v25  ;;  %v1603_v11 = vmul.f32 0.2, %v1595_v12  ;;  %v1604_v57 = vmul.f32 0.2, %v1596_v32  ;;  %v1601_v6 = vadd.f32 %v2640_v44, %v1577_v3 }
 0x494   : > { %v1605_v52 = vmul.f32 0.2, %v1597_v4  ;;  %v1606_v63 = vmul.f32 0.2, %v1598_v46  ;;  %v1607_v27 = vmul.f32 0.2, %v1599_v35 }
 0x495   : > { %v1610_v53 = vmax.f32 %v1594_v25, %v1602_v56  ;;  %v1611_v58 = vmax.f32 %v1595_v12, %v1603_v11  ;;  %v1612_v60 = vmax.f32 %v1596_v32, %v1604_v57  ;;  %v1608_v28 = vmul.f32 0.2, %v1600_v54 }
 0x496   : > { %v1613_v9 = vmax.f32 %v1597_v4, %v1605_v52  ;;  %v1614_v36 = vmax.f32 %v1598_v46, %v1606_v63  ;;  %v1615_v59 = vmax.f32 %v1599_v35, %v1607_v27  ;;  %v1609_v43 = vmul.f32 0.2, %v1601_v6 }
 0x497   : > { %v1618_v55 = vsel %vm1183_vm0, %v1610_v53, -inf  ;;  %v1621_v8 = vsel %vm1183_vm0, %v1611_v58, -inf  ;;  %v1624_v31 = vsel %vm1183_vm0, %v1612_v60, -inf  ;;  %v1616_v17 = vmax.f32 %v1600_v54, %v1608_v28 }
 0x498   : > { %1619 = vmax.xlane.f32.xlu0 %v1618_v55  ;;  %1622 = vmax.xlane.f32.xlu1 %v1621_v8  ;;  %v1627_v41 = vsel %vm1183_vm0, %v1613_v9, -inf  ;;  %v1630_v13 = vsel %vm1183_vm0, %v1614_v36, -inf  ;;  %v1633_v37 = vsel %vm1183_vm0, %v1615_v59, -inf  ;;  %v1617_v21 = vmax.f32 %v1601_v6, %v1609_v43 }
 0x499   : > { %v1636_v29 = vsel %vm1183_vm0, %v1616_v17, -inf }
 0x49a   : > { %v1639_v22 = vsel %vm1183_vm0, %v1617_v21, -inf }
 0x49c   : > { %1625 = vmax.xlane.f32.xlu0 %v1624_v31  ;;  %1628 = vmax.xlane.f32.xlu1 %v1627_v41 }
 0x4a0   : > { %1631 = vmax.xlane.f32.xlu0 %v1630_v13  ;;  %1634 = vmax.xlane.f32.xlu1 %v1633_v37 }
 0x4a4   : > { %1637 = vmax.xlane.f32.xlu0 %v1636_v29  ;;  %1640 = vmax.xlane.f32.xlu1 %v1639_v22 }
 0x521   : > { %v1620_v15 = vpop.xlane.xlu0 %1619  ;;  %v1623_v2 = vpop.xlane.xlu1 %1622 }
 0x522   : > { %v1642_v18 = vsub.f32 %v1610_v53, %v1620_v15  ;;  %v1643_v7 = vsub.f32 %v1611_v58, %v1623_v2 }
 0x524   : > { %v1650_v20 = vmul.f32 1.442695, %v1642_v18  ;;  %v1652_v47 = vmul.f32 1.442695, %v1643_v7 }
 0x525   : > { %v1626_v50 = vpop.xlane.xlu0 %1625  ;;  %v1629_v38 = vpop.xlane.xlu1 %1628 }
 0x526   : > { %3016 = vpow2.f32 %v1650_v20  ;;  %v1644_v26 = vsub.f32 %v1612_v60, %v1626_v50  ;;  %v1645_v48 = vsub.f32 %v1613_v9, %v1629_v38 }
 0x527   : > { %3018 = vpow2.f32 %v1652_v47  ;;  %v2960_v47 = vld [vmem:[#allocation10 + $0x38] sm:$0xff]  }
 0x528   : > { %v1654_v19 = vmul.f32 1.442695, %v1644_v26  ;;  %v1656_v44 = vmul.f32 1.442695, %v1645_v48  ;;  %2780 = vmatprep.subr.bf16.mxu0 %v2960_v47  ;;  %v2962_v48 = vld [vmem:[#allocation8 + $0x38] sm:$0xff]  }
 0x529   : > { %v1632_v25 = vpop.xlane.xlu0 %1631  ;;  %v1635_v5 = vpop.xlane.xlu1 %1634  ;;  %2804 = vmatprep.subr.bf16.mxu1 %v2962_v48 }
 0x52a   : > { %3020 = vpow2.f32 %v1654_v19  ;;  %v1646_v49 = vsub.f32 %v1614_v36, %v1632_v25  ;;  %v1647_v12 = vsub.f32 %v1615_v59, %v1635_v5 }
 0x52b   : > { %3022 = vpow2.f32 %v1656_v44 }
 0x52c   : > { %v1658_v32 = vmul.f32 1.442695, %v1646_v49  ;;  %v1660_v4 = vmul.f32 1.442695, %v1647_v12 }
 0x52d   : > { %v1638_v3 = vpop.xlane.xlu0 %1637  ;;  %v1641_v46 = vpop.xlane.xlu1 %1640 }
 0x52e   : > { %3024 = vpow2.f32 %v1658_v32  ;;  %v1648_v56 = vsub.f32 %v1616_v17, %v1638_v3  ;;  %v1649_v35 = vsub.f32 %v1617_v21, %v1641_v46 }
 0x52f   : > { %3026 = vpow2.f32 %v1660_v4 }
 0x530   : > { %v1662_v11 = vmul.f32 1.442695, %v1648_v56  ;;  %v1664_v57 = vmul.f32 1.442695, %v1649_v35 }
 0x532   : > { %3028 = vpow2.f32 %v1662_v11  ;;  %v2961_v11 = vld [vmem:[#allocation10 + $0x30] sm:$0xff]  }
 0x533   : > { %v3017_v52 = vpop.eup %3016  ;;  %3030 = vpow2.f32 %v1664_v57 }
 0x534   : > { %v3019_v53 = vpop.eup %3018  ;;  %v1666_v58 = vsel %vm1183_vm0, %v3017_v52, 0.0 }
 0x535   : > { %1667 = vadd.xlane.f32.xlu0 %v1666_v58  ;;  %v1669_v54 = vsel %vm1183_vm0, %v3019_v53, 0.0 }
 0x536   : > { %1670 = vadd.xlane.f32.xlu1 %v1669_v54  ;;  %v2964_v54 = vld [vmem:[#allocation8 + $0x30] sm:$0xff]  }
 0x537   : > { %v3021_v55 = vpop.eup %3020 }
 0x538   : > { %v3023_v60 = vpop.eup %3022  ;;  %v1672_v63 = vsel %vm1183_vm0, %v3021_v55, 0.0 }
 0x539   : > { %1673 = vadd.xlane.f32.xlu0 %v1672_v63  ;;  %v1675_v6 = vsel %vm1183_vm0, %v3023_v60, 0.0  ;;  %v2966_v63 = vld [vmem:[#allocation8 + $0x28] sm:$0xff]  }
 0x53a   : > { %1676 = vadd.xlane.f32.xlu1 %v1675_v6  ;;  %v2967_v6 = vld [vmem:[#allocation10 + $0x18] sm:$0xff]  }
 0x53b   : > { %v3025_v8 = vpop.eup %3024 }
 0x53c   : > { %v3027_v9 = vpop.eup %3026  ;;  %v1678_v27 = vsel %vm1183_vm0, %v3025_v8, 0.0 }
 0x53d   : > { %1679 = vadd.xlane.f32.xlu0 %v1678_v27  ;;  %v1681_v31 = vsel %vm1183_vm0, %v3027_v9, 0.0  ;;  %v2968_v27 = vld [vmem:[#allocation8 + $0x20] sm:$0xff]  }
 0x53e   : > { %1682 = vadd.xlane.f32.xlu1 %v1681_v31  ;;  %v2969_v31 = vld [vmem:[#allocation10 + $0x10] sm:$0xff]  }
 0x53f   : > { %v3029_v36 = vpop.eup %3028 }
 0x540   : > { %v3031_v28 = vpop.eup %3030  ;;  %v1684_v41 = vsel %vm1183_vm0, %v3029_v36, 0.0 }
 0x541   : > { %1685 = vadd.xlane.f32.xlu0 %v1684_v41  ;;  %v1687_v59 = vsel %vm1183_vm0, %v3031_v28, 0.0  ;;  %v2971_v41 = vld [vmem:[#allocation10 + $0x8] sm:$0xff]  }
 0x542   : > { %1688 = vadd.xlane.f32.xlu1 %v1687_v59 }
 0x5be   : > { %v1668_v43 = vpop.xlane.xlu0 %1667 }
 0x5bf   : > { %3032 = vrcp.f32 %v1668_v43  ;;  %v1671_v13 = vpop.xlane.xlu1 %1670 }
 0x5c0   : > { %3034 = vrcp.f32 %v1671_v13  ;;  %v2972_v13 = vld [vmem:[#allocation8 + $0x10] sm:$0xff]  }
 0x5c2   : > { %v1674_v17 = vpop.xlane.xlu0 %1673 }
 0x5c3   : > { %3036 = vrcp.f32 %v1674_v17  ;;  %v1677_v37 = vpop.xlane.xlu1 %1676  ;;  %v2973_v17 = vld [vmem:[#allocation10] sm:$0xff]  }
 0x5c4   : > { %3038 = vrcp.f32 %v1677_v37  ;;  %v2976_v37 = vld [vmem:[#allocation11 + $0x38] sm:$0xff]  }
 0x5c6   : > { %v1680_v21 = vpop.xlane.xlu0 %1679 }
 0x5c7   : > { %3040 = vrcp.f32 %v1680_v21  ;;  %v1683_v18 = vpop.xlane.xlu1 %1682  ;;  %v2975_v21 = vld [vmem:[#allocation8] sm:$0xff]  }
 0x5c8   : > { %3042 = vrcp.f32 %v1683_v18 }
 0x5ca   : > { %v1686_v20 = vpop.xlane.xlu0 %1685 }
 0x5cb   : > { %3044 = vrcp.f32 %v1686_v20  ;;  %v1689_v38 = vpop.xlane.xlu1 %1688 }
 0x5cc   : > { %v3033_v29 = vpop.eup %3032  ;;  %3046 = vrcp.f32 %v1689_v38 }
 0x5cd   : > { %v1698_v22 = vmul.f32 %v3033_v29, %v3017_v52  ;;  %v3035_v15 = vpop.eup %3034  ;;  %v2963_v52 = vld [vmem:[#allocation10 + $0x28] sm:$0xff]   ;;  %v2977_v29 = vld [vmem:[#allocation11 + $0x30] sm:$0xff]  }
 0x5ce   : > { %v1699_v2 = vmul.f32 %v3035_v15, %v3019_v53 }
 0x5cf   : > { %1706 = vxpose.xlu0.b32.start [1/8] (short) (narrow) %v1698_v22, 64 }
 0x5d0   : > { %v3037_v7 = vpop.eup %3036 }
 0x5d1   : > { %v1700_v50 = vmul.f32 %v3037_v7, %v3021_v55  ;;  %v3039_v26 = vpop.eup %3038  ;;  %v2965_v55 = vld [vmem:[#allocation10 + $0x20] sm:$0xff]  }
 0x5d2   : > { %v1701_v19 = vmul.f32 %v3039_v26, %v3023_v60 }
 0x5d3   : > { %1707 = vxpose.xlu0.b32.cont [2/8] (short) (narrow) %v1699_v2, 64 }
 0x5d4   : > { %v3041_v44 = vpop.eup %3040 }
 0x5d5   : > { %v1702_v25 = vmul.f32 %v3041_v44, %v3025_v8  ;;  %v3043_v49 = vpop.eup %3042 }
 0x5d6   : > { %v1703_v5 = vmul.f32 %v3043_v49, %v3027_v9 }
 0x5d7   : > { %1708 = vxpose.xlu0.b32.cont [3/8] (short) (narrow) %v1700_v50, 64 }
 0x5d8   : > { %v3045_v12 = vpop.eup %3044 }
 0x5d9   : > { %v1704_v32 = vmul.f32 %v3045_v12, %v3029_v36  ;;  %v3047_v4 = vpop.eup %3046 }
 0x5da   : > { %v1705_v3 = vmul.f32 %v3047_v4, %v3031_v28  ;;  %v2970_v28 = vld [vmem:[#allocation8 + $0x18] sm:$0xff]  }
 0x5db   : > { %1709 = vxpose.xlu0.b32.cont [4/8] (short) (narrow) %v1701_v19, 64 }
 0x5df   : > { %1710 = vxpose.xlu0.b32.cont [5/8] (short) (narrow) %v1702_v25, 64 }
 0x5e3   : > { %1711 = vxpose.xlu0.b32.cont [6/8] (short) (narrow) %v1703_v5, 64 }
 0x5e7   : > { %1712 = vxpose.xlu0.b32.cont [7/8] (short) (narrow) %v1704_v32, 64 }
 0x5eb   : > { %1713 = vxpose.xlu0.b32.end [8/8] (short) (narrow) %v1705_v3, 64 }
 0x64b   : > { %v1722_v56 = vpop.trf.xlu0 }
 0x64f   : > { %v1723_v46 = vpop.trf.xlu0 }
 0x650   : > { %v1738_v35 = vpack.c.bf16 %v1723_v46, %v1722_v56 }
 0x652   : > { %2585 = vmatmul.mubr.msk.bf16.vlgmr.msra.gmra.mxu0 %vm1183_vm0, %v1738_v35  ;;  %2772 = vmatprep.mubr.msk.bf16.mxu1 %vm1183_vm0, %v1738_v35 }
 0x653   : > { %v1724_v57 = vpop.trf.xlu0  ;;  %2781 = vmatpush3.bf16.msra.mxu0 %v2960_v47  ;;  %1796 = vmatprep.mubr.bf16.mxu0 %v3296_v0 }
 0x654   : > { %2782 = vmatprep.subr.bf16.mxu0 %v2961_v11 }
 0x657   : > { %v1725_v53 = vpop.trf.xlu0  ;;  %2783 = vmatpush3.bf16.msra.mxu0 %v2961_v11 }
 0x658   : > { %v1739_v58 = vpack.c.bf16 %v1725_v53, %v1724_v57  ;;  %2784 = vmatprep.subr.bf16.mxu0 %v2963_v52 }
 0x65a   : > { %2586 = vmatmul.mubr.msk.bf16.gmra.mxu0 %vm1183_vm0, %v1739_v58  ;;  %2773 = vmatmul.mubr.msk.bf16.vlgmr.msra.gmra.mxu1 %vm1183_vm0, %v1739_v58 }
 0x65b   : > { %2805 = vmatpush3.bf16.msra.mxu1 %v2962_v48  ;;  %v1726_v60 = vpop.trf.xlu0  ;;  %2785 = vmatpush3.bf16.msra.mxu0 %v2963_v52 }
 0x65c   : > { %2806 = vmatprep.subr.bf16.mxu1 %v2964_v54  ;;  %2786 = vmatprep.subr.bf16.mxu0 %v2965_v55 }
 0x65d   : > { %1806 = vmatprep.mubr.bf16.mxu0 %v3296_v0 }
 0x65f   : > { %2807 = vmatpush3.bf16.msra.mxu1 %v2964_v54  ;;  %v1727_v8 = vpop.trf.xlu0  ;;  %2787 = vmatpush3.bf16.msra.mxu0 %v2965_v55 }
 0x660   : > { %v1740_v9 = vpack.c.bf16 %v1727_v8, %v1726_v60  ;;  %2808 = vmatprep.subr.bf16.mxu1 %v2966_v63  ;;  %2788 = vmatprep.subr.bf16.mxu0 %v2967_v6 }
 0x662   : > { %2587 = vmatmul.mubr.msk.bf16.gmra.mxu0 %vm1183_vm0, %v1740_v9  ;;  %2776 = vmatprep.mubr.msk.bf16.mxu1 %vm1183_vm0, %v1740_v9 }
 0x663   : > { %2809 = vmatpush3.bf16.msra.mxu1 %v2966_v63  ;;  %v1728_v36 = vpop.trf.xlu0  ;;  %2789 = vmatpush3.bf16.msra.mxu0 %v2967_v6 }
 0x664   : > { %2810 = vmatprep.subr.bf16.mxu1 %v2968_v27  ;;  %2790 = vmatprep.subr.bf16.mxu0 %v2969_v31 }
 0x665   : > { %1816 = vmatprep.mubr.bf16.mxu0 %v3296_v0  ;;  %v2974_v0 = vld [vmem:[#allocation8 + $0x8] sm:$0xff]  }
 0x667   : > { %2811 = vmatpush3.bf16.msra.mxu1 %v2968_v27  ;;  %v1729_v59 = vpop.trf.xlu0  ;;  %2791 = vmatpush3.bf16.msra.mxu0 %v2969_v31 }
 0x668   : > { %v1741_v43 = vpack.c.bf16 %v1729_v59, %v1728_v36  ;;  %2812 = vmatprep.subr.bf16.mxu1 %v2970_v28  ;;  %2792 = vmatprep.subr.bf16.mxu0 %v2971_v41 }
 0x66a   : > { %2588 = vmatmul.mubr.msk.bf16.gmra.mxu0 %vm1183_vm0, %v1741_v43  ;;  %2777 = vmatmul.mubr.msk.bf16.gmra.mxu1 %vm1183_vm0, %v1741_v43 }
 0x66b   : > { %2813 = vmatpush3.bf16.msra.mxu1 %v2970_v28  ;;  %2793 = vmatpush3.bf16.msra.mxu0 %v2971_v41 }
 0x66c   : > { %2796 = vmatprep.mubr.bf16.mxu0 %v1948_v16  ;;  %2814 = vmatprep.subr.bf16.mxu1 %v2972_v13  ;;  %v2981_v16 = vld [vmem:[#allocation11 + $0x10] sm:$0xff]  }
 0x66d   : > { %2794 = vmatprep.subr.bf16.mxu0 %v2973_v17  ;;  %2820 = vmatprep.mubr.bf16.mxu1 %v3555_v40  ;;  %v2979_v40 = vld [vmem:[#allocation11 + $0x20] sm:$0xff]  }
 0x66f   : > { %2815 = vmatpush3.bf16.msra.mxu1 %v2972_v13  ;;  %2795 = vmatpush3.bf16.msra.mxu0 %v2973_v17 }
 0x670   : > { %2816 = vmatprep.subr.bf16.mxu1 %v2974_v0  ;;  %2828 = vmatprep.subr.bf16.mxu0 %v2976_v37 }
 0x672   : > { %2797 = vmatmul.mubr.bf16.vlgmr.msra.gmra.mxu0 %v1949_v30 }
 0x673   : > { %2817 = vmatpush3.bf16.msra.mxu1 %v2974_v0  ;;  %2800 = vmatprep.mubr.bf16.mxu0 %v1950_v1 }
 0x674   : > { %2818 = vmatprep.subr.bf16.mxu1 %v2975_v21  ;;  %2829 = vmatpush3.bf16.msra.mxu0 %v2976_v37 }
 0x675   : > { %2830 = vmatprep.subr.bf16.mxu0 %v2977_v29 }
 0x677   : > { %2819 = vmatpush3.bf16.msra.mxu1 %v2975_v21 }
 0x678   : > { %2831 = vmatpush3.bf16.msra.mxu0 %v2977_v29 }
 0x679   : > { %2832 = vmatprep.subr.bf16.mxu0 %v2978_v14 }
 0x67a   : > { %2821 = vmatmul.mubr.bf16.vlgmr.msra.gmra.mxu1 %v3567_v51  ;;  %2801 = vmatmul.mubr.bf16.gmra.mxu0 %v1951_v33  ;;  %v2983_v51 = vld [vmem:[#allocation11] sm:$0xff]  }
 0x67b   : > { %2824 = vmatprep.mubr.bf16.mxu1 %v3579_v62 }
 0x67c   : > { %2833 = vmatpush3.bf16.msra.mxu0 %v2978_v14 }
 0x67d   : > { %2834 = vmatprep.subr.bf16.mxu0 %v2979_v40 }
 0x680   : > { %2835 = vmatpush3.bf16.msra.mxu0 %v2979_v40 }
 0x681   : > { %2836 = vmatprep.subr.bf16.mxu0 %v2980_v39 }
 0x682   : > { %2825 = vmatmul.mubr.bf16.gmra.mxu1 %v3591_v10 }
 0x684   : > { %2837 = vmatpush3.bf16.msra.mxu0 %v2980_v39 }
 0x685   : > { %2838 = vmatprep.subr.bf16.mxu0 %v2981_v16 }
 0x688   : > { %2839 = vmatpush3.bf16.msra.mxu0 %v2981_v16 }
 0x689   : > { %2840 = vmatprep.subr.bf16.mxu0 %v2982_v42 }
 0x68c   : > { %2841 = vmatpush3.bf16.msra.mxu0 %v2982_v42 }
 0x68d   : > { %2842 = vmatprep.subr.bf16.mxu0 %v2983_v51 }
 0x690   : > { %2843 = vmatpush3.bf16.msra.mxu0 %v2983_v51 }
 0x712   : > { %v1788_v24 = vpop.f32.mrf.mxu0 }
 0x713   : > { %v1892_v15 = vmax.f32 %v1788_v24, 0.0 }
 0x714   : > { %v1790_v62 = vpop.f32.mrf.mxu0 }
 0x715   : > { %v1893_v1 = vmax.f32 %v1790_v62, 0.0 }
 0x716   : > { %v1792_v30 = vpop.f32.mrf.mxu0 }
 0x717   : > { %v1895_v18 = vmax.f32 %v1792_v30, 0.0  ;;  %v1916_v50 = vadd.f32 %v1893_v1, %v1892_v15 }
 0x718   : > { %v1794_v45 = vpop.f32.mrf.mxu0 }
 0x719   : > { %v1896_v61 = vmax.f32 %v1794_v45, 0.0 }
 0x71a   : > { %v1798_v10 = vpop.f32.mrf.mxu0  ;;  %v2774_v34 = vpop.f32.mrf.mxu1 }
 0x71b   : > { %v1898_v20 = vmax.f32 %v1798_v10, 0.0  ;;  %v1917_v26 = vadd.f32 %v1896_v61, %v1895_v18  ;;  %v1900_v5 = vmax.f32 %v2774_v34, 0.0 }
 0x71c   : > { %v1800_v23 = vpop.f32.mrf.mxu0  ;;  %v1861_v33 = vpop.f32.mrf.mxu1 }
 0x71d   : > { %v1899_v22 = vmax.f32 %v1800_v23, 0.0  ;;  %v1894_v47 = vmax.f32 %v1861_v33, 0.0 }
 0x71e   : > { %v1802_v2 = vpop.f32.mrf.mxu0  ;;  %v2775_v7 = vpop.f32.mrf.mxu1 }
 0x71f   : > { %v1918_v19 = vadd.f32 %v1899_v22, %v1898_v20  ;;  %v1901_v44 = vmax.f32 %v1802_v2, 0.0  ;;  %v1924_v32 = vadd.f32 %v1916_v50, %v1894_v47  ;;  %v1903_v4 = vmax.f32 %v2775_v7, 0.0  ;;  %v2617_v50 = vld [vmem:[%s3958_s7] ss:$0 sm:$0xff] }
 0x720   : > { %v1804_v38 = vpop.f32.mrf.mxu0  ;;  %v1864_v48 = vpop.f32.mrf.mxu1 }
 0x721   : > { %v1902_v25 = vmax.f32 %v1804_v38, 0.0  ;;  %v1897_v49 = vmax.f32 %v1864_v48, 0.0  ;;  %v1926_v35 = vadd.f32 %v1918_v19, %v1900_v5 }
 0x722   : > { %v1808_v12 = vpop.f32.mrf.mxu0 }
 0x723   : > { %v1919_v3 = vadd.f32 %v1902_v25, %v1901_v44  ;;  %v1925_v56 = vadd.f32 %v1917_v26, %v1897_v49  ;;  %v1904_v27 = vmax.f32 %v1808_v12, 0.0 }
 0x724   : > { %v1810_v46 = vpop.f32.mrf.mxu0 }
 0x725   : > { %v1927_v11 = vadd.f32 %v1919_v3, %v1903_v4  ;;  %v2194_v57 = vpack.c.bf16 %v1925_v56, %v1924_v32  ;;  %v1905_v60 = vmax.f32 %v1810_v46, 0.0 }
 0x726   : > { %v1812_v52 = vpop.f32.mrf.mxu0 }
 0x727   : > { %v2195_v53 = vpack.c.bf16 %v1927_v11, %v1926_v35  ;;  %2844 = vmatprep.mubr.bf16.mxu0 %v2194_v57  ;;  %v1907_v31 = vmax.f32 %v1812_v52, 0.0  ;;  %v1920_v43 = vadd.f32 %v1905_v60, %v1904_v27 }
 0x728   : > { %v1814_v58 = vpop.f32.mrf.mxu0 }
 0x729   : > { %2845 = vmatmul.mubr.bf16.vlgmr.msra.gmra.mxu0 %v2195_v53  ;;  %v1908_v63 = vmax.f32 %v1814_v58, 0.0 }
 0x72a   : > { %v1818_v54 = vpop.f32.mrf.mxu0  ;;  %v2778_v55 = vpop.f32.mrf.mxu1 }
 0x72b   : > { %v1910_v41 = vmax.f32 %v1818_v54, 0.0  ;;  %v1921_v13 = vadd.f32 %v1908_v63, %v1907_v31  ;;  %v1912_v40 = vmax.f32 %v2778_v55, 0.0 }
 0x72c   : > { %v1820_v6 = vpop.f32.mrf.mxu0  ;;  %v1877_v8 = vpop.f32.mrf.mxu1 }
 0x72d   : > { %v1911_v9 = vmax.f32 %v1820_v6, 0.0  ;;  %v1906_v59 = vmax.f32 %v1877_v8, 0.0 }
 0x72e   : > { %v1822_v36 = vpop.f32.mrf.mxu0  ;;  %v2779_v28 = vpop.f32.mrf.mxu1 }
 0x72f   : > { %v1922_v37 = vadd.f32 %v1911_v9, %v1910_v41  ;;  %v1913_v21 = vmax.f32 %v1822_v36, 0.0  ;;  %v1928_v39 = vadd.f32 %v1920_v43, %v1906_v59  ;;  %v1915_v16 = vmax.f32 %v2779_v28, 0.0 }
 0x730   : > { %v1824_v17 = vpop.f32.mrf.mxu0  ;;  %v1880_v0 = vpop.f32.mrf.mxu1 }
 0x731   : > { %v1914_v29 = vmax.f32 %v1824_v17, 0.0  ;;  %v1909_v14 = vmax.f32 %v1880_v0, 0.0  ;;  %v1930_v24 = vadd.f32 %v1922_v37, %v1912_v40 }
 0x732   : > { %v2798_v10 = vpop.f32.mrf.mxu0 }
 0x733   : > { %v1923_v42 = vadd.f32 %v1914_v29, %v1913_v21  ;;  %v1929_v51 = vadd.f32 %v1921_v13, %v1909_v14 }
 0x734   : > { %v2050_v34 = vpop.f32.mrf.mxu0 }
 0x735   : > { %v1931_v62 = vadd.f32 %v1923_v42, %v1915_v16  ;;  %v2196_v30 = vpack.c.bf16 %v1929_v51, %v1928_v39 }
 0x736   : > { %v2799_v1 = vpop.f32.mrf.mxu0 }
 0x737   : > { %2848 = vmatprep.mubr.bf16.mxu0 %v2196_v30  ;;  %v2197_v45 = vpack.c.bf16 %v1931_v62, %v1930_v24 }
 0x738   : > { %v2053_v61 = vpop.f32.mrf.mxu0 }
 0x739   : > { %2849 = vmatmul.mubr.bf16.gmra.mxu0 %v2197_v45 }
 0x73a   : > { %v2802_v23 = vpop.f32.mrf.mxu0  ;;  %v2822_v33 = vpop.f32.mrf.mxu1 }
 0x73b   : > { %v2172_v20 = vadd.f32 %v2822_v33, %v2798_v10 }
 0x73c   : > { %v2066_v22 = vpop.f32.mrf.mxu0  ;;  %v2163_v15 = vpop.f32.mrf.mxu1 }
 0x73d   : > { %v2164_v26 = vadd.f32 %v2163_v15, %v2050_v34 }
 0x73e   : > { %v2803_v18 = vpop.f32.mrf.mxu0  ;;  %v2823_v2 = vpop.f32.mrf.mxu1 }
 0x73f   : > { %v2175_v44 = vadd.f32 %v2823_v2, %v2799_v1 }
 0x740   : > { %v2069_v7 = vpop.f32.mrf.mxu0  ;;  %v2166_v48 = vpop.f32.mrf.mxu1 }
 0x741   : > { %v2167_v12 = vadd.f32 %v2166_v48, %v2053_v61 }
 0x742   : > { %v2826_v3 = vpop.f32.mrf.mxu1 }
 0x743   : > { %v2188_v53 = vadd.f32 %v2826_v3, %v2802_v23 }
 0x744   : > { %v2179_v57 = vpop.f32.mrf.mxu1 }
 0x745   : > { %v2180_v54 = vadd.f32 %v2179_v57, %v2066_v22 }
 0x746   : > { %v2827_v52 = vpop.f32.mrf.mxu1 }
 0x747   : > { %v2191_v6 = vadd.f32 %v2827_v52, %v2803_v18 }
 0x748   : > { %v2182_v60 = vpop.f32.mrf.mxu1 }
 0x749   : > { %v2183_v31 = vadd.f32 %v2182_v60, %v2069_v7 }
 0x7e9   : > { %v2846_v47 = vpop.f32.mrf.mxu0 }
 0x7ea   : > { %v2329_v38 = vadd.f32 %v2846_v47, %v2172_v20 }
 0x7eb   : > { %v2296_v19 = vpop.f32.mrf.mxu0 }
 0x7ec   : > { %v2344_v25 = vadd.f32 %v2617_v50, %v2329_v38  ;;  %v2327_v49 = vadd.f32 %v2296_v19, %v2164_v26 }
 0x7ed   : > { %v2847_v5 = vpop.f32.mrf.mxu0 }
 0x7ee   : > { %2352 = vst [vmem:[%s3891_s10 + $0x10] sm:$0xff] %v2344_v25  ;;  %v2342_v32 = vadd.f32 %v2617_v50, %v2327_v49  ;;  %v2330_v4 = vadd.f32 %v2847_v5, %v2175_v44 }
 0x7ef   : > { %v2299_v56 = vpop.f32.mrf.mxu0 }
 0x7f0   : > { %2350 = vst [vmem:[%s3891_s10] sm:$0xff] %v2342_v32  ;;  %v2345_v46 = vadd.f32 %v2617_v50, %v2330_v4  ;;  %v2328_v35 = vadd.f32 %v2299_v56, %v2167_v12 }
 0x7f2   : > { %2353 = vst [vmem:[%s3891_s10 + $0x18] sm:$0xff] %v2345_v46  ;;  %v2343_v11 = vadd.f32 %v2617_v50, %v2328_v35 }
 0x7f4   : > { %2351 = vst [vmem:[%s3891_s10 + $0x8] sm:$0xff] %v2343_v11 }
 0x7f9   : > { %v2850_v58 = vpop.f32.mrf.mxu0 }
 0x7fa   : > { %v2333_v55 = vadd.f32 %v2850_v58, %v2188_v53 }
 0x7fb   : > { %v2312_v63 = vpop.f32.mrf.mxu0 }
 0x7fc   : > { %v2348_v8 = vadd.f32 %v2617_v50, %v2333_v55  ;;  %v2331_v9 = vadd.f32 %v2312_v63, %v2180_v54 }
 0x7fd   : > { %v2851_v27 = vpop.f32.mrf.mxu0 }
 0x7fe   : > { %2356 = vst [vmem:[%s3891_s10 + $0x30] sm:$0xff] %v2348_v8  ;;  %v2346_v36 = vadd.f32 %v2617_v50, %v2331_v9  ;;  %v2334_v28 = vadd.f32 %v2851_v27, %v2191_v6 }
 0x7ff   : > { %v2315_v41 = vpop.f32.mrf.mxu0 }
 0x800   : > { %2354 = vst [vmem:[%s3891_s10 + $0x20] sm:$0xff] %v2346_v36  ;;  %v2349_v59 = vadd.f32 %v2617_v50, %v2334_v28  ;;  %v2332_v43 = vadd.f32 %v2315_v41, %v2183_v31 }
 0x802   : > { %2357 = vst [vmem:[%s3891_s10 + $0x38] sm:$0xff] %v2349_v59  ;;  %v2347_v13 = vadd.f32 %v2617_v50, %v2332_v43 }
 0x804   : > { %2355 = vst [vmem:[%s3891_s10 + $0x28] sm:$0xff] %v2347_v13 }
 0x805   : > { %3219 = shalt.err (!%p3216_p3)
}
 0x806   : > { %s3220_s9 = scalar_lea.hbm %s3906_s2, 1024  ;;  %s3224_s16 = scalar_lea.hbm %s3959_s8, 2048 }
 0x807   : > { %p3221_p4 = scmp.ne.s32.totalorder %s3906_s2, %s3220_s9  ;;  %p3225_p2 = scmp.lt.s32.totalorder %s3906_s2, %s3959_s8 }
 0x808   : > { %p3226_p7 = scmp.lt.s32.totalorder %s3224_s16, %s3220_s9 }
 0x809   : > { %p3222_p12 = pnand %p3221_p4, %p3983_p11 }
 0x80a   : > { %p3227_p8 = por %p3226_p7, %p3225_p2 }
 0x80b   : > { %p3223_p6 = pneg %p3222_p12 }
 0x80d   : > { %p3228_p10 = pnand %p3227_p8, %p3223_p6 }
 0x80f   : > { %3231 = shalt.err (!%p3228_p10)
}
 0x810   : > { %s3300_s19 = smov 128   ;;  %s3301_s17 = smov 8  }
 0x811   : > { %2874 = dma.vmem_to_hbm [thread:$0]  (%p3983_p11), %s3900_s21, 1024, %s3906_s2, %s2359_s24, %s3300_s19, %s3300_s19, %s3301_s17  }
 0x812 PF: > { %s2387_s26 = sand.u32 1, %s3270_s27   ;;  %p3984_p0 = scmp.ne.s32.totalorder %s3973_s23, 0 }
 0x813   : > { %p3985_p13 = scmp.ge.s32.totalorder %s3282_s30, 2  ;;  %s2388_s11 = scalar_lea.sflag [#allocation4], %s2387_s26 }
 0x815   : > { %p2897_p5 = pnand %p3985_p13, %p3984_p0 }
 0x817   : > { %p2898_p9 = pneg %p2897_p5 }
 0x819   : > { %3265 = dma.done.wait (%p2898_p9), %s2388_s11, 1024  }
 0x81a   : > { %3267 = vsyncadd (%p2898_p9), %s2388_s11, 4294966272  ;;  %p24_p1 = scmp.ge.s32.totalorder %s3455_s18, 4   ;;  %s3986_s27 = smov %s3274_s28 }
 0x81b   : > { %s3987_s28 = smov %s3278_s29  ;;  %s3988_s29 = smov %s3467_s14 }
 0x81c   : > { %s3989_s30 = smov %s3455_s18  ;;  %26 = sbr.rel (!%p24_p1) target bundleno = 11 (0xb), region = 117 }
 0x821   :  { %2393 = vsyncpa [#allocation3], 1 }
 0x822   :  { %2395 = vsyncpa [#allocation3 + $0x1], 1 }
 0x823   :  { %2396 = vsyncpa [#allocation6], 1 }
 0x824   :  { %2397 = vsyncpa [#allocation9], 1 }
 0x825   :  { %2398 = vsyncpa [#allocation12], 1 }
 0x826   :  { %2399 = vsyncpa [#allocation4], 1 }
 0x827   :  { %2401 = vsyncpa [#allocation4 + $0x1], 1 }

</bundles_post_ra>
